<compile_context>
chip_gen: v6e
topology: v6e:2x2x1
jax: 0.10.0
libtpu: 0.0.40
codegen_flags: <defaults>
</compile_context>

<pallas_src>
import math

import jax
import jax.numpy as jnp
import numpy as np
from jax import lax
from jax.experimental import pallas as pl
from jax.experimental.pallas import tpu as pltpu

# ----------------------------- config ---------------------------------------
B, T, S = 2, 8, 8          # batch, tgt seq len, memory (src) seq len
E, NHEAD, FF = 32, 4, 64   # d_model, heads, feedforward dim
HD = E // NHEAD
NUM_LAYERS = 3             # weight-shared decoder iterations
EPS = 1e-5
NEG_INF = -1e9
SCALE = 1.0 / math.sqrt(HD)
BT, BS = B * T, B * S      # merged-batch row counts

# Packed parameter layout (all weights pre-transposed; every kernel slice is a
# row-only slice whose column range starts at lane 0):
#   W1 [8E + FF, E]:
#     rows 0:E    self Wq^T    rows 4E:5E  cross Wq^T
#     rows E:2E   self Wk^T    rows 5E:6E  cross Wk^T
#     rows 2E:3E  self Wv^T    rows 6E:7E  cross Wv^T
#     rows 3E:4E  self Wout^T  rows 7E:8E  cross Wout^T
#     rows 8E:8E+FF  FFN linear2 W^T
#   W2 [E, FF] : FFN linear1 W^T
#   BV [18, FF]: bias / LayerNorm vectors (row indices below), cols 0:E (or 0:FF)
SA_QB, SA_KB, SA_VB, SA_OB = 0, 1, 2, 3
CA_QB, CA_KB, CA_VB, CA_OB = 4, 5, 6, 7
L2B = 8
N1W, N1B, N2W, N2B, N3W, N3B, FNW, FNB = 9, 10, 11, 12, 13, 14, 15, 16
L1B = 17
N_BV_ROWS = 18


# ----------------------- shared math helper (reference) ----------------------
def _layer_norm(x, w, b):
    mu = jnp.mean(x, axis=-1, keepdims=True)
    var = jnp.mean((x - mu) ** 2, axis=-1, keepdims=True)
    return (x - mu) * lax.rsqrt(var + EPS) * w + b


# ------------------------------- kernel --------------------------------------
def decoder_kernel(x_ref, mem_ref, smask_ref, mmask_ref,
                   w1_ref, w2_ref, bv_ref, out_ref):
    x = x_ref[...]            # [BT, E]  both batch elements stacked on sublanes
    mem = mem_ref[...]        # [BS, E]
    smask = smask_ref[...]    # [BT, BT] block-diag causal (additive)
    mmask = mmask_ref[...]    # [BT, BS] block-diag (additive)

    def bias(i, w=E):
        # [1, w] row; broadcast happens implicitly at point of use (item 7).
        return bv_ref[i:i + 1, 0:w]

    def layer_norm(y, wi, bi):
        mu = jnp.mean(y, axis=-1, keepdims=True)
        var = jnp.mean((y - mu) ** 2, axis=-1, keepdims=True)
        return (y - mu) * lax.rsqrt(var + EPS) * bias(wi) + bias(bi)

    def attention(q, k, v, w_out, b_out_row, mask):
        """Multi-head attention over the merged batch; q is pre-scaled by SCALE.
        Per-head scores/softmax/ctx, then ONE fused output-projection dot."""
        parts = []
        for h in range(NHEAD):                                  # static unroll
            sl = slice(h * HD, (h + 1) * HD)
            s = lax.dot_general(q[:, sl], k[:, sl],
                                (((1,), (1,)), ((), ())),       # q @ k^T, no .T op
                                preferred_element_type=jnp.float32) + mask
            s = s - jnp.max(s, axis=-1, keepdims=True)
            p = jnp.exp(s)
            p = p * pl.reciprocal(jnp.sum(p, axis=-1, keepdims=True), approx=True)
            parts.append(jnp.dot(p, v[:, sl], preferred_element_type=jnp.float32))
        ctx = jnp.concatenate(parts, axis=-1)                   # [BT, E]
        return jnp.dot(ctx, w_out,
                       preferred_element_type=jnp.float32) + bias(b_out_row)

    # Cross-attention K/V of memory are layer-invariant (weights are shared):
    # compute once, outside the unrolled layer loop.
    ck = jnp.dot(mem, w1_ref[5 * E:6 * E, :],
                 preferred_element_type=jnp.float32) + bias(CA_KB)     # [BS, E]
    cv = jnp.dot(mem, w1_ref[6 * E:7 * E, :],
                 preferred_element_type=jnp.float32) + bias(CA_VB)     # [BS, E]

    # ---- weight-shared decoder iterations, unrolled inside the kernel ----
    for _ in range(NUM_LAYERS):
        # self attention + residual + LN1 (split Q/K/V dots; row-only weight slices)
        q = (jnp.dot(x, w1_ref[0:E, :],
                     preferred_element_type=jnp.float32) + bias(SA_QB)) * SCALE
        k = jnp.dot(x, w1_ref[E:2 * E, :],
                    preferred_element_type=jnp.float32) + bias(SA_KB)
        v = jnp.dot(x, w1_ref[2 * E:3 * E, :],
                    preferred_element_type=jnp.float32) + bias(SA_VB)
        sa = attention(q, k, v, w1_ref[3 * E:4 * E, :], SA_OB, smask)
        x = layer_norm(x + sa, N1W, N1B)

        # cross attention + residual + LN2
        q = (jnp.dot(x, w1_ref[4 * E:5 * E, :],
                     preferred_element_type=jnp.float32) + bias(CA_QB)) * SCALE
        ca = attention(q, ck, cv, w1_ref[7 * E:8 * E, :], CA_OB, mmask)
        x = layer_norm(x + ca, N2W, N2B)

        # feedforward + residual + LN3
        h1 = jnp.maximum(
            jnp.dot(x, w2_ref[...],
                    preferred_element_type=jnp.float32) + bias(L1B, FF), 0.0)
        f = jnp.dot(h1, w1_ref[8 * E:8 * E + FF, :],
                    preferred_element_type=jnp.float32) + bias(L2B)
        x = layer_norm(x + f, N3W, N3B)

    # final (shared) output LayerNorm of the decoder stack.
    # (Output is [16, 32]; making it lane-dense would need an in-kernel relayout
    #  for a negligible win, so it is written as-is.)
    out_ref[...] = layer_norm(x, FNW, FNB)


# --------------------------- parameter packing --------------------------------
def pack_params(params):
    (sa_w, sa_b, sa_ow, sa_ob, ca_w, ca_b, ca_ow, ca_ob,
     l1w, l1b, l2w, l2b, n1w, n1b, n2w, n2b, n3w, n3b, fnw, fnb) = params

    w1 = jnp.concatenate(
        [sa_w[0:E].T, sa_w[E:2 * E].T, sa_w[2 * E:3 * E].T, sa_ow.T,
         ca_w[0:E].T, ca_w[E:2 * E].T, ca_w[2 * E:3 * E].T, ca_ow.T,
         l2w.T], axis=0).astype(jnp.float32)                    # [8E+FF, E]
    w2 = l1w.T.astype(jnp.float32)                              # [E, FF]

    bv = jnp.zeros((N_BV_ROWS, FF), jnp.float32)
    bv = bv.at[SA_QB, 0:E].set(sa_b[0, 0:E])
    bv = bv.at[SA_KB, 0:E].set(sa_b[0, E:2 * E])
    bv = bv.at[SA_VB, 0:E].set(sa_b[0, 2 * E:3 * E])
    bv = bv.at[SA_OB, 0:E].set(sa_ob[0])
    bv = bv.at[CA_QB, 0:E].set(ca_b[0, 0:E])
    bv = bv.at[CA_KB, 0:E].set(ca_b[0, E:2 * E])
    bv = bv.at[CA_VB, 0:E].set(ca_b[0, 2 * E:3 * E])
    bv = bv.at[CA_OB, 0:E].set(ca_ob[0])
    bv = bv.at[L2B, 0:E].set(l2b[0])
    bv = bv.at[N1W, 0:E].set(n1w[0]);  bv = bv.at[N1B, 0:E].set(n1b[0])
    bv = bv.at[N2W, 0:E].set(n2w[0]);  bv = bv.at[N2B, 0:E].set(n2b[0])
    bv = bv.at[N3W, 0:E].set(n3w[0]);  bv = bv.at[N3B, 0:E].set(n3b[0])
    bv = bv.at[FNW, 0:E].set(fnw[0]);  bv = bv.at[FNB, 0:E].set(fnb[0])
    bv = bv.at[L1B, 0:FF].set(l1b[0])
    return w1, w2, bv


# ------------------------------- wrapper --------------------------------------
def _block_diag_mask(mask, rows, cols):
    """Embed a per-example additive mask into a [B*rows, B*cols] block-diagonal
    additive mask; cross-batch blocks get NEG_INF so the merged-batch attention
    cannot attend across batch elements."""
    full = jnp.full((B * rows, B * cols), NEG_INF, jnp.float32)
    for b in range(B):
        full = full.at[b * rows:(b + 1) * rows, b * cols:(b + 1) * cols].set(mask)
    return full


def _full_spec(shape):
    return pl.BlockSpec(shape, lambda i: (0,) * len(shape))


def universal_transformer_decoder(tgt, memory, tgt_mask, memory_mask, params):
    w1, w2, bv = pack_params(params)
    x2d = tgt.reshape(BT, E)          # merge batch along sublanes
    m2d = memory.reshape(BS, E)
    smask = _block_diag_mask(tgt_mask, T, T)       # [BT, BT]
    mmask = _block_diag_mask(memory_mask, T, S)    # [BT, BS]

    out = pl.pallas_call(
        decoder_kernel,
        out_shape=jax.ShapeDtypeStruct((BT, E), jnp.float32),
        grid_spec=pltpu.PrefetchScalarGridSpec(
            num_scalar_prefetch=0,
            grid=(1,),                              # single step: whole problem
            in_specs=[_full_spec(x2d.shape), _full_spec(m2d.shape),
                      _full_spec(smask.shape), _full_spec(mmask.shape),
                      _full_spec(w1.shape), _full_spec(w2.shape),
                      _full_spec(bv.shape)],
            out_specs=_full_spec((BT, E)),
        ),
        compiler_params=pltpu.CompilerParams(
            dimension_semantics=("arbitrary",)),
    )(x2d, m2d, smask, mmask, w1, w2, bv)
    return out.reshape(B, T, E)


# ----------------------------- reference --------------------------------------
# Pure-JAX reference on the *unpacked* params, written independently of the kernel
# (per-batch loop, per-head concat, explicit .T, true division in softmax).
def _mha_ref(q_in, kv_in, w_in, b_in, w_out, b_out, mask):
    q = jnp.dot(q_in, w_in[:E].T) + b_in[:, :E]
    k = jnp.dot(kv_in, w_in[E:2 * E].T) + b_in[:, E:2 * E]
    v = jnp.dot(kv_in, w_in[2 * E:].T) + b_in[:, 2 * E:]
    parts = []
    for h in range(NHEAD):
        sl = slice(h * HD, (h + 1) * HD)
        s = jnp.dot(q[:, sl], k[:, sl].T) * SCALE + mask
        s = s - jnp.max(s, axis=-1, keepdims=True)
        p = jnp.exp(s)
        p = p / jnp.sum(p, axis=-1, keepdims=True)
        parts.append(jnp.dot(p, v[:, sl]))
    ctx = jnp.concatenate(parts, axis=-1)
    return jnp.dot(ctx, w_out.T) + b_out


def ref_forward(tgt, memory, tmask, mmask, params):
    (sa_w, sa_b, sa_ow, sa_ob, ca_w, ca_b, ca_ow, ca_ob,
     l1w, l1b, l2w, l2b, n1w, n1b, n2w, n2b, n3w, n3b, fnw, fnb) = params

    def one_batch(x, mem):
        for _ in range(NUM_LAYERS):
            sa = _mha_ref(x, x, sa_w, sa_b, sa_ow, sa_ob, tmask)
            x = _layer_norm(x + sa, n1w, n1b)
            ca = _mha_ref(x, mem, ca_w, ca_b, ca_ow, ca_ob, mmask)
            x = _layer_norm(x + ca, n2w, n2b)
            h = jnp.maximum(jnp.dot(x, l1w.T) + l1b, 0.0)
            f = jnp.dot(h, l2w.T) + l2b
            x = _layer_norm(x + f, n3w, n3b)
        return _layer_norm(x, fnw, fnb)

    return jnp.stack([one_batch(tgt[b], memory[b]) for b in range(B)])


# ------------------------------ param init ------------------------------------
def init_params(key):
    ks = jax.random.split(key, 20)

    def lin_w(k, out_dim, in_dim):
        return jax.random.normal(k, (out_dim, in_dim), jnp.float32) / math.sqrt(in_dim)

    def small_b(k, dim):
        return 0.01 * jax.random.normal(k, (1, dim), jnp.float32)

    def ln_w(k):
        return 1.0 + 0.05 * jax.random.normal(k, (1, E), jnp.float32)

    def ln_b(k):
        return 0.02 * jax.random.normal(k, (1, E), jnp.float32)

    sa_w = lin_w(ks[0], 3 * E, E); sa_b = small_b(ks[1], 3 * E)
    sa_ow = lin_w(ks[2], E, E);    sa_ob = small_b(ks[3], E)
    ca_w = lin_w(ks[4], 3 * E, E); ca_b = small_b(ks[5], 3 * E)
    ca_ow = lin_w(ks[6], E, E);    ca_ob = small_b(ks[7], E)
    l1w = lin_w(ks[8], FF, E);     l1b = small_b(ks[9], FF)
    l2w = lin_w(ks[10], E, FF);    l2b = small_b(ks[11], E)
    n1w, n1b = ln_w(ks[12]), ln_b(ks[13])
    n2w, n2b = ln_w(ks[14]), ln_b(ks[15])
    n3w, n3b = ln_w(ks[16]), ln_b(ks[17])
    fnw, fnb = ln_w(ks[18]), ln_b(ks[19])
    return (sa_w, sa_b, sa_ow, sa_ob, ca_w, ca_b, ca_ow, ca_ob,
            l1w, l1b, l2w, l2b, n1w, n1b, n2w, n2b, n3w, n3b, fnw, fnb)


# --------------------------------- main ----------------------------------------
if __name__ == "__main__":
    key = jax.random.PRNGKey(0)
    k_tgt, k_mem, k_par = jax.random.split(key, 3)

    tgt = jax.random.normal(k_tgt, (B, T, E), jnp.float32)
    memory = jax.random.normal(k_mem, (B, S, E), jnp.float32)

    # Causal additive mask for self-attention; no memory mask (zeros == None).
    causal = jnp.where(jnp.tril(jnp.ones((T, T), bool)), 0.0, NEG_INF).astype(jnp.float32)
    mem_mask = jnp.zeros((T, S), jnp.float32)

    params = init_params(k_par)

    out = jax.block_until_ready(
        universal_transformer_decoder(tgt, memory, causal, mem_mask, params))
    ref = jax.block_until_ready(ref_forward(tgt, memory, causal, mem_mask, params))

    np.testing.assert_allclose(np.asarray(out), np.asarray(ref), atol=5e-2, rtol=5e-2)
    print("KERNEL_OK")
</pallas_src>

<mosaic_0001>
module attributes {stable_mosaic.version = 11 : i64} {
  func.func @decoder_kernel(%arg0: i32, %arg1: memref<16x32xf32, #tpu.memory_space<vmem>>, %arg2: memref<16x32xf32, #tpu.memory_space<vmem>>, %arg3: memref<16x16xf32, #tpu.memory_space<vmem>>, %arg4: memref<16x16xf32, #tpu.memory_space<vmem>>, %arg5: memref<320x32xf32, #tpu.memory_space<vmem>>, %arg6: memref<32x64xf32, #tpu.memory_space<vmem>>, %arg7: memref<18x64xf32, #tpu.memory_space<vmem>>, %arg8: memref<16x32xf32, #tpu.memory_space<vmem>>) attributes {dimension_semantics = [#tpu.dimension_semantics<arbitrary>], iteration_bounds = array<i64: 1>, scalar_prefetch = 0 : i64, scratch_operands = 0 : i64, tpu.core_type = #tpu.core_type<tc>, window_params = [{pipeline_mode = #tpu.pipeline_mode<synchronous>, transform_indices = @transform_0, window_bounds = array<i64: 16, 32>}, {pipeline_mode = #tpu.pipeline_mode<synchronous>, transform_indices = @transform_1, window_bounds = array<i64: 16, 32>}, {pipeline_mode = #tpu.pipeline_mode<synchronous>, transform_indices = @transform_2, window_bounds = array<i64: 16, 16>}, {pipeline_mode = #tpu.pipeline_mode<synchronous>, transform_indices = @transform_3, window_bounds = array<i64: 16, 16>}, {pipeline_mode = #tpu.pipeline_mode<synchronous>, transform_indices = @transform_4, window_bounds = array<i64: 320, 32>}, {pipeline_mode = #tpu.pipeline_mode<synchronous>, transform_indices = @transform_5, window_bounds = array<i64: 32, 64>}, {pipeline_mode = #tpu.pipeline_mode<synchronous>, transform_indices = @transform_6, window_bounds = array<i64: 18, 64>}, {pipeline_mode = #tpu.pipeline_mode<synchronous>, transform_indices = @transform_7, window_bounds = array<i64: 16, 32>}]} {
    %c0 = arith.constant 0 : index
    %c0_0 = arith.constant 0 : index
    %0 = vector.load %arg1[%c0, %c0_0] : memref<16x32xf32, #tpu.memory_space<vmem>>, vector<16x32xf32>
    %c0_1 = arith.constant 0 : index
    %c0_2 = arith.constant 0 : index
    %1 = vector.load %arg2[%c0_1, %c0_2] : memref<16x32xf32, #tpu.memory_space<vmem>>, vector<16x32xf32>
    %c0_3 = arith.constant 0 : index
    %c0_4 = arith.constant 0 : index
    %2 = vector.load %arg3[%c0_3, %c0_4] : memref<16x16xf32, #tpu.memory_space<vmem>>, vector<16x16xf32>
    %c0_5 = arith.constant 0 : index
    %c0_6 = arith.constant 0 : index
    %3 = vector.load %arg4[%c0_5, %c0_6] : memref<16x16xf32, #tpu.memory_space<vmem>>, vector<16x16xf32>
    %c160 = arith.constant 160 : index
    %c0_7 = arith.constant 0 : index
    %4 = vector.load %arg5[%c160, %c0_7] : memref<320x32xf32, #tpu.memory_space<vmem>>, vector<32x32xf32>
    %cst = arith.constant dense<0.000000e+00> : vector<16x32xf32>
    %5 = tpu.matmul %1, %4, %cst {dimension_numbers = #tpu.dot_dimension_numbers<[1], [0], [0], [1], [0, 0, 1, 1], [], []>} : vector<16x32xf32>, vector<32x32xf32>, vector<16x32xf32> -> vector<16x32xf32>
    %c5 = arith.constant 5 : index
    %c0_8 = arith.constant 0 : index
    %6 = vector.load %arg7[%c5, %c0_8] : memref<18x64xf32, #tpu.memory_space<vmem>>, vector<1x32xf32>
    %7 = vector.broadcast %6 : vector<1x32xf32> to vector<16x32xf32>
    %8 = arith.addf %5, %7 : vector<16x32xf32>
    %c192 = arith.constant 192 : index
    %c0_9 = arith.constant 0 : index
    %9 = vector.load %arg5[%c192, %c0_9] : memref<320x32xf32, #tpu.memory_space<vmem>>, vector<32x32xf32>
    %cst_10 = arith.constant dense<0.000000e+00> : vector<16x32xf32>
    %10 = tpu.matmul %1, %9, %cst_10 {dimension_numbers = #tpu.dot_dimension_numbers<[1], [0], [0], [1], [0, 0, 1, 1], [], []>} : vector<16x32xf32>, vector<32x32xf32>, vector<16x32xf32> -> vector<16x32xf32>
    %c6 = arith.constant 6 : index
    %c0_11 = arith.constant 0 : index
    %11 = vector.load %arg7[%c6, %c0_11] : memref<18x64xf32, #tpu.memory_space<vmem>>, vector<1x32xf32>
    %12 = vector.broadcast %11 : vector<1x32xf32> to vector<16x32xf32>
    %13 = arith.addf %10, %12 : vector<16x32xf32>
    %c0_12 = arith.constant 0 : index
    %c0_13 = arith.constant 0 : index
    %14 = vector.load %arg5[%c0_12, %c0_13] : memref<320x32xf32, #tpu.memory_space<vmem>>, vector<32x32xf32>
    %cst_14 = arith.constant dense<0.000000e+00> : vector<16x32xf32>
    %15 = tpu.matmul %0, %14, %cst_14 {dimension_numbers = #tpu.dot_dimension_numbers<[1], [0], [0], [1], [0, 0, 1, 1], [], []>} : vector<16x32xf32>, vector<32x32xf32>, vector<16x32xf32> -> vector<16x32xf32>
    %c0_15 = arith.constant 0 : index
    %c0_16 = arith.constant 0 : index
    %16 = vector.load %arg7[%c0_15, %c0_16] : memref<18x64xf32, #tpu.memory_space<vmem>>, vector<1x32xf32>
    %17 = vector.broadcast %16 : vector<1x32xf32> to vector<16x32xf32>
    %18 = arith.addf %15, %17 : vector<16x32xf32>
    %cst_17 = arith.constant 0.353553385 : f32
    %19 = vector.broadcast %cst_17 : f32 to vector<16x32xf32>
    %20 = arith.mulf %18, %19 : vector<16x32xf32>
    %c32 = arith.constant 32 : index
    %c0_18 = arith.constant 0 : index
    %21 = vector.load %arg5[%c32, %c0_18] : memref<320x32xf32, #tpu.memory_space<vmem>>, vector<32x32xf32>
    %cst_19 = arith.constant dense<0.000000e+00> : vector<16x32xf32>
    %22 = tpu.matmul %0, %21, %cst_19 {dimension_numbers = #tpu.dot_dimension_numbers<[1], [0], [0], [1], [0, 0, 1, 1], [], []>} : vector<16x32xf32>, vector<32x32xf32>, vector<16x32xf32> -> vector<16x32xf32>
    %c1 = arith.constant 1 : index
    %c0_20 = arith.constant 0 : index
    %23 = vector.load %arg7[%c1, %c0_20] : memref<18x64xf32, #tpu.memory_space<vmem>>, vector<1x32xf32>
    %24 = vector.broadcast %23 : vector<1x32xf32> to vector<16x32xf32>
    %25 = arith.addf %22, %24 : vector<16x32xf32>
    %c64 = arith.constant 64 : index
    %c0_21 = arith.constant 0 : index
    %26 = vector.load %arg5[%c64, %c0_21] : memref<320x32xf32, #tpu.memory_space<vmem>>, vector<32x32xf32>
    %cst_22 = arith.constant dense<0.000000e+00> : vector<16x32xf32>
    %27 = tpu.matmul %0, %26, %cst_22 {dimension_numbers = #tpu.dot_dimension_numbers<[1], [0], [0], [1], [0, 0, 1, 1], [], []>} : vector<16x32xf32>, vector<32x32xf32>, vector<16x32xf32> -> vector<16x32xf32>
    %c2 = arith.constant 2 : index
    %c0_23 = arith.constant 0 : index
    %28 = vector.load %arg7[%c2, %c0_23] : memref<18x64xf32, #tpu.memory_space<vmem>>, vector<1x32xf32>
    %29 = vector.broadcast %28 : vector<1x32xf32> to vector<16x32xf32>
    %30 = arith.addf %27, %29 : vector<16x32xf32>
    %c96 = arith.constant 96 : index
    %c0_24 = arith.constant 0 : index
    %31 = vector.load %arg5[%c96, %c0_24] : memref<320x32xf32, #tpu.memory_space<vmem>>, vector<32x32xf32>
    %32 = vector.extract_strided_slice %20 {offsets = [0, 0], sizes = [16, 8], strides = [1, 1]} : vector<16x32xf32> to vector<16x8xf32>
    %33 = vector.extract_strided_slice %25 {offsets = [0, 0], sizes = [16, 8], strides = [1, 1]} : vector<16x32xf32> to vector<16x8xf32>
    %cst_25 = arith.constant dense<0.000000e+00> : vector<16x16xf32>
    %34 = tpu.matmul %32, %33, %cst_25 {dimension_numbers = #tpu.dot_dimension_numbers<[1], [1], [0], [0], [0, 0, 1, 0], [], []>} : vector<16x8xf32>, vector<16x8xf32>, vector<16x16xf32> -> vector<16x16xf32>
    %35 = arith.addf %34, %2 : vector<16x16xf32>
    %cst_26 = arith.constant dense<0xFF800000> : vector<16xf32>
    %36 = vector.multi_reduction <maximumf>, %35, %cst_26 [1] : vector<16x16xf32> to vector<16xf32>
    %37 = vector.shape_cast %36 : vector<16xf32> to vector<16x1xf32>
    %38 = vector.broadcast %37 : vector<16x1xf32> to vector<16x16xf32>
    %39 = arith.subf %35, %38 : vector<16x16xf32>
    %40 = math.exp %39 : vector<16x16xf32>
    %cst_27 = arith.constant dense<0.000000e+00> : vector<16xf32>
    %41 = vector.multi_reduction <add>, %40, %cst_27 [1] : vector<16x16xf32> to vector<16xf32>
    %42 = vector.shape_cast %41 : vector<16xf32> to vector<16x1xf32>
    %43 = tpu.reciprocal %42 {approx = true} : vector<16x1xf32> -> vector<16x1xf32>
    %44 = vector.broadcast %43 : vector<16x1xf32> to vector<16x16xf32>
    %45 = arith.mulf %40, %44 : vector<16x16xf32>
    %46 = vector.extract_strided_slice %30 {offsets = [0, 0], sizes = [16, 8], strides = [1, 1]} : vector<16x32xf32> to vector<16x8xf32>
    %cst_28 = arith.constant dense<0.000000e+00> : vector<16x8xf32>
    %47 = tpu.matmul %45, %46, %cst_28 {dimension_numbers = #tpu.dot_dimension_numbers<[1], [0], [0], [1], [0, 0, 1, 1], [], []>} : vector<16x16xf32>, vector<16x8xf32>, vector<16x8xf32> -> vector<16x8xf32>
    %48 = vector.extract_strided_slice %20 {offsets = [0, 8], sizes = [16, 8], strides = [1, 1]} : vector<16x32xf32> to vector<16x8xf32>
    %49 = vector.extract_strided_slice %25 {offsets = [0, 8], sizes = [16, 8], strides = [1, 1]} : vector<16x32xf32> to vector<16x8xf32>
    %cst_29 = arith.constant dense<0.000000e+00> : vector<16x16xf32>
    %50 = tpu.matmul %48, %49, %cst_29 {dimension_numbers = #tpu.dot_dimension_numbers<[1], [1], [0], [0], [0, 0, 1, 0], [], []>} : vector<16x8xf32>, vector<16x8xf32>, vector<16x16xf32> -> vector<16x16xf32>
    %51 = arith.addf %50, %2 : vector<16x16xf32>
    %cst_30 = arith.constant dense<0xFF800000> : vector<16xf32>
    %52 = vector.multi_reduction <maximumf>, %51, %cst_30 [1] : vector<16x16xf32> to vector<16xf32>
    %53 = vector.shape_cast %52 : vector<16xf32> to vector<16x1xf32>
    %54 = vector.broadcast %53 : vector<16x1xf32> to vector<16x16xf32>
    %55 = arith.subf %51, %54 : vector<16x16xf32>
    %56 = math.exp %55 : vector<16x16xf32>
    %cst_31 = arith.constant dense<0.000000e+00> : vector<16xf32>
    %57 = vector.multi_reduction <add>, %56, %cst_31 [1] : vector<16x16xf32> to vector<16xf32>
    %58 = vector.shape_cast %57 : vector<16xf32> to vector<16x1xf32>
    %59 = tpu.reciprocal %58 {approx = true} : vector<16x1xf32> -> vector<16x1xf32>
    %60 = vector.broadcast %59 : vector<16x1xf32> to vector<16x16xf32>
    %61 = arith.mulf %56, %60 : vector<16x16xf32>
    %62 = vector.extract_strided_slice %30 {offsets = [0, 8], sizes = [16, 8], strides = [1, 1]} : vector<16x32xf32> to vector<16x8xf32>
    %cst_32 = arith.constant dense<0.000000e+00> : vector<16x8xf32>
    %63 = tpu.matmul %61, %62, %cst_32 {dimension_numbers = #tpu.dot_dimension_numbers<[1], [0], [0], [1], [0, 0, 1, 1], [], []>} : vector<16x16xf32>, vector<16x8xf32>, vector<16x8xf32> -> vector<16x8xf32>
    %64 = vector.extract_strided_slice %20 {offsets = [0, 16], sizes = [16, 8], strides = [1, 1]} : vector<16x32xf32> to vector<16x8xf32>
    %65 = vector.extract_strided_slice %25 {offsets = [0, 16], sizes = [16, 8], strides = [1, 1]} : vector<16x32xf32> to vector<16x8xf32>
    %cst_33 = arith.constant dense<0.000000e+00> : vector<16x16xf32>
    %66 = tpu.matmul %64, %65, %cst_33 {dimension_numbers = #tpu.dot_dimension_numbers<[1], [1], [0], [0], [0, 0, 1, 0], [], []>} : vector<16x8xf32>, vector<16x8xf32>, vector<16x16xf32> -> vector<16x16xf32>
    %67 = arith.addf %66, %2 : vector<16x16xf32>
    %cst_34 = arith.constant dense<0xFF800000> : vector<16xf32>
    %68 = vector.multi_reduction <maximumf>, %67, %cst_34 [1] : vector<16x16xf32> to vector<16xf32>
    %69 = vector.shape_cast %68 : vector<16xf32> to vector<16x1xf32>
    %70 = vector.broadcast %69 : vector<16x1xf32> to vector<16x16xf32>
    %71 = arith.subf %67, %70 : vector<16x16xf32>
    %72 = math.exp %71 : vector<16x16xf32>
    %cst_35 = arith.constant dense<0.000000e+00> : vector<16xf32>
    %73 = vector.multi_reduction <add>, %72, %cst_35 [1] : vector<16x16xf32> to vector<16xf32>
    %74 = vector.shape_cast %73 : vector<16xf32> to vector<16x1xf32>
    %75 = tpu.reciprocal %74 {approx = true} : vector<16x1xf32> -> vector<16x1xf32>
    %76 = vector.broadcast %75 : vector<16x1xf32> to vector<16x16xf32>
    %77 = arith.mulf %72, %76 : vector<16x16xf32>
    %78 = vector.extract_strided_slice %30 {offsets = [0, 16], sizes = [16, 8], strides = [1, 1]} : vector<16x32xf32> to vector<16x8xf32>
    %cst_36 = arith.constant dense<0.000000e+00> : vector<16x8xf32>
    %79 = tpu.matmul %77, %78, %cst_36 {dimension_numbers = #tpu.dot_dimension_numbers<[1], [0], [0], [1], [0, 0, 1, 1], [], []>} : vector<16x16xf32>, vector<16x8xf32>, vector<16x8xf32> -> vector<16x8xf32>
    %80 = vector.extract_strided_slice %20 {offsets = [0, 24], sizes = [16, 8], strides = [1, 1]} : vector<16x32xf32> to vector<16x8xf32>
    %81 = vector.extract_strided_slice %25 {offsets = [0, 24], sizes = [16, 8], strides = [1, 1]} : vector<16x32xf32> to vector<16x8xf32>
    %cst_37 = arith.constant dense<0.000000e+00> : vector<16x16xf32>
    %82 = tpu.matmul %80, %81, %cst_37 {dimension_numbers = #tpu.dot_dimension_numbers<[1], [1], [0], [0], [0, 0, 1, 0], [], []>} : vector<16x8xf32>, vector<16x8xf32>, vector<16x16xf32> -> vector<16x16xf32>
    %83 = arith.addf %82, %2 : vector<16x16xf32>
    %cst_38 = arith.constant dense<0xFF800000> : vector<16xf32>
    %84 = vector.multi_reduction <maximumf>, %83, %cst_38 [1] : vector<16x16xf32> to vector<16xf32>
    %85 = vector.shape_cast %84 : vector<16xf32> to vector<16x1xf32>
    %86 = vector.broadcast %85 : vector<16x1xf32> to vector<16x16xf32>
    %87 = arith.subf %83, %86 : vector<16x16xf32>
    %88 = math.exp %87 : vector<16x16xf32>
    %cst_39 = arith.constant dense<0.000000e+00> : vector<16xf32>
    %89 = vector.multi_reduction <add>, %88, %cst_39 [1] : vector<16x16xf32> to vector<16xf32>
    %90 = vector.shape_cast %89 : vector<16xf32> to vector<16x1xf32>
    %91 = tpu.reciprocal %90 {approx = true} : vector<16x1xf32> -> vector<16x1xf32>
    %92 = vector.broadcast %91 : vector<16x1xf32> to vector<16x16xf32>
    %93 = arith.mulf %88, %92 : vector<16x16xf32>
    %94 = vector.extract_strided_slice %30 {offsets = [0, 24], sizes = [16, 8], strides = [1, 1]} : vector<16x32xf32> to vector<16x8xf32>
    %cst_40 = arith.constant dense<0.000000e+00> : vector<16x8xf32>
    %95 = tpu.matmul %93, %94, %cst_40 {dimension_numbers = #tpu.dot_dimension_numbers<[1], [0], [0], [1], [0, 0, 1, 1], [], []>} : vector<16x16xf32>, vector<16x8xf32>, vector<16x8xf32> -> vector<16x8xf32>
    %96 = tpu.concatenate %47, %63, %79, %95 in 1 : vector<16x8xf32>, vector<16x8xf32>, vector<16x8xf32>, vector<16x8xf32> -> vector<16x32xf32>
    %cst_41 = arith.constant dense<0.000000e+00> : vector<16x32xf32>
    %97 = tpu.matmul %96, %31, %cst_41 {dimension_numbers = #tpu.dot_dimension_numbers<[1], [0], [0], [1], [0, 0, 1, 1], [], []>} : vector<16x32xf32>, vector<32x32xf32>, vector<16x32xf32> -> vector<16x32xf32>
    %c3 = arith.constant 3 : index
    %c0_42 = arith.constant 0 : index
    %98 = vector.load %arg7[%c3, %c0_42] : memref<18x64xf32, #tpu.memory_space<vmem>>, vector<1x32xf32>
    %99 = vector.broadcast %98 : vector<1x32xf32> to vector<16x32xf32>
    %100 = arith.addf %97, %99 : vector<16x32xf32>
    %101 = arith.addf %0, %100 : vector<16x32xf32>
    %cst_43 = arith.constant dense<0.000000e+00> : vector<16xf32>
    %102 = vector.multi_reduction <add>, %101, %cst_43 [1] : vector<16x32xf32> to vector<16xf32>
    %103 = vector.shape_cast %102 : vector<16xf32> to vector<16x1xf32>
    %cst_44 = arith.constant 3.200000e+01 : f32
    %104 = vector.broadcast %cst_44 : f32 to vector<16x1xf32>
    %105 = arith.divf %103, %104 : vector<16x1xf32>
    %106 = vector.broadcast %105 : vector<16x1xf32> to vector<16x32xf32>
    %107 = arith.subf %101, %106 : vector<16x32xf32>
    %108 = arith.mulf %107, %107 : vector<16x32xf32>
    %cst_45 = arith.constant dense<0.000000e+00> : vector<16xf32>
    %109 = vector.multi_reduction <add>, %108, %cst_45 [1] : vector<16x32xf32> to vector<16xf32>
    %110 = vector.shape_cast %109 : vector<16xf32> to vector<16x1xf32>
    %cst_46 = arith.constant 3.200000e+01 : f32
    %111 = vector.broadcast %cst_46 : f32 to vector<16x1xf32>
    %112 = arith.divf %110, %111 : vector<16x1xf32>
    %113 = vector.broadcast %105 : vector<16x1xf32> to vector<16x32xf32>
    %114 = arith.subf %101, %113 : vector<16x32xf32>
    %cst_47 = arith.constant 9.99999974E-6 : f32
    %115 = vector.broadcast %cst_47 : f32 to vector<16x1xf32>
    %116 = arith.addf %112, %115 : vector<16x1xf32>
    %117 = math.rsqrt %116 : vector<16x1xf32>
    %118 = vector.broadcast %117 : vector<16x1xf32> to vector<16x32xf32>
    %119 = arith.mulf %114, %118 : vector<16x32xf32>
    %c9 = arith.constant 9 : index
    %c0_48 = arith.constant 0 : index
    %120 = vector.load %arg7[%c9, %c0_48] : memref<18x64xf32, #tpu.memory_space<vmem>>, vector<1x32xf32>
    %121 = vector.broadcast %120 : vector<1x32xf32> to vector<16x32xf32>
    %122 = arith.mulf %119, %121 : vector<16x32xf32>
    %c10 = arith.constant 10 : index
    %c0_49 = arith.constant 0 : index
    %123 = vector.load %arg7[%c10, %c0_49] : memref<18x64xf32, #tpu.memory_space<vmem>>, vector<1x32xf32>
    %124 = vector.broadcast %123 : vector<1x32xf32> to vector<16x32xf32>
    %125 = arith.addf %122, %124 : vector<16x32xf32>
    %c128 = arith.constant 128 : index
    %c0_50 = arith.constant 0 : index
    %126 = vector.load %arg5[%c128, %c0_50] : memref<320x32xf32, #tpu.memory_space<vmem>>, vector<32x32xf32>
    %cst_51 = arith.constant dense<0.000000e+00> : vector<16x32xf32>
    %127 = tpu.matmul %125, %126, %cst_51 {dimension_numbers = #tpu.dot_dimension_numbers<[1], [0], [0], [1], [0, 0, 1, 1], [], []>} : vector<16x32xf32>, vector<32x32xf32>, vector<16x32xf32> -> vector<16x32xf32>
    %c4 = arith.constant 4 : index
    %c0_52 = arith.constant 0 : index
    %128 = vector.load %arg7[%c4, %c0_52] : memref<18x64xf32, #tpu.memory_space<vmem>>, vector<1x32xf32>
    %129 = vector.broadcast %128 : vector<1x32xf32> to vector<16x32xf32>
    %130 = arith.addf %127, %129 : vector<16x32xf32>
    %cst_53 = arith.constant 0.353553385 : f32
    %131 = vector.broadcast %cst_53 : f32 to vector<16x32xf32>
    %132 = arith.mulf %130, %131 : vector<16x32xf32>
    %c224 = arith.constant 224 : index
    %c0_54 = arith.constant 0 : index
    %133 = vector.load %arg5[%c224, %c0_54] : memref<320x32xf32, #tpu.memory_space<vmem>>, vector<32x32xf32>
    %134 = vector.extract_strided_slice %132 {offsets = [0, 0], sizes = [16, 8], strides = [1, 1]} : vector<16x32xf32> to vector<16x8xf32>
    %135 = vector.extract_strided_slice %8 {offsets = [0, 0], sizes = [16, 8], strides = [1, 1]} : vector<16x32xf32> to vector<16x8xf32>
    %cst_55 = arith.constant dense<0.000000e+00> : vector<16x16xf32>
    %136 = tpu.matmul %134, %135, %cst_55 {dimension_numbers = #tpu.dot_dimension_numbers<[1], [1], [0], [0], [0, 0, 1, 0], [], []>} : vector<16x8xf32>, vector<16x8xf32>, vector<16x16xf32> -> vector<16x16xf32>
    %137 = arith.addf %136, %3 : vector<16x16xf32>
    %cst_56 = arith.constant dense<0xFF800000> : vector<16xf32>
    %138 = vector.multi_reduction <maximumf>, %137, %cst_56 [1] : vector<16x16xf32> to vector<16xf32>
    %139 = vector.shape_cast %138 : vector<16xf32> to vector<16x1xf32>
    %140 = vector.broadcast %139 : vector<16x1xf32> to vector<16x16xf32>
    %141 = arith.subf %137, %140 : vector<16x16xf32>
    %142 = math.exp %141 : vector<16x16xf32>
    %cst_57 = arith.constant dense<0.000000e+00> : vector<16xf32>
    %143 = vector.multi_reduction <add>, %142, %cst_57 [1] : vector<16x16xf32> to vector<16xf32>
    %144 = vector.shape_cast %143 : vector<16xf32> to vector<16x1xf32>
    %145 = tpu.reciprocal %144 {approx = true} : vector<16x1xf32> -> vector<16x1xf32>
    %146 = vector.broadcast %145 : vector<16x1xf32> to vector<16x16xf32>
    %147 = arith.mulf %142, %146 : vector<16x16xf32>
    %148 = vector.extract_strided_slice %13 {offsets = [0, 0], sizes = [16, 8], strides = [1, 1]} : vector<16x32xf32> to vector<16x8xf32>
    %cst_58 = arith.constant dense<0.000000e+00> : vector<16x8xf32>
    %149 = tpu.matmul %147, %148, %cst_58 {dimension_numbers = #tpu.dot_dimension_numbers<[1], [0], [0], [1], [0, 0, 1, 1], [], []>} : vector<16x16xf32>, vector<16x8xf32>, vector<16x8xf32> -> vector<16x8xf32>
    %150 = vector.extract_strided_slice %132 {offsets = [0, 8], sizes = [16, 8], strides = [1, 1]} : vector<16x32xf32> to vector<16x8xf32>
    %151 = vector.extract_strided_slice %8 {offsets = [0, 8], sizes = [16, 8], strides = [1, 1]} : vector<16x32xf32> to vector<16x8xf32>
    %cst_59 = arith.constant dense<0.000000e+00> : vector<16x16xf32>
    %152 = tpu.matmul %150, %151, %cst_59 {dimension_numbers = #tpu.dot_dimension_numbers<[1], [1], [0], [0], [0, 0, 1, 0], [], []>} : vector<16x8xf32>, vector<16x8xf32>, vector<16x16xf32> -> vector<16x16xf32>
    %153 = arith.addf %152, %3 : vector<16x16xf32>
    %cst_60 = arith.constant dense<0xFF800000> : vector<16xf32>
    %154 = vector.multi_reduction <maximumf>, %153, %cst_60 [1] : vector<16x16xf32> to vector<16xf32>
    %155 = vector.shape_cast %154 : vector<16xf32> to vector<16x1xf32>
    %156 = vector.broadcast %155 : vector<16x1xf32> to vector<16x16xf32>
    %157 = arith.subf %153, %156 : vector<16x16xf32>
    %158 = math.exp %157 : vector<16x16xf32>
    %cst_61 = arith.constant dense<0.000000e+00> : vector<16xf32>
    %159 = vector.multi_reduction <add>, %158, %cst_61 [1] : vector<16x16xf32> to vector<16xf32>
    %160 = vector.shape_cast %159 : vector<16xf32> to vector<16x1xf32>
    %161 = tpu.reciprocal %160 {approx = true} : vector<16x1xf32> -> vector<16x1xf32>
    %162 = vector.broadcast %161 : vector<16x1xf32> to vector<16x16xf32>
    %163 = arith.mulf %158, %162 : vector<16x16xf32>
    %164 = vector.extract_strided_slice %13 {offsets = [0, 8], sizes = [16, 8], strides = [1, 1]} : vector<16x32xf32> to vector<16x8xf32>
    %cst_62 = arith.constant dense<0.000000e+00> : vector<16x8xf32>
    %165 = tpu.matmul %163, %164, %cst_62 {dimension_numbers = #tpu.dot_dimension_numbers<[1], [0], [0], [1], [0, 0, 1, 1], [], []>} : vector<16x16xf32>, vector<16x8xf32>, vector<16x8xf32> -> vector<16x8xf32>
    %166 = vector.extract_strided_slice %132 {offsets = [0, 16], sizes = [16, 8], strides = [1, 1]} : vector<16x32xf32> to vector<16x8xf32>
    %167 = vector.extract_strided_slice %8 {offsets = [0, 16], sizes = [16, 8], strides = [1, 1]} : vector<16x32xf32> to vector<16x8xf32>
    %cst_63 = arith.constant dense<0.000000e+00> : vector<16x16xf32>
    %168 = tpu.matmul %166, %167, %cst_63 {dimension_numbers = #tpu.dot_dimension_numbers<[1], [1], [0], [0], [0, 0, 1, 0], [], []>} : vector<16x8xf32>, vector<16x8xf32>, vector<16x16xf32> -> vector<16x16xf32>
    %169 = arith.addf %168, %3 : vector<16x16xf32>
    %cst_64 = arith.constant dense<0xFF800000> : vector<16xf32>
    %170 = vector.multi_reduction <maximumf>, %169, %cst_64 [1] : vector<16x16xf32> to vector<16xf32>
    %171 = vector.shape_cast %170 : vector<16xf32> to vector<16x1xf32>
    %172 = vector.broadcast %171 : vector<16x1xf32> to vector<16x16xf32>
    %173 = arith.subf %169, %172 : vector<16x16xf32>
    %174 = math.exp %173 : vector<16x16xf32>
    %cst_65 = arith.constant dense<0.000000e+00> : vector<16xf32>
    %175 = vector.multi_reduction <add>, %174, %cst_65 [1] : vector<16x16xf32> to vector<16xf32>
    %176 = vector.shape_cast %175 : vector<16xf32> to vector<16x1xf32>
    %177 = tpu.reciprocal %176 {approx = true} : vector<16x1xf32> -> vector<16x1xf32>
    %178 = vector.broadcast %177 : vector<16x1xf32> to vector<16x16xf32>
    %179 = arith.mulf %174, %178 : vector<16x16xf32>
    %180 = vector.extract_strided_slice %13 {offsets = [0, 16], sizes = [16, 8], strides = [1, 1]} : vector<16x32xf32> to vector<16x8xf32>
    %cst_66 = arith.constant dense<0.000000e+00> : vector<16x8xf32>
    %181 = tpu.matmul %179, %180, %cst_66 {dimension_numbers = #tpu.dot_dimension_numbers<[1], [0], [0], [1], [0, 0, 1, 1], [], []>} : vector<16x16xf32>, vector<16x8xf32>, vector<16x8xf32> -> vector<16x8xf32>
    %182 = vector.extract_strided_slice %132 {offsets = [0, 24], sizes = [16, 8], strides = [1, 1]} : vector<16x32xf32> to vector<16x8xf32>
    %183 = vector.extract_strided_slice %8 {offsets = [0, 24], sizes = [16, 8], strides = [1, 1]} : vector<16x32xf32> to vector<16x8xf32>
    %cst_67 = arith.constant dense<0.000000e+00> : vector<16x16xf32>
    %184 = tpu.matmul %182, %183, %cst_67 {dimension_numbers = #tpu.dot_dimension_numbers<[1], [1], [0], [0], [0, 0, 1, 0], [], []>} : vector<16x8xf32>, vector<16x8xf32>, vector<16x16xf32> -> vector<16x16xf32>
    %185 = arith.addf %184, %3 : vector<16x16xf32>
    %cst_68 = arith.constant dense<0xFF800000> : vector<16xf32>
    %186 = vector.multi_reduction <maximumf>, %185, %cst_68 [1] : vector<16x16xf32> to vector<16xf32>
    %187 = vector.shape_cast %186 : vector<16xf32> to vector<16x1xf32>
    %188 = vector.broadcast %187 : vector<16x1xf32> to vector<16x16xf32>
    %189 = arith.subf %185, %188 : vector<16x16xf32>
    %190 = math.exp %189 : vector<16x16xf32>
    %cst_69 = arith.constant dense<0.000000e+00> : vector<16xf32>
    %191 = vector.multi_reduction <add>, %190, %cst_69 [1] : vector<16x16xf32> to vector<16xf32>
    %192 = vector.shape_cast %191 : vector<16xf32> to vector<16x1xf32>
    %193 = tpu.reciprocal %192 {approx = true} : vector<16x1xf32> -> vector<16x1xf32>
    %194 = vector.broadcast %193 : vector<16x1xf32> to vector<16x16xf32>
    %195 = arith.mulf %190, %194 : vector<16x16xf32>
    %196 = vector.extract_strided_slice %13 {offsets = [0, 24], sizes = [16, 8], strides = [1, 1]} : vector<16x32xf32> to vector<16x8xf32>
    %cst_70 = arith.constant dense<0.000000e+00> : vector<16x8xf32>
    %197 = tpu.matmul %195, %196, %cst_70 {dimension_numbers = #tpu.dot_dimension_numbers<[1], [0], [0], [1], [0, 0, 1, 1], [], []>} : vector<16x16xf32>, vector<16x8xf32>, vector<16x8xf32> -> vector<16x8xf32>
    %198 = tpu.concatenate %149, %165, %181, %197 in 1 : vector<16x8xf32>, vector<16x8xf32>, vector<16x8xf32>, vector<16x8xf32> -> vector<16x32xf32>
    %cst_71 = arith.constant dense<0.000000e+00> : vector<16x32xf32>
    %199 = tpu.matmul %198, %133, %cst_71 {dimension_numbers = #tpu.dot_dimension_numbers<[1], [0], [0], [1], [0, 0, 1, 1], [], []>} : vector<16x32xf32>, vector<32x32xf32>, vector<16x32xf32> -> vector<16x32xf32>
    %c7 = arith.constant 7 : index
    %c0_72 = arith.constant 0 : index
    %200 = vector.load %arg7[%c7, %c0_72] : memref<18x64xf32, #tpu.memory_space<vmem>>, vector<1x32xf32>
    %201 = vector.broadcast %200 : vector<1x32xf32> to vector<16x32xf32>
    %202 = arith.addf %199, %201 : vector<16x32xf32>
    %203 = arith.addf %125, %202 : vector<16x32xf32>
    %cst_73 = arith.constant dense<0.000000e+00> : vector<16xf32>
    %204 = vector.multi_reduction <add>, %203, %cst_73 [1] : vector<16x32xf32> to vector<16xf32>
    %205 = vector.shape_cast %204 : vector<16xf32> to vector<16x1xf32>
    %cst_74 = arith.constant 3.200000e+01 : f32
    %206 = vector.broadcast %cst_74 : f32 to vector<16x1xf32>
    %207 = arith.divf %205, %206 : vector<16x1xf32>
    %208 = vector.broadcast %207 : vector<16x1xf32> to vector<16x32xf32>
    %209 = arith.subf %203, %208 : vector<16x32xf32>
    %210 = arith.mulf %209, %209 : vector<16x32xf32>
    %cst_75 = arith.constant dense<0.000000e+00> : vector<16xf32>
    %211 = vector.multi_reduction <add>, %210, %cst_75 [1] : vector<16x32xf32> to vector<16xf32>
    %212 = vector.shape_cast %211 : vector<16xf32> to vector<16x1xf32>
    %cst_76 = arith.constant 3.200000e+01 : f32
    %213 = vector.broadcast %cst_76 : f32 to vector<16x1xf32>
    %214 = arith.divf %212, %213 : vector<16x1xf32>
    %215 = vector.broadcast %207 : vector<16x1xf32> to vector<16x32xf32>
    %216 = arith.subf %203, %215 : vector<16x32xf32>
    %cst_77 = arith.constant 9.99999974E-6 : f32
    %217 = vector.broadcast %cst_77 : f32 to vector<16x1xf32>
    %218 = arith.addf %214, %217 : vector<16x1xf32>
    %219 = math.rsqrt %218 : vector<16x1xf32>
    %220 = vector.broadcast %219 : vector<16x1xf32> to vector<16x32xf32>
    %221 = arith.mulf %216, %220 : vector<16x32xf32>
    %c11 = arith.constant 11 : index
    %c0_78 = arith.constant 0 : index
    %222 = vector.load %arg7[%c11, %c0_78] : memref<18x64xf32, #tpu.memory_space<vmem>>, vector<1x32xf32>
    %223 = vector.broadcast %222 : vector<1x32xf32> to vector<16x32xf32>
    %224 = arith.mulf %221, %223 : vector<16x32xf32>
    %c12 = arith.constant 12 : index
    %c0_79 = arith.constant 0 : index
    %225 = vector.load %arg7[%c12, %c0_79] : memref<18x64xf32, #tpu.memory_space<vmem>>, vector<1x32xf32>
    %226 = vector.broadcast %225 : vector<1x32xf32> to vector<16x32xf32>
    %227 = arith.addf %224, %226 : vector<16x32xf32>
    %c0_80 = arith.constant 0 : index
    %c0_81 = arith.constant 0 : index
    %228 = vector.load %arg6[%c0_80, %c0_81] : memref<32x64xf32, #tpu.memory_space<vmem>>, vector<32x64xf32>
    %cst_82 = arith.constant dense<0.000000e+00> : vector<16x64xf32>
    %229 = tpu.matmul %227, %228, %cst_82 {dimension_numbers = #tpu.dot_dimension_numbers<[1], [0], [0], [1], [0, 0, 1, 1], [], []>} : vector<16x32xf32>, vector<32x64xf32>, vector<16x64xf32> -> vector<16x64xf32>
    %c17 = arith.constant 17 : index
    %c0_83 = arith.constant 0 : index
    %230 = vector.load %arg7[%c17, %c0_83] : memref<18x64xf32, #tpu.memory_space<vmem>>, vector<1x64xf32>
    %231 = vector.broadcast %230 : vector<1x64xf32> to vector<16x64xf32>
    %232 = arith.addf %229, %231 : vector<16x64xf32>
    %cst_84 = arith.constant 0.000000e+00 : f32
    %233 = vector.broadcast %cst_84 : f32 to vector<16x64xf32>
    %234 = arith.maximumf %232, %233 : vector<16x64xf32>
    %c256 = arith.constant 256 : index
    %c0_85 = arith.constant 0 : index
    %235 = vector.load %arg5[%c256, %c0_85] : memref<320x32xf32, #tpu.memory_space<vmem>>, vector<64x32xf32>
    %cst_86 = arith.constant dense<0.000000e+00> : vector<16x32xf32>
    %236 = tpu.matmul %234, %235, %cst_86 {dimension_numbers = #tpu.dot_dimension_numbers<[1], [0], [0], [1], [0, 0, 1, 1], [], []>} : vector<16x64xf32>, vector<64x32xf32>, vector<16x32xf32> -> vector<16x32xf32>
    %c8 = arith.constant 8 : index
    %c0_87 = arith.constant 0 : index
    %237 = vector.load %arg7[%c8, %c0_87] : memref<18x64xf32, #tpu.memory_space<vmem>>, vector<1x32xf32>
    %238 = vector.broadcast %237 : vector<1x32xf32> to vector<16x32xf32>
    %239 = arith.addf %236, %238 : vector<16x32xf32>
    %240 = arith.addf %227, %239 : vector<16x32xf32>
    %cst_88 = arith.constant dense<0.000000e+00> : vector<16xf32>
    %241 = vector.multi_reduction <add>, %240, %cst_88 [1] : vector<16x32xf32> to vector<16xf32>
    %242 = vector.shape_cast %241 : vector<16xf32> to vector<16x1xf32>
    %cst_89 = arith.constant 3.200000e+01 : f32
    %243 = vector.broadcast %cst_89 : f32 to vector<16x1xf32>
    %244 = arith.divf %242, %243 : vector<16x1xf32>
    %245 = vector.broadcast %244 : vector<16x1xf32> to vector<16x32xf32>
    %246 = arith.subf %240, %245 : vector<16x32xf32>
    %247 = arith.mulf %246, %246 : vector<16x32xf32>
    %cst_90 = arith.constant dense<0.000000e+00> : vector<16xf32>
    %248 = vector.multi_reduction <add>, %247, %cst_90 [1] : vector<16x32xf32> to vector<16xf32>
    %249 = vector.shape_cast %248 : vector<16xf32> to vector<16x1xf32>
    %cst_91 = arith.constant 3.200000e+01 : f32
    %250 = vector.broadcast %cst_91 : f32 to vector<16x1xf32>
    %251 = arith.divf %249, %250 : vector<16x1xf32>
    %252 = vector.broadcast %244 : vector<16x1xf32> to vector<16x32xf32>
    %253 = arith.subf %240, %252 : vector<16x32xf32>
    %cst_92 = arith.constant 9.99999974E-6 : f32
    %254 = vector.broadcast %cst_92 : f32 to vector<16x1xf32>
    %255 = arith.addf %251, %254 : vector<16x1xf32>
    %256 = math.rsqrt %255 : vector<16x1xf32>
    %257 = vector.broadcast %256 : vector<16x1xf32> to vector<16x32xf32>
    %258 = arith.mulf %253, %257 : vector<16x32xf32>
    %c13 = arith.constant 13 : index
    %c0_93 = arith.constant 0 : index
    %259 = vector.load %arg7[%c13, %c0_93] : memref<18x64xf32, #tpu.memory_space<vmem>>, vector<1x32xf32>
    %260 = vector.broadcast %259 : vector<1x32xf32> to vector<16x32xf32>
    %261 = arith.mulf %258, %260 : vector<16x32xf32>
    %c14 = arith.constant 14 : index
    %c0_94 = arith.constant 0 : index
    %262 = vector.load %arg7[%c14, %c0_94] : memref<18x64xf32, #tpu.memory_space<vmem>>, vector<1x32xf32>
    %263 = vector.broadcast %262 : vector<1x32xf32> to vector<16x32xf32>
    %264 = arith.addf %261, %263 : vector<16x32xf32>
    %c0_95 = arith.constant 0 : index
    %c0_96 = arith.constant 0 : index
    %265 = vector.load %arg5[%c0_95, %c0_96] : memref<320x32xf32, #tpu.memory_space<vmem>>, vector<32x32xf32>
    %cst_97 = arith.constant dense<0.000000e+00> : vector<16x32xf32>
    %266 = tpu.matmul %264, %265, %cst_97 {dimension_numbers = #tpu.dot_dimension_numbers<[1], [0], [0], [1], [0, 0, 1, 1], [], []>} : vector<16x32xf32>, vector<32x32xf32>, vector<16x32xf32> -> vector<16x32xf32>
    %c0_98 = arith.constant 0 : index
    %c0_99 = arith.constant 0 : index
    %267 = vector.load %arg7[%c0_98, %c0_99] : memref<18x64xf32, #tpu.memory_space<vmem>>, vector<1x32xf32>
    %268 = vector.broadcast %267 : vector<1x32xf32> to vector<16x32xf32>
    %269 = arith.addf %266, %268 : vector<16x32xf32>
    %cst_100 = arith.constant 0.353553385 : f32
    %270 = vector.broadcast %cst_100 : f32 to vector<16x32xf32>
    %271 = arith.mulf %269, %270 : vector<16x32xf32>
    %c32_101 = arith.constant 32 : index
    %c0_102 = arith.constant 0 : index
    %272 = vector.load %arg5[%c32_101, %c0_102] : memref<320x32xf32, #tpu.memory_space<vmem>>, vector<32x32xf32>
    %cst_103 = arith.constant dense<0.000000e+00> : vector<16x32xf32>
    %273 = tpu.matmul %264, %272, %cst_103 {dimension_numbers = #tpu.dot_dimension_numbers<[1], [0], [0], [1], [0, 0, 1, 1], [], []>} : vector<16x32xf32>, vector<32x32xf32>, vector<16x32xf32> -> vector<16x32xf32>
    %c1_104 = arith.constant 1 : index
    %c0_105 = arith.constant 0 : index
    %274 = vector.load %arg7[%c1_104, %c0_105] : memref<18x64xf32, #tpu.memory_space<vmem>>, vector<1x32xf32>
    %275 = vector.broadcast %274 : vector<1x32xf32> to vector<16x32xf32>
    %276 = arith.addf %273, %275 : vector<16x32xf32>
    %c64_106 = arith.constant 64 : index
    %c0_107 = arith.constant 0 : index
    %277 = vector.load %arg5[%c64_106, %c0_107] : memref<320x32xf32, #tpu.memory_space<vmem>>, vector<32x32xf32>
    %cst_108 = arith.constant dense<0.000000e+00> : vector<16x32xf32>
    %278 = tpu.matmul %264, %277, %cst_108 {dimension_numbers = #tpu.dot_dimension_numbers<[1], [0], [0], [1], [0, 0, 1, 1], [], []>} : vector<16x32xf32>, vector<32x32xf32>, vector<16x32xf32> -> vector<16x32xf32>
    %c2_109 = arith.constant 2 : index
    %c0_110 = arith.constant 0 : index
    %279 = vector.load %arg7[%c2_109, %c0_110] : memref<18x64xf32, #tpu.memory_space<vmem>>, vector<1x32xf32>
    %280 = vector.broadcast %279 : vector<1x32xf32> to vector<16x32xf32>
    %281 = arith.addf %278, %280 : vector<16x32xf32>
    %c96_111 = arith.constant 96 : index
    %c0_112 = arith.constant 0 : index
    %282 = vector.load %arg5[%c96_111, %c0_112] : memref<320x32xf32, #tpu.memory_space<vmem>>, vector<32x32xf32>
    %283 = vector.extract_strided_slice %271 {offsets = [0, 0], sizes = [16, 8], strides = [1, 1]} : vector<16x32xf32> to vector<16x8xf32>
    %284 = vector.extract_strided_slice %276 {offsets = [0, 0], sizes = [16, 8], strides = [1, 1]} : vector<16x32xf32> to vector<16x8xf32>
    %cst_113 = arith.constant dense<0.000000e+00> : vector<16x16xf32>
    %285 = tpu.matmul %283, %284, %cst_113 {dimension_numbers = #tpu.dot_dimension_numbers<[1], [1], [0], [0], [0, 0, 1, 0], [], []>} : vector<16x8xf32>, vector<16x8xf32>, vector<16x16xf32> -> vector<16x16xf32>
    %286 = arith.addf %285, %2 : vector<16x16xf32>
    %cst_114 = arith.constant dense<0xFF800000> : vector<16xf32>
    %287 = vector.multi_reduction <maximumf>, %286, %cst_114 [1] : vector<16x16xf32> to vector<16xf32>
    %288 = vector.shape_cast %287 : vector<16xf32> to vector<16x1xf32>
    %289 = vector.broadcast %288 : vector<16x1xf32> to vector<16x16xf32>
    %290 = arith.subf %286, %289 : vector<16x16xf32>
    %291 = math.exp %290 : vector<16x16xf32>
    %cst_115 = arith.constant dense<0.000000e+00> : vector<16xf32>
    %292 = vector.multi_reduction <add>, %291, %cst_115 [1] : vector<16x16xf32> to vector<16xf32>
    %293 = vector.shape_cast %292 : vector<16xf32> to vector<16x1xf32>
    %294 = tpu.reciprocal %293 {approx = true} : vector<16x1xf32> -> vector<16x1xf32>
    %295 = vector.broadcast %294 : vector<16x1xf32> to vector<16x16xf32>
    %296 = arith.mulf %291, %295 : vector<16x16xf32>
    %297 = vector.extract_strided_slice %281 {offsets = [0, 0], sizes = [16, 8], strides = [1, 1]} : vector<16x32xf32> to vector<16x8xf32>
    %cst_116 = arith.constant dense<0.000000e+00> : vector<16x8xf32>
    %298 = tpu.matmul %296, %297, %cst_116 {dimension_numbers = #tpu.dot_dimension_numbers<[1], [0], [0], [1], [0, 0, 1, 1], [], []>} : vector<16x16xf32>, vector<16x8xf32>, vector<16x8xf32> -> vector<16x8xf32>
    %299 = vector.extract_strided_slice %271 {offsets = [0, 8], sizes = [16, 8], strides = [1, 1]} : vector<16x32xf32> to vector<16x8xf32>
    %300 = vector.extract_strided_slice %276 {offsets = [0, 8], sizes = [16, 8], strides = [1, 1]} : vector<16x32xf32> to vector<16x8xf32>
    %cst_117 = arith.constant dense<0.000000e+00> : vector<16x16xf32>
    %301 = tpu.matmul %299, %300, %cst_117 {dimension_numbers = #tpu.dot_dimension_numbers<[1], [1], [0], [0], [0, 0, 1, 0], [], []>} : vector<16x8xf32>, vector<16x8xf32>, vector<16x16xf32> -> vector<16x16xf32>
    %302 = arith.addf %301, %2 : vector<16x16xf32>
    %cst_118 = arith.constant dense<0xFF800000> : vector<16xf32>
    %303 = vector.multi_reduction <maximumf>, %302, %cst_118 [1] : vector<16x16xf32> to vector<16xf32>
    %304 = vector.shape_cast %303 : vector<16xf32> to vector<16x1xf32>
    %305 = vector.broadcast %304 : vector<16x1xf32> to vector<16x16xf32>
    %306 = arith.subf %302, %305 : vector<16x16xf32>
    %307 = math.exp %306 : vector<16x16xf32>
    %cst_119 = arith.constant dense<0.000000e+00> : vector<16xf32>
    %308 = vector.multi_reduction <add>, %307, %cst_119 [1] : vector<16x16xf32> to vector<16xf32>
    %309 = vector.shape_cast %308 : vector<16xf32> to vector<16x1xf32>
    %310 = tpu.reciprocal %309 {approx = true} : vector<16x1xf32> -> vector<16x1xf32>
    %311 = vector.broadcast %310 : vector<16x1xf32> to vector<16x16xf32>
    %312 = arith.mulf %307, %311 : vector<16x16xf32>
    %313 = vector.extract_strided_slice %281 {offsets = [0, 8], sizes = [16, 8], strides = [1, 1]} : vector<16x32xf32> to vector<16x8xf32>
    %cst_120 = arith.constant dense<0.000000e+00> : vector<16x8xf32>
    %314 = tpu.matmul %312, %313, %cst_120 {dimension_numbers = #tpu.dot_dimension_numbers<[1], [0], [0], [1], [0, 0, 1, 1], [], []>} : vector<16x16xf32>, vector<16x8xf32>, vector<16x8xf32> -> vector<16x8xf32>
    %315 = vector.extract_strided_slice %271 {offsets = [0, 16], sizes = [16, 8], strides = [1, 1]} : vector<16x32xf32> to vector<16x8xf32>
    %316 = vector.extract_strided_slice %276 {offsets = [0, 16], sizes = [16, 8], strides = [1, 1]} : vector<16x32xf32> to vector<16x8xf32>
    %cst_121 = arith.constant dense<0.000000e+00> : vector<16x16xf32>
    %317 = tpu.matmul %315, %316, %cst_121 {dimension_numbers = #tpu.dot_dimension_numbers<[1], [1], [0], [0], [0, 0, 1, 0], [], []>} : vector<16x8xf32>, vector<16x8xf32>, vector<16x16xf32> -> vector<16x16xf32>
    %318 = arith.addf %317, %2 : vector<16x16xf32>
    %cst_122 = arith.constant dense<0xFF800000> : vector<16xf32>
    %319 = vector.multi_reduction <maximumf>, %318, %cst_122 [1] : vector<16x16xf32> to vector<16xf32>
    %320 = vector.shape_cast %319 : vector<16xf32> to vector<16x1xf32>
    %321 = vector.broadcast %320 : vector<16x1xf32> to vector<16x16xf32>
    %322 = arith.subf %318, %321 : vector<16x16xf32>
    %323 = math.exp %322 : vector<16x16xf32>
    %cst_123 = arith.constant dense<0.000000e+00> : vector<16xf32>
    %324 = vector.multi_reduction <add>, %323, %cst_123 [1] : vector<16x16xf32> to vector<16xf32>
    %325 = vector.shape_cast %324 : vector<16xf32> to vector<16x1xf32>
    %326 = tpu.reciprocal %325 {approx = true} : vector<16x1xf32> -> vector<16x1xf32>
    %327 = vector.broadcast %326 : vector<16x1xf32> to vector<16x16xf32>
    %328 = arith.mulf %323, %327 : vector<16x16xf32>
    %329 = vector.extract_strided_slice %281 {offsets = [0, 16], sizes = [16, 8], strides = [1, 1]} : vector<16x32xf32> to vector<16x8xf32>
    %cst_124 = arith.constant dense<0.000000e+00> : vector<16x8xf32>
    %330 = tpu.matmul %328, %329, %cst_124 {dimension_numbers = #tpu.dot_dimension_numbers<[1], [0], [0], [1], [0, 0, 1, 1], [], []>} : vector<16x16xf32>, vector<16x8xf32>, vector<16x8xf32> -> vector<16x8xf32>
    %331 = vector.extract_strided_slice %271 {offsets = [0, 24], sizes = [16, 8], strides = [1, 1]} : vector<16x32xf32> to vector<16x8xf32>
    %332 = vector.extract_strided_slice %276 {offsets = [0, 24], sizes = [16, 8], strides = [1, 1]} : vector<16x32xf32> to vector<16x8xf32>
    %cst_125 = arith.constant dense<0.000000e+00> : vector<16x16xf32>
    %333 = tpu.matmul %331, %332, %cst_125 {dimension_numbers = #tpu.dot_dimension_numbers<[1], [1], [0], [0], [0, 0, 1, 0], [], []>} : vector<16x8xf32>, vector<16x8xf32>, vector<16x16xf32> -> vector<16x16xf32>
    %334 = arith.addf %333, %2 : vector<16x16xf32>
    %cst_126 = arith.constant dense<0xFF800000> : vector<16xf32>
    %335 = vector.multi_reduction <maximumf>, %334, %cst_126 [1] : vector<16x16xf32> to vector<16xf32>
    %336 = vector.shape_cast %335 : vector<16xf32> to vector<16x1xf32>
    %337 = vector.broadcast %336 : vector<16x1xf32> to vector<16x16xf32>
    %338 = arith.subf %334, %337 : vector<16x16xf32>
    %339 = math.exp %338 : vector<16x16xf32>
    %cst_127 = arith.constant dense<0.000000e+00> : vector<16xf32>
    %340 = vector.multi_reduction <add>, %339, %cst_127 [1] : vector<16x16xf32> to vector<16xf32>
    %341 = vector.shape_cast %340 : vector<16xf32> to vector<16x1xf32>
    %342 = tpu.reciprocal %341 {approx = true} : vector<16x1xf32> -> vector<16x1xf32>
    %343 = vector.broadcast %342 : vector<16x1xf32> to vector<16x16xf32>
    %344 = arith.mulf %339, %343 : vector<16x16xf32>
    %345 = vector.extract_strided_slice %281 {offsets = [0, 24], sizes = [16, 8], strides = [1, 1]} : vector<16x32xf32> to vector<16x8xf32>
    %cst_128 = arith.constant dense<0.000000e+00> : vector<16x8xf32>
    %346 = tpu.matmul %344, %345, %cst_128 {dimension_numbers = #tpu.dot_dimension_numbers<[1], [0], [0], [1], [0, 0, 1, 1], [], []>} : vector<16x16xf32>, vector<16x8xf32>, vector<16x8xf32> -> vector<16x8xf32>
    %347 = tpu.concatenate %298, %314, %330, %346 in 1 : vector<16x8xf32>, vector<16x8xf32>, vector<16x8xf32>, vector<16x8xf32> -> vector<16x32xf32>
    %cst_129 = arith.constant dense<0.000000e+00> : vector<16x32xf32>
    %348 = tpu.matmul %347, %282, %cst_129 {dimension_numbers = #tpu.dot_dimension_numbers<[1], [0], [0], [1], [0, 0, 1, 1], [], []>} : vector<16x32xf32>, vector<32x32xf32>, vector<16x32xf32> -> vector<16x32xf32>
    %c3_130 = arith.constant 3 : index
    %c0_131 = arith.constant 0 : index
    %349 = vector.load %arg7[%c3_130, %c0_131] : memref<18x64xf32, #tpu.memory_space<vmem>>, vector<1x32xf32>
    %350 = vector.broadcast %349 : vector<1x32xf32> to vector<16x32xf32>
    %351 = arith.addf %348, %350 : vector<16x32xf32>
    %352 = arith.addf %264, %351 : vector<16x32xf32>
    %cst_132 = arith.constant dense<0.000000e+00> : vector<16xf32>
    %353 = vector.multi_reduction <add>, %352, %cst_132 [1] : vector<16x32xf32> to vector<16xf32>
    %354 = vector.shape_cast %353 : vector<16xf32> to vector<16x1xf32>
    %cst_133 = arith.constant 3.200000e+01 : f32
    %355 = vector.broadcast %cst_133 : f32 to vector<16x1xf32>
    %356 = arith.divf %354, %355 : vector<16x1xf32>
    %357 = vector.broadcast %356 : vector<16x1xf32> to vector<16x32xf32>
    %358 = arith.subf %352, %357 : vector<16x32xf32>
    %359 = arith.mulf %358, %358 : vector<16x32xf32>
    %cst_134 = arith.constant dense<0.000000e+00> : vector<16xf32>
    %360 = vector.multi_reduction <add>, %359, %cst_134 [1] : vector<16x32xf32> to vector<16xf32>
    %361 = vector.shape_cast %360 : vector<16xf32> to vector<16x1xf32>
    %cst_135 = arith.constant 3.200000e+01 : f32
    %362 = vector.broadcast %cst_135 : f32 to vector<16x1xf32>
    %363 = arith.divf %361, %362 : vector<16x1xf32>
    %364 = vector.broadcast %356 : vector<16x1xf32> to vector<16x32xf32>
    %365 = arith.subf %352, %364 : vector<16x32xf32>
    %cst_136 = arith.constant 9.99999974E-6 : f32
    %366 = vector.broadcast %cst_136 : f32 to vector<16x1xf32>
    %367 = arith.addf %363, %366 : vector<16x1xf32>
    %368 = math.rsqrt %367 : vector<16x1xf32>
    %369 = vector.broadcast %368 : vector<16x1xf32> to vector<16x32xf32>
    %370 = arith.mulf %365, %369 : vector<16x32xf32>
    %c9_137 = arith.constant 9 : index
    %c0_138 = arith.constant 0 : index
    %371 = vector.load %arg7[%c9_137, %c0_138] : memref<18x64xf32, #tpu.memory_space<vmem>>, vector<1x32xf32>
    %372 = vector.broadcast %371 : vector<1x32xf32> to vector<16x32xf32>
    %373 = arith.mulf %370, %372 : vector<16x32xf32>
    %c10_139 = arith.constant 10 : index
    %c0_140 = arith.constant 0 : index
    %374 = vector.load %arg7[%c10_139, %c0_140] : memref<18x64xf32, #tpu.memory_space<vmem>>, vector<1x32xf32>
    %375 = vector.broadcast %374 : vector<1x32xf32> to vector<16x32xf32>
    %376 = arith.addf %373, %375 : vector<16x32xf32>
    %c128_141 = arith.constant 128 : index
    %c0_142 = arith.constant 0 : index
    %377 = vector.load %arg5[%c128_141, %c0_142] : memref<320x32xf32, #tpu.memory_space<vmem>>, vector<32x32xf32>
    %cst_143 = arith.constant dense<0.000000e+00> : vector<16x32xf32>
    %378 = tpu.matmul %376, %377, %cst_143 {dimension_numbers = #tpu.dot_dimension_numbers<[1], [0], [0], [1], [0, 0, 1, 1], [], []>} : vector<16x32xf32>, vector<32x32xf32>, vector<16x32xf32> -> vector<16x32xf32>
    %c4_144 = arith.constant 4 : index
    %c0_145 = arith.constant 0 : index
    %379 = vector.load %arg7[%c4_144, %c0_145] : memref<18x64xf32, #tpu.memory_space<vmem>>, vector<1x32xf32>
    %380 = vector.broadcast %379 : vector<1x32xf32> to vector<16x32xf32>
    %381 = arith.addf %378, %380 : vector<16x32xf32>
    %cst_146 = arith.constant 0.353553385 : f32
    %382 = vector.broadcast %cst_146 : f32 to vector<16x32xf32>
    %383 = arith.mulf %381, %382 : vector<16x32xf32>
    %c224_147 = arith.constant 224 : index
    %c0_148 = arith.constant 0 : index
    %384 = vector.load %arg5[%c224_147, %c0_148] : memref<320x32xf32, #tpu.memory_space<vmem>>, vector<32x32xf32>
    %385 = vector.extract_strided_slice %383 {offsets = [0, 0], sizes = [16, 8], strides = [1, 1]} : vector<16x32xf32> to vector<16x8xf32>
    %386 = vector.extract_strided_slice %8 {offsets = [0, 0], sizes = [16, 8], strides = [1, 1]} : vector<16x32xf32> to vector<16x8xf32>
    %cst_149 = arith.constant dense<0.000000e+00> : vector<16x16xf32>
    %387 = tpu.matmul %385, %386, %cst_149 {dimension_numbers = #tpu.dot_dimension_numbers<[1], [1], [0], [0], [0, 0, 1, 0], [], []>} : vector<16x8xf32>, vector<16x8xf32>, vector<16x16xf32> -> vector<16x16xf32>
    %388 = arith.addf %387, %3 : vector<16x16xf32>
    %cst_150 = arith.constant dense<0xFF800000> : vector<16xf32>
    %389 = vector.multi_reduction <maximumf>, %388, %cst_150 [1] : vector<16x16xf32> to vector<16xf32>
    %390 = vector.shape_cast %389 : vector<16xf32> to vector<16x1xf32>
    %391 = vector.broadcast %390 : vector<16x1xf32> to vector<16x16xf32>
    %392 = arith.subf %388, %391 : vector<16x16xf32>
    %393 = math.exp %392 : vector<16x16xf32>
    %cst_151 = arith.constant dense<0.000000e+00> : vector<16xf32>
    %394 = vector.multi_reduction <add>, %393, %cst_151 [1] : vector<16x16xf32> to vector<16xf32>
    %395 = vector.shape_cast %394 : vector<16xf32> to vector<16x1xf32>
    %396 = tpu.reciprocal %395 {approx = true} : vector<16x1xf32> -> vector<16x1xf32>
    %397 = vector.broadcast %396 : vector<16x1xf32> to vector<16x16xf32>
    %398 = arith.mulf %393, %397 : vector<16x16xf32>
    %399 = vector.extract_strided_slice %13 {offsets = [0, 0], sizes = [16, 8], strides = [1, 1]} : vector<16x32xf32> to vector<16x8xf32>
    %cst_152 = arith.constant dense<0.000000e+00> : vector<16x8xf32>
    %400 = tpu.matmul %398, %399, %cst_152 {dimension_numbers = #tpu.dot_dimension_numbers<[1], [0], [0], [1], [0, 0, 1, 1], [], []>} : vector<16x16xf32>, vector<16x8xf32>, vector<16x8xf32> -> vector<16x8xf32>
    %401 = vector.extract_strided_slice %383 {offsets = [0, 8], sizes = [16, 8], strides = [1, 1]} : vector<16x32xf32> to vector<16x8xf32>
    %402 = vector.extract_strided_slice %8 {offsets = [0, 8], sizes = [16, 8], strides = [1, 1]} : vector<16x32xf32> to vector<16x8xf32>
    %cst_153 = arith.constant dense<0.000000e+00> : vector<16x16xf32>
    %403 = tpu.matmul %401, %402, %cst_153 {dimension_numbers = #tpu.dot_dimension_numbers<[1], [1], [0], [0], [0, 0, 1, 0], [], []>} : vector<16x8xf32>, vector<16x8xf32>, vector<16x16xf32> -> vector<16x16xf32>
    %404 = arith.addf %403, %3 : vector<16x16xf32>
    %cst_154 = arith.constant dense<0xFF800000> : vector<16xf32>
    %405 = vector.multi_reduction <maximumf>, %404, %cst_154 [1] : vector<16x16xf32> to vector<16xf32>
    %406 = vector.shape_cast %405 : vector<16xf32> to vector<16x1xf32>
    %407 = vector.broadcast %406 : vector<16x1xf32> to vector<16x16xf32>
    %408 = arith.subf %404, %407 : vector<16x16xf32>
    %409 = math.exp %408 : vector<16x16xf32>
    %cst_155 = arith.constant dense<0.000000e+00> : vector<16xf32>
    %410 = vector.multi_reduction <add>, %409, %cst_155 [1] : vector<16x16xf32> to vector<16xf32>
    %411 = vector.shape_cast %410 : vector<16xf32> to vector<16x1xf32>
    %412 = tpu.reciprocal %411 {approx = true} : vector<16x1xf32> -> vector<16x1xf32>
    %413 = vector.broadcast %412 : vector<16x1xf32> to vector<16x16xf32>
    %414 = arith.mulf %409, %413 : vector<16x16xf32>
    %415 = vector.extract_strided_slice %13 {offsets = [0, 8], sizes = [16, 8], strides = [1, 1]} : vector<16x32xf32> to vector<16x8xf32>
    %cst_156 = arith.constant dense<0.000000e+00> : vector<16x8xf32>
    %416 = tpu.matmul %414, %415, %cst_156 {dimension_numbers = #tpu.dot_dimension_numbers<[1], [0], [0], [1], [0, 0, 1, 1], [], []>} : vector<16x16xf32>, vector<16x8xf32>, vector<16x8xf32> -> vector<16x8xf32>
    %417 = vector.extract_strided_slice %383 {offsets = [0, 16], sizes = [16, 8], strides = [1, 1]} : vector<16x32xf32> to vector<16x8xf32>
    %418 = vector.extract_strided_slice %8 {offsets = [0, 16], sizes = [16, 8], strides = [1, 1]} : vector<16x32xf32> to vector<16x8xf32>
    %cst_157 = arith.constant dense<0.000000e+00> : vector<16x16xf32>
    %419 = tpu.matmul %417, %418, %cst_157 {dimension_numbers = #tpu.dot_dimension_numbers<[1], [1], [0], [0], [0, 0, 1, 0], [], []>} : vector<16x8xf32>, vector<16x8xf32>, vector<16x16xf32> -> vector<16x16xf32>
    %420 = arith.addf %419, %3 : vector<16x16xf32>
    %cst_158 = arith.constant dense<0xFF800000> : vector<16xf32>
    %421 = vector.multi_reduction <maximumf>, %420, %cst_158 [1] : vector<16x16xf32> to vector<16xf32>
    %422 = vector.shape_cast %421 : vector<16xf32> to vector<16x1xf32>
    %423 = vector.broadcast %422 : vector<16x1xf32> to vector<16x16xf32>
    %424 = arith.subf %420, %423 : vector<16x16xf32>
    %425 = math.exp %424 : vector<16x16xf32>
    %cst_159 = arith.constant dense<0.000000e+00> : vector<16xf32>
    %426 = vector.multi_reduction <add>, %425, %cst_159 [1] : vector<16x16xf32> to vector<16xf32>
    %427 = vector.shape_cast %426 : vector<16xf32> to vector<16x1xf32>
    %428 = tpu.reciprocal %427 {approx = true} : vector<16x1xf32> -> vector<16x1xf32>
    %429 = vector.broadcast %428 : vector<16x1xf32> to vector<16x16xf32>
    %430 = arith.mulf %425, %429 : vector<16x16xf32>
    %431 = vector.extract_strided_slice %13 {offsets = [0, 16], sizes = [16, 8], strides = [1, 1]} : vector<16x32xf32> to vector<16x8xf32>
    %cst_160 = arith.constant dense<0.000000e+00> : vector<16x8xf32>
    %432 = tpu.matmul %430, %431, %cst_160 {dimension_numbers = #tpu.dot_dimension_numbers<[1], [0], [0], [1], [0, 0, 1, 1], [], []>} : vector<16x16xf32>, vector<16x8xf32>, vector<16x8xf32> -> vector<16x8xf32>
    %433 = vector.extract_strided_slice %383 {offsets = [0, 24], sizes = [16, 8], strides = [1, 1]} : vector<16x32xf32> to vector<16x8xf32>
    %434 = vector.extract_strided_slice %8 {offsets = [0, 24], sizes = [16, 8], strides = [1, 1]} : vector<16x32xf32> to vector<16x8xf32>
    %cst_161 = arith.constant dense<0.000000e+00> : vector<16x16xf32>
    %435 = tpu.matmul %433, %434, %cst_161 {dimension_numbers = #tpu.dot_dimension_numbers<[1], [1], [0], [0], [0, 0, 1, 0], [], []>} : vector<16x8xf32>, vector<16x8xf32>, vector<16x16xf32> -> vector<16x16xf32>
    %436 = arith.addf %435, %3 : vector<16x16xf32>
    %cst_162 = arith.constant dense<0xFF800000> : vector<16xf32>
    %437 = vector.multi_reduction <maximumf>, %436, %cst_162 [1] : vector<16x16xf32> to vector<16xf32>
    %438 = vector.shape_cast %437 : vector<16xf32> to vector<16x1xf32>
    %439 = vector.broadcast %438 : vector<16x1xf32> to vector<16x16xf32>
    %440 = arith.subf %436, %439 : vector<16x16xf32>
    %441 = math.exp %440 : vector<16x16xf32>
    %cst_163 = arith.constant dense<0.000000e+00> : vector<16xf32>
    %442 = vector.multi_reduction <add>, %441, %cst_163 [1] : vector<16x16xf32> to vector<16xf32>
    %443 = vector.shape_cast %442 : vector<16xf32> to vector<16x1xf32>
    %444 = tpu.reciprocal %443 {approx = true} : vector<16x1xf32> -> vector<16x1xf32>
    %445 = vector.broadcast %444 : vector<16x1xf32> to vector<16x16xf32>
    %446 = arith.mulf %441, %445 : vector<16x16xf32>
    %447 = vector.extract_strided_slice %13 {offsets = [0, 24], sizes = [16, 8], strides = [1, 1]} : vector<16x32xf32> to vector<16x8xf32>
    %cst_164 = arith.constant dense<0.000000e+00> : vector<16x8xf32>
    %448 = tpu.matmul %446, %447, %cst_164 {dimension_numbers = #tpu.dot_dimension_numbers<[1], [0], [0], [1], [0, 0, 1, 1], [], []>} : vector<16x16xf32>, vector<16x8xf32>, vector<16x8xf32> -> vector<16x8xf32>
    %449 = tpu.concatenate %400, %416, %432, %448 in 1 : vector<16x8xf32>, vector<16x8xf32>, vector<16x8xf32>, vector<16x8xf32> -> vector<16x32xf32>
    %cst_165 = arith.constant dense<0.000000e+00> : vector<16x32xf32>
    %450 = tpu.matmul %449, %384, %cst_165 {dimension_numbers = #tpu.dot_dimension_numbers<[1], [0], [0], [1], [0, 0, 1, 1], [], []>} : vector<16x32xf32>, vector<32x32xf32>, vector<16x32xf32> -> vector<16x32xf32>
    %c7_166 = arith.constant 7 : index
    %c0_167 = arith.constant 0 : index
    %451 = vector.load %arg7[%c7_166, %c0_167] : memref<18x64xf32, #tpu.memory_space<vmem>>, vector<1x32xf32>
    %452 = vector.broadcast %451 : vector<1x32xf32> to vector<16x32xf32>
    %453 = arith.addf %450, %452 : vector<16x32xf32>
    %454 = arith.addf %376, %453 : vector<16x32xf32>
    %cst_168 = arith.constant dense<0.000000e+00> : vector<16xf32>
    %455 = vector.multi_reduction <add>, %454, %cst_168 [1] : vector<16x32xf32> to vector<16xf32>
    %456 = vector.shape_cast %455 : vector<16xf32> to vector<16x1xf32>
    %cst_169 = arith.constant 3.200000e+01 : f32
    %457 = vector.broadcast %cst_169 : f32 to vector<16x1xf32>
    %458 = arith.divf %456, %457 : vector<16x1xf32>
    %459 = vector.broadcast %458 : vector<16x1xf32> to vector<16x32xf32>
    %460 = arith.subf %454, %459 : vector<16x32xf32>
    %461 = arith.mulf %460, %460 : vector<16x32xf32>
    %cst_170 = arith.constant dense<0.000000e+00> : vector<16xf32>
    %462 = vector.multi_reduction <add>, %461, %cst_170 [1] : vector<16x32xf32> to vector<16xf32>
    %463 = vector.shape_cast %462 : vector<16xf32> to vector<16x1xf32>
    %cst_171 = arith.constant 3.200000e+01 : f32
    %464 = vector.broadcast %cst_171 : f32 to vector<16x1xf32>
    %465 = arith.divf %463, %464 : vector<16x1xf32>
    %466 = vector.broadcast %458 : vector<16x1xf32> to vector<16x32xf32>
    %467 = arith.subf %454, %466 : vector<16x32xf32>
    %cst_172 = arith.constant 9.99999974E-6 : f32
    %468 = vector.broadcast %cst_172 : f32 to vector<16x1xf32>
    %469 = arith.addf %465, %468 : vector<16x1xf32>
    %470 = math.rsqrt %469 : vector<16x1xf32>
    %471 = vector.broadcast %470 : vector<16x1xf32> to vector<16x32xf32>
    %472 = arith.mulf %467, %471 : vector<16x32xf32>
    %c11_173 = arith.constant 11 : index
    %c0_174 = arith.constant 0 : index
    %473 = vector.load %arg7[%c11_173, %c0_174] : memref<18x64xf32, #tpu.memory_space<vmem>>, vector<1x32xf32>
    %474 = vector.broadcast %473 : vector<1x32xf32> to vector<16x32xf32>
    %475 = arith.mulf %472, %474 : vector<16x32xf32>
    %c12_175 = arith.constant 12 : index
    %c0_176 = arith.constant 0 : index
    %476 = vector.load %arg7[%c12_175, %c0_176] : memref<18x64xf32, #tpu.memory_space<vmem>>, vector<1x32xf32>
    %477 = vector.broadcast %476 : vector<1x32xf32> to vector<16x32xf32>
    %478 = arith.addf %475, %477 : vector<16x32xf32>
    %c0_177 = arith.constant 0 : index
    %c0_178 = arith.constant 0 : index
    %479 = vector.load %arg6[%c0_177, %c0_178] : memref<32x64xf32, #tpu.memory_space<vmem>>, vector<32x64xf32>
    %cst_179 = arith.constant dense<0.000000e+00> : vector<16x64xf32>
    %480 = tpu.matmul %478, %479, %cst_179 {dimension_numbers = #tpu.dot_dimension_numbers<[1], [0], [0], [1], [0, 0, 1, 1], [], []>} : vector<16x32xf32>, vector<32x64xf32>, vector<16x64xf32> -> vector<16x64xf32>
    %c17_180 = arith.constant 17 : index
    %c0_181 = arith.constant 0 : index
    %481 = vector.load %arg7[%c17_180, %c0_181] : memref<18x64xf32, #tpu.memory_space<vmem>>, vector<1x64xf32>
    %482 = vector.broadcast %481 : vector<1x64xf32> to vector<16x64xf32>
    %483 = arith.addf %480, %482 : vector<16x64xf32>
    %cst_182 = arith.constant 0.000000e+00 : f32
    %484 = vector.broadcast %cst_182 : f32 to vector<16x64xf32>
    %485 = arith.maximumf %483, %484 : vector<16x64xf32>
    %c256_183 = arith.constant 256 : index
    %c0_184 = arith.constant 0 : index
    %486 = vector.load %arg5[%c256_183, %c0_184] : memref<320x32xf32, #tpu.memory_space<vmem>>, vector<64x32xf32>
    %cst_185 = arith.constant dense<0.000000e+00> : vector<16x32xf32>
    %487 = tpu.matmul %485, %486, %cst_185 {dimension_numbers = #tpu.dot_dimension_numbers<[1], [0], [0], [1], [0, 0, 1, 1], [], []>} : vector<16x64xf32>, vector<64x32xf32>, vector<16x32xf32> -> vector<16x32xf32>
    %c8_186 = arith.constant 8 : index
    %c0_187 = arith.constant 0 : index
    %488 = vector.load %arg7[%c8_186, %c0_187] : memref<18x64xf32, #tpu.memory_space<vmem>>, vector<1x32xf32>
    %489 = vector.broadcast %488 : vector<1x32xf32> to vector<16x32xf32>
    %490 = arith.addf %487, %489 : vector<16x32xf32>
    %491 = arith.addf %478, %490 : vector<16x32xf32>
    %cst_188 = arith.constant dense<0.000000e+00> : vector<16xf32>
    %492 = vector.multi_reduction <add>, %491, %cst_188 [1] : vector<16x32xf32> to vector<16xf32>
    %493 = vector.shape_cast %492 : vector<16xf32> to vector<16x1xf32>
    %cst_189 = arith.constant 3.200000e+01 : f32
    %494 = vector.broadcast %cst_189 : f32 to vector<16x1xf32>
    %495 = arith.divf %493, %494 : vector<16x1xf32>
    %496 = vector.broadcast %495 : vector<16x1xf32> to vector<16x32xf32>
    %497 = arith.subf %491, %496 : vector<16x32xf32>
    %498 = arith.mulf %497, %497 : vector<16x32xf32>
    %cst_190 = arith.constant dense<0.000000e+00> : vector<16xf32>
    %499 = vector.multi_reduction <add>, %498, %cst_190 [1] : vector<16x32xf32> to vector<16xf32>
    %500 = vector.shape_cast %499 : vector<16xf32> to vector<16x1xf32>
    %cst_191 = arith.constant 3.200000e+01 : f32
    %501 = vector.broadcast %cst_191 : f32 to vector<16x1xf32>
    %502 = arith.divf %500, %501 : vector<16x1xf32>
    %503 = vector.broadcast %495 : vector<16x1xf32> to vector<16x32xf32>
    %504 = arith.subf %491, %503 : vector<16x32xf32>
    %cst_192 = arith.constant 9.99999974E-6 : f32
    %505 = vector.broadcast %cst_192 : f32 to vector<16x1xf32>
    %506 = arith.addf %502, %505 : vector<16x1xf32>
    %507 = math.rsqrt %506 : vector<16x1xf32>
    %508 = vector.broadcast %507 : vector<16x1xf32> to vector<16x32xf32>
    %509 = arith.mulf %504, %508 : vector<16x32xf32>
    %c13_193 = arith.constant 13 : index
    %c0_194 = arith.constant 0 : index
    %510 = vector.load %arg7[%c13_193, %c0_194] : memref<18x64xf32, #tpu.memory_space<vmem>>, vector<1x32xf32>
    %511 = vector.broadcast %510 : vector<1x32xf32> to vector<16x32xf32>
    %512 = arith.mulf %509, %511 : vector<16x32xf32>
    %c14_195 = arith.constant 14 : index
    %c0_196 = arith.constant 0 : index
    %513 = vector.load %arg7[%c14_195, %c0_196] : memref<18x64xf32, #tpu.memory_space<vmem>>, vector<1x32xf32>
    %514 = vector.broadcast %513 : vector<1x32xf32> to vector<16x32xf32>
    %515 = arith.addf %512, %514 : vector<16x32xf32>
    %c0_197 = arith.constant 0 : index
    %c0_198 = arith.constant 0 : index
    %516 = vector.load %arg5[%c0_197, %c0_198] : memref<320x32xf32, #tpu.memory_space<vmem>>, vector<32x32xf32>
    %cst_199 = arith.constant dense<0.000000e+00> : vector<16x32xf32>
    %517 = tpu.matmul %515, %516, %cst_199 {dimension_numbers = #tpu.dot_dimension_numbers<[1], [0], [0], [1], [0, 0, 1, 1], [], []>} : vector<16x32xf32>, vector<32x32xf32>, vector<16x32xf32> -> vector<16x32xf32>
    %c0_200 = arith.constant 0 : index
    %c0_201 = arith.constant 0 : index
    %518 = vector.load %arg7[%c0_200, %c0_201] : memref<18x64xf32, #tpu.memory_space<vmem>>, vector<1x32xf32>
    %519 = vector.broadcast %518 : vector<1x32xf32> to vector<16x32xf32>
    %520 = arith.addf %517, %519 : vector<16x32xf32>
    %cst_202 = arith.constant 0.353553385 : f32
    %521 = vector.broadcast %cst_202 : f32 to vector<16x32xf32>
    %522 = arith.mulf %520, %521 : vector<16x32xf32>
    %c32_203 = arith.constant 32 : index
    %c0_204 = arith.constant 0 : index
    %523 = vector.load %arg5[%c32_203, %c0_204] : memref<320x32xf32, #tpu.memory_space<vmem>>, vector<32x32xf32>
    %cst_205 = arith.constant dense<0.000000e+00> : vector<16x32xf32>
    %524 = tpu.matmul %515, %523, %cst_205 {dimension_numbers = #tpu.dot_dimension_numbers<[1], [0], [0], [1], [0, 0, 1, 1], [], []>} : vector<16x32xf32>, vector<32x32xf32>, vector<16x32xf32> -> vector<16x32xf32>
    %c1_206 = arith.constant 1 : index
    %c0_207 = arith.constant 0 : index
    %525 = vector.load %arg7[%c1_206, %c0_207] : memref<18x64xf32, #tpu.memory_space<vmem>>, vector<1x32xf32>
    %526 = vector.broadcast %525 : vector<1x32xf32> to vector<16x32xf32>
    %527 = arith.addf %524, %526 : vector<16x32xf32>
    %c64_208 = arith.constant 64 : index
    %c0_209 = arith.constant 0 : index
    %528 = vector.load %arg5[%c64_208, %c0_209] : memref<320x32xf32, #tpu.memory_space<vmem>>, vector<32x32xf32>
    %cst_210 = arith.constant dense<0.000000e+00> : vector<16x32xf32>
    %529 = tpu.matmul %515, %528, %cst_210 {dimension_numbers = #tpu.dot_dimension_numbers<[1], [0], [0], [1], [0, 0, 1, 1], [], []>} : vector<16x32xf32>, vector<32x32xf32>, vector<16x32xf32> -> vector<16x32xf32>
    %c2_211 = arith.constant 2 : index
    %c0_212 = arith.constant 0 : index
    %530 = vector.load %arg7[%c2_211, %c0_212] : memref<18x64xf32, #tpu.memory_space<vmem>>, vector<1x32xf32>
    %531 = vector.broadcast %530 : vector<1x32xf32> to vector<16x32xf32>
    %532 = arith.addf %529, %531 : vector<16x32xf32>
    %c96_213 = arith.constant 96 : index
    %c0_214 = arith.constant 0 : index
    %533 = vector.load %arg5[%c96_213, %c0_214] : memref<320x32xf32, #tpu.memory_space<vmem>>, vector<32x32xf32>
    %534 = vector.extract_strided_slice %522 {offsets = [0, 0], sizes = [16, 8], strides = [1, 1]} : vector<16x32xf32> to vector<16x8xf32>
    %535 = vector.extract_strided_slice %527 {offsets = [0, 0], sizes = [16, 8], strides = [1, 1]} : vector<16x32xf32> to vector<16x8xf32>
    %cst_215 = arith.constant dense<0.000000e+00> : vector<16x16xf32>
    %536 = tpu.matmul %534, %535, %cst_215 {dimension_numbers = #tpu.dot_dimension_numbers<[1], [1], [0], [0], [0, 0, 1, 0], [], []>} : vector<16x8xf32>, vector<16x8xf32>, vector<16x16xf32> -> vector<16x16xf32>
    %537 = arith.addf %536, %2 : vector<16x16xf32>
    %cst_216 = arith.constant dense<0xFF800000> : vector<16xf32>
    %538 = vector.multi_reduction <maximumf>, %537, %cst_216 [1] : vector<16x16xf32> to vector<16xf32>
    %539 = vector.shape_cast %538 : vector<16xf32> to vector<16x1xf32>
    %540 = vector.broadcast %539 : vector<16x1xf32> to vector<16x16xf32>
    %541 = arith.subf %537, %540 : vector<16x16xf32>
    %542 = math.exp %541 : vector<16x16xf32>
    %cst_217 = arith.constant dense<0.000000e+00> : vector<16xf32>
    %543 = vector.multi_reduction <add>, %542, %cst_217 [1] : vector<16x16xf32> to vector<16xf32>
    %544 = vector.shape_cast %543 : vector<16xf32> to vector<16x1xf32>
    %545 = tpu.reciprocal %544 {approx = true} : vector<16x1xf32> -> vector<16x1xf32>
    %546 = vector.broadcast %545 : vector<16x1xf32> to vector<16x16xf32>
    %547 = arith.mulf %542, %546 : vector<16x16xf32>
    %548 = vector.extract_strided_slice %532 {offsets = [0, 0], sizes = [16, 8], strides = [1, 1]} : vector<16x32xf32> to vector<16x8xf32>
    %cst_218 = arith.constant dense<0.000000e+00> : vector<16x8xf32>
    %549 = tpu.matmul %547, %548, %cst_218 {dimension_numbers = #tpu.dot_dimension_numbers<[1], [0], [0], [1], [0, 0, 1, 1], [], []>} : vector<16x16xf32>, vector<16x8xf32>, vector<16x8xf32> -> vector<16x8xf32>
    %550 = vector.extract_strided_slice %522 {offsets = [0, 8], sizes = [16, 8], strides = [1, 1]} : vector<16x32xf32> to vector<16x8xf32>
    %551 = vector.extract_strided_slice %527 {offsets = [0, 8], sizes = [16, 8], strides = [1, 1]} : vector<16x32xf32> to vector<16x8xf32>
    %cst_219 = arith.constant dense<0.000000e+00> : vector<16x16xf32>
    %552 = tpu.matmul %550, %551, %cst_219 {dimension_numbers = #tpu.dot_dimension_numbers<[1], [1], [0], [0], [0, 0, 1, 0], [], []>} : vector<16x8xf32>, vector<16x8xf32>, vector<16x16xf32> -> vector<16x16xf32>
    %553 = arith.addf %552, %2 : vector<16x16xf32>
    %cst_220 = arith.constant dense<0xFF800000> : vector<16xf32>
    %554 = vector.multi_reduction <maximumf>, %553, %cst_220 [1] : vector<16x16xf32> to vector<16xf32>
    %555 = vector.shape_cast %554 : vector<16xf32> to vector<16x1xf32>
    %556 = vector.broadcast %555 : vector<16x1xf32> to vector<16x16xf32>
    %557 = arith.subf %553, %556 : vector<16x16xf32>
    %558 = math.exp %557 : vector<16x16xf32>
    %cst_221 = arith.constant dense<0.000000e+00> : vector<16xf32>
    %559 = vector.multi_reduction <add>, %558, %cst_221 [1] : vector<16x16xf32> to vector<16xf32>
    %560 = vector.shape_cast %559 : vector<16xf32> to vector<16x1xf32>
    %561 = tpu.reciprocal %560 {approx = true} : vector<16x1xf32> -> vector<16x1xf32>
    %562 = vector.broadcast %561 : vector<16x1xf32> to vector<16x16xf32>
    %563 = arith.mulf %558, %562 : vector<16x16xf32>
    %564 = vector.extract_strided_slice %532 {offsets = [0, 8], sizes = [16, 8], strides = [1, 1]} : vector<16x32xf32> to vector<16x8xf32>
    %cst_222 = arith.constant dense<0.000000e+00> : vector<16x8xf32>
    %565 = tpu.matmul %563, %564, %cst_222 {dimension_numbers = #tpu.dot_dimension_numbers<[1], [0], [0], [1], [0, 0, 1, 1], [], []>} : vector<16x16xf32>, vector<16x8xf32>, vector<16x8xf32> -> vector<16x8xf32>
    %566 = vector.extract_strided_slice %522 {offsets = [0, 16], sizes = [16, 8], strides = [1, 1]} : vector<16x32xf32> to vector<16x8xf32>
    %567 = vector.extract_strided_slice %527 {offsets = [0, 16], sizes = [16, 8], strides = [1, 1]} : vector<16x32xf32> to vector<16x8xf32>
    %cst_223 = arith.constant dense<0.000000e+00> : vector<16x16xf32>
    %568 = tpu.matmul %566, %567, %cst_223 {dimension_numbers = #tpu.dot_dimension_numbers<[1], [1], [0], [0], [0, 0, 1, 0], [], []>} : vector<16x8xf32>, vector<16x8xf32>, vector<16x16xf32> -> vector<16x16xf32>
    %569 = arith.addf %568, %2 : vector<16x16xf32>
    %cst_224 = arith.constant dense<0xFF800000> : vector<16xf32>
    %570 = vector.multi_reduction <maximumf>, %569, %cst_224 [1] : vector<16x16xf32> to vector<16xf32>
    %571 = vector.shape_cast %570 : vector<16xf32> to vector<16x1xf32>
    %572 = vector.broadcast %571 : vector<16x1xf32> to vector<16x16xf32>
    %573 = arith.subf %569, %572 : vector<16x16xf32>
    %574 = math.exp %573 : vector<16x16xf32>
    %cst_225 = arith.constant dense<0.000000e+00> : vector<16xf32>
    %575 = vector.multi_reduction <add>, %574, %cst_225 [1] : vector<16x16xf32> to vector<16xf32>
    %576 = vector.shape_cast %575 : vector<16xf32> to vector<16x1xf32>
    %577 = tpu.reciprocal %576 {approx = true} : vector<16x1xf32> -> vector<16x1xf32>
    %578 = vector.broadcast %577 : vector<16x1xf32> to vector<16x16xf32>
    %579 = arith.mulf %574, %578 : vector<16x16xf32>
    %580 = vector.extract_strided_slice %532 {offsets = [0, 16], sizes = [16, 8], strides = [1, 1]} : vector<16x32xf32> to vector<16x8xf32>
    %cst_226 = arith.constant dense<0.000000e+00> : vector<16x8xf32>
    %581 = tpu.matmul %579, %580, %cst_226 {dimension_numbers = #tpu.dot_dimension_numbers<[1], [0], [0], [1], [0, 0, 1, 1], [], []>} : vector<16x16xf32>, vector<16x8xf32>, vector<16x8xf32> -> vector<16x8xf32>
    %582 = vector.extract_strided_slice %522 {offsets = [0, 24], sizes = [16, 8], strides = [1, 1]} : vector<16x32xf32> to vector<16x8xf32>
    %583 = vector.extract_strided_slice %527 {offsets = [0, 24], sizes = [16, 8], strides = [1, 1]} : vector<16x32xf32> to vector<16x8xf32>
    %cst_227 = arith.constant dense<0.000000e+00> : vector<16x16xf32>
    %584 = tpu.matmul %582, %583, %cst_227 {dimension_numbers = #tpu.dot_dimension_numbers<[1], [1], [0], [0], [0, 0, 1, 0], [], []>} : vector<16x8xf32>, vector<16x8xf32>, vector<16x16xf32> -> vector<16x16xf32>
    %585 = arith.addf %584, %2 : vector<16x16xf32>
    %cst_228 = arith.constant dense<0xFF800000> : vector<16xf32>
    %586 = vector.multi_reduction <maximumf>, %585, %cst_228 [1] : vector<16x16xf32> to vector<16xf32>
    %587 = vector.shape_cast %586 : vector<16xf32> to vector<16x1xf32>
    %588 = vector.broadcast %587 : vector<16x1xf32> to vector<16x16xf32>
    %589 = arith.subf %585, %588 : vector<16x16xf32>
    %590 = math.exp %589 : vector<16x16xf32>
    %cst_229 = arith.constant dense<0.000000e+00> : vector<16xf32>
    %591 = vector.multi_reduction <add>, %590, %cst_229 [1] : vector<16x16xf32> to vector<16xf32>
    %592 = vector.shape_cast %591 : vector<16xf32> to vector<16x1xf32>
    %593 = tpu.reciprocal %592 {approx = true} : vector<16x1xf32> -> vector<16x1xf32>
    %594 = vector.broadcast %593 : vector<16x1xf32> to vector<16x16xf32>
    %595 = arith.mulf %590, %594 : vector<16x16xf32>
    %596 = vector.extract_strided_slice %532 {offsets = [0, 24], sizes = [16, 8], strides = [1, 1]} : vector<16x32xf32> to vector<16x8xf32>
    %cst_230 = arith.constant dense<0.000000e+00> : vector<16x8xf32>
    %597 = tpu.matmul %595, %596, %cst_230 {dimension_numbers = #tpu.dot_dimension_numbers<[1], [0], [0], [1], [0, 0, 1, 1], [], []>} : vector<16x16xf32>, vector<16x8xf32>, vector<16x8xf32> -> vector<16x8xf32>
    %598 = tpu.concatenate %549, %565, %581, %597 in 1 : vector<16x8xf32>, vector<16x8xf32>, vector<16x8xf32>, vector<16x8xf32> -> vector<16x32xf32>
    %cst_231 = arith.constant dense<0.000000e+00> : vector<16x32xf32>
    %599 = tpu.matmul %598, %533, %cst_231 {dimension_numbers = #tpu.dot_dimension_numbers<[1], [0], [0], [1], [0, 0, 1, 1], [], []>} : vector<16x32xf32>, vector<32x32xf32>, vector<16x32xf32> -> vector<16x32xf32>
    %c3_232 = arith.constant 3 : index
    %c0_233 = arith.constant 0 : index
    %600 = vector.load %arg7[%c3_232, %c0_233] : memref<18x64xf32, #tpu.memory_space<vmem>>, vector<1x32xf32>
    %601 = vector.broadcast %600 : vector<1x32xf32> to vector<16x32xf32>
    %602 = arith.addf %599, %601 : vector<16x32xf32>
    %603 = arith.addf %515, %602 : vector<16x32xf32>
    %cst_234 = arith.constant dense<0.000000e+00> : vector<16xf32>
    %604 = vector.multi_reduction <add>, %603, %cst_234 [1] : vector<16x32xf32> to vector<16xf32>
    %605 = vector.shape_cast %604 : vector<16xf32> to vector<16x1xf32>
    %cst_235 = arith.constant 3.200000e+01 : f32
    %606 = vector.broadcast %cst_235 : f32 to vector<16x1xf32>
    %607 = arith.divf %605, %606 : vector<16x1xf32>
    %608 = vector.broadcast %607 : vector<16x1xf32> to vector<16x32xf32>
    %609 = arith.subf %603, %608 : vector<16x32xf32>
    %610 = arith.mulf %609, %609 : vector<16x32xf32>
    %cst_236 = arith.constant dense<0.000000e+00> : vector<16xf32>
    %611 = vector.multi_reduction <add>, %610, %cst_236 [1] : vector<16x32xf32> to vector<16xf32>
    %612 = vector.shape_cast %611 : vector<16xf32> to vector<16x1xf32>
    %cst_237 = arith.constant 3.200000e+01 : f32
    %613 = vector.broadcast %cst_237 : f32 to vector<16x1xf32>
    %614 = arith.divf %612, %613 : vector<16x1xf32>
    %615 = vector.broadcast %607 : vector<16x1xf32> to vector<16x32xf32>
    %616 = arith.subf %603, %615 : vector<16x32xf32>
    %cst_238 = arith.constant 9.99999974E-6 : f32
    %617 = vector.broadcast %cst_238 : f32 to vector<16x1xf32>
    %618 = arith.addf %614, %617 : vector<16x1xf32>
    %619 = math.rsqrt %618 : vector<16x1xf32>
    %620 = vector.broadcast %619 : vector<16x1xf32> to vector<16x32xf32>
    %621 = arith.mulf %616, %620 : vector<16x32xf32>
    %c9_239 = arith.constant 9 : index
    %c0_240 = arith.constant 0 : index
    %622 = vector.load %arg7[%c9_239, %c0_240] : memref<18x64xf32, #tpu.memory_space<vmem>>, vector<1x32xf32>
    %623 = vector.broadcast %622 : vector<1x32xf32> to vector<16x32xf32>
    %624 = arith.mulf %621, %623 : vector<16x32xf32>
    %c10_241 = arith.constant 10 : index
    %c0_242 = arith.constant 0 : index
    %625 = vector.load %arg7[%c10_241, %c0_242] : memref<18x64xf32, #tpu.memory_space<vmem>>, vector<1x32xf32>
    %626 = vector.broadcast %625 : vector<1x32xf32> to vector<16x32xf32>
    %627 = arith.addf %624, %626 : vector<16x32xf32>
    %c128_243 = arith.constant 128 : index
    %c0_244 = arith.constant 0 : index
    %628 = vector.load %arg5[%c128_243, %c0_244] : memref<320x32xf32, #tpu.memory_space<vmem>>, vector<32x32xf32>
    %cst_245 = arith.constant dense<0.000000e+00> : vector<16x32xf32>
    %629 = tpu.matmul %627, %628, %cst_245 {dimension_numbers = #tpu.dot_dimension_numbers<[1], [0], [0], [1], [0, 0, 1, 1], [], []>} : vector<16x32xf32>, vector<32x32xf32>, vector<16x32xf32> -> vector<16x32xf32>
    %c4_246 = arith.constant 4 : index
    %c0_247 = arith.constant 0 : index
    %630 = vector.load %arg7[%c4_246, %c0_247] : memref<18x64xf32, #tpu.memory_space<vmem>>, vector<1x32xf32>
    %631 = vector.broadcast %630 : vector<1x32xf32> to vector<16x32xf32>
    %632 = arith.addf %629, %631 : vector<16x32xf32>
    %cst_248 = arith.constant 0.353553385 : f32
    %633 = vector.broadcast %cst_248 : f32 to vector<16x32xf32>
    %634 = arith.mulf %632, %633 : vector<16x32xf32>
    %c224_249 = arith.constant 224 : index
    %c0_250 = arith.constant 0 : index
    %635 = vector.load %arg5[%c224_249, %c0_250] : memref<320x32xf32, #tpu.memory_space<vmem>>, vector<32x32xf32>
    %636 = vector.extract_strided_slice %634 {offsets = [0, 0], sizes = [16, 8], strides = [1, 1]} : vector<16x32xf32> to vector<16x8xf32>
    %637 = vector.extract_strided_slice %8 {offsets = [0, 0], sizes = [16, 8], strides = [1, 1]} : vector<16x32xf32> to vector<16x8xf32>
    %cst_251 = arith.constant dense<0.000000e+00> : vector<16x16xf32>
    %638 = tpu.matmul %636, %637, %cst_251 {dimension_numbers = #tpu.dot_dimension_numbers<[1], [1], [0], [0], [0, 0, 1, 0], [], []>} : vector<16x8xf32>, vector<16x8xf32>, vector<16x16xf32> -> vector<16x16xf32>
    %639 = arith.addf %638, %3 : vector<16x16xf32>
    %cst_252 = arith.constant dense<0xFF800000> : vector<16xf32>
    %640 = vector.multi_reduction <maximumf>, %639, %cst_252 [1] : vector<16x16xf32> to vector<16xf32>
    %641 = vector.shape_cast %640 : vector<16xf32> to vector<16x1xf32>
    %642 = vector.broadcast %641 : vector<16x1xf32> to vector<16x16xf32>
    %643 = arith.subf %639, %642 : vector<16x16xf32>
    %644 = math.exp %643 : vector<16x16xf32>
    %cst_253 = arith.constant dense<0.000000e+00> : vector<16xf32>
    %645 = vector.multi_reduction <add>, %644, %cst_253 [1] : vector<16x16xf32> to vector<16xf32>
    %646 = vector.shape_cast %645 : vector<16xf32> to vector<16x1xf32>
    %647 = tpu.reciprocal %646 {approx = true} : vector<16x1xf32> -> vector<16x1xf32>
    %648 = vector.broadcast %647 : vector<16x1xf32> to vector<16x16xf32>
    %649 = arith.mulf %644, %648 : vector<16x16xf32>
    %650 = vector.extract_strided_slice %13 {offsets = [0, 0], sizes = [16, 8], strides = [1, 1]} : vector<16x32xf32> to vector<16x8xf32>
    %cst_254 = arith.constant dense<0.000000e+00> : vector<16x8xf32>
    %651 = tpu.matmul %649, %650, %cst_254 {dimension_numbers = #tpu.dot_dimension_numbers<[1], [0], [0], [1], [0, 0, 1, 1], [], []>} : vector<16x16xf32>, vector<16x8xf32>, vector<16x8xf32> -> vector<16x8xf32>
    %652 = vector.extract_strided_slice %634 {offsets = [0, 8], sizes = [16, 8], strides = [1, 1]} : vector<16x32xf32> to vector<16x8xf32>
    %653 = vector.extract_strided_slice %8 {offsets = [0, 8], sizes = [16, 8], strides = [1, 1]} : vector<16x32xf32> to vector<16x8xf32>
    %cst_255 = arith.constant dense<0.000000e+00> : vector<16x16xf32>
    %654 = tpu.matmul %652, %653, %cst_255 {dimension_numbers = #tpu.dot_dimension_numbers<[1], [1], [0], [0], [0, 0, 1, 0], [], []>} : vector<16x8xf32>, vector<16x8xf32>, vector<16x16xf32> -> vector<16x16xf32>
    %655 = arith.addf %654, %3 : vector<16x16xf32>
    %cst_256 = arith.constant dense<0xFF800000> : vector<16xf32>
    %656 = vector.multi_reduction <maximumf>, %655, %cst_256 [1] : vector<16x16xf32> to vector<16xf32>
    %657 = vector.shape_cast %656 : vector<16xf32> to vector<16x1xf32>
    %658 = vector.broadcast %657 : vector<16x1xf32> to vector<16x16xf32>
    %659 = arith.subf %655, %658 : vector<16x16xf32>
    %660 = math.exp %659 : vector<16x16xf32>
    %cst_257 = arith.constant dense<0.000000e+00> : vector<16xf32>
    %661 = vector.multi_reduction <add>, %660, %cst_257 [1] : vector<16x16xf32> to vector<16xf32>
    %662 = vector.shape_cast %661 : vector<16xf32> to vector<16x1xf32>
    %663 = tpu.reciprocal %662 {approx = true} : vector<16x1xf32> -> vector<16x1xf32>
    %664 = vector.broadcast %663 : vector<16x1xf32> to vector<16x16xf32>
    %665 = arith.mulf %660, %664 : vector<16x16xf32>
    %666 = vector.extract_strided_slice %13 {offsets = [0, 8], sizes = [16, 8], strides = [1, 1]} : vector<16x32xf32> to vector<16x8xf32>
    %cst_258 = arith.constant dense<0.000000e+00> : vector<16x8xf32>
    %667 = tpu.matmul %665, %666, %cst_258 {dimension_numbers = #tpu.dot_dimension_numbers<[1], [0], [0], [1], [0, 0, 1, 1], [], []>} : vector<16x16xf32>, vector<16x8xf32>, vector<16x8xf32> -> vector<16x8xf32>
    %668 = vector.extract_strided_slice %634 {offsets = [0, 16], sizes = [16, 8], strides = [1, 1]} : vector<16x32xf32> to vector<16x8xf32>
    %669 = vector.extract_strided_slice %8 {offsets = [0, 16], sizes = [16, 8], strides = [1, 1]} : vector<16x32xf32> to vector<16x8xf32>
    %cst_259 = arith.constant dense<0.000000e+00> : vector<16x16xf32>
    %670 = tpu.matmul %668, %669, %cst_259 {dimension_numbers = #tpu.dot_dimension_numbers<[1], [1], [0], [0], [0, 0, 1, 0], [], []>} : vector<16x8xf32>, vector<16x8xf32>, vector<16x16xf32> -> vector<16x16xf32>
    %671 = arith.addf %670, %3 : vector<16x16xf32>
    %cst_260 = arith.constant dense<0xFF800000> : vector<16xf32>
    %672 = vector.multi_reduction <maximumf>, %671, %cst_260 [1] : vector<16x16xf32> to vector<16xf32>
    %673 = vector.shape_cast %672 : vector<16xf32> to vector<16x1xf32>
    %674 = vector.broadcast %673 : vector<16x1xf32> to vector<16x16xf32>
    %675 = arith.subf %671, %674 : vector<16x16xf32>
    %676 = math.exp %675 : vector<16x16xf32>
    %cst_261 = arith.constant dense<0.000000e+00> : vector<16xf32>
    %677 = vector.multi_reduction <add>, %676, %cst_261 [1] : vector<16x16xf32> to vector<16xf32>
    %678 = vector.shape_cast %677 : vector<16xf32> to vector<16x1xf32>
    %679 = tpu.reciprocal %678 {approx = true} : vector<16x1xf32> -> vector<16x1xf32>
    %680 = vector.broadcast %679 : vector<16x1xf32> to vector<16x16xf32>
    %681 = arith.mulf %676, %680 : vector<16x16xf32>
    %682 = vector.extract_strided_slice %13 {offsets = [0, 16], sizes = [16, 8], strides = [1, 1]} : vector<16x32xf32> to vector<16x8xf32>
    %cst_262 = arith.constant dense<0.000000e+00> : vector<16x8xf32>
    %683 = tpu.matmul %681, %682, %cst_262 {dimension_numbers = #tpu.dot_dimension_numbers<[1], [0], [0], [1], [0, 0, 1, 1], [], []>} : vector<16x16xf32>, vector<16x8xf32>, vector<16x8xf32> -> vector<16x8xf32>
    %684 = vector.extract_strided_slice %634 {offsets = [0, 24], sizes = [16, 8], strides = [1, 1]} : vector<16x32xf32> to vector<16x8xf32>
    %685 = vector.extract_strided_slice %8 {offsets = [0, 24], sizes = [16, 8], strides = [1, 1]} : vector<16x32xf32> to vector<16x8xf32>
    %cst_263 = arith.constant dense<0.000000e+00> : vector<16x16xf32>
    %686 = tpu.matmul %684, %685, %cst_263 {dimension_numbers = #tpu.dot_dimension_numbers<[1], [1], [0], [0], [0, 0, 1, 0], [], []>} : vector<16x8xf32>, vector<16x8xf32>, vector<16x16xf32> -> vector<16x16xf32>
    %687 = arith.addf %686, %3 : vector<16x16xf32>
    %cst_264 = arith.constant dense<0xFF800000> : vector<16xf32>
    %688 = vector.multi_reduction <maximumf>, %687, %cst_264 [1] : vector<16x16xf32> to vector<16xf32>
    %689 = vector.shape_cast %688 : vector<16xf32> to vector<16x1xf32>
    %690 = vector.broadcast %689 : vector<16x1xf32> to vector<16x16xf32>
    %691 = arith.subf %687, %690 : vector<16x16xf32>
    %692 = math.exp %691 : vector<16x16xf32>
    %cst_265 = arith.constant dense<0.000000e+00> : vector<16xf32>
    %693 = vector.multi_reduction <add>, %692, %cst_265 [1] : vector<16x16xf32> to vector<16xf32>
    %694 = vector.shape_cast %693 : vector<16xf32> to vector<16x1xf32>
    %695 = tpu.reciprocal %694 {approx = true} : vector<16x1xf32> -> vector<16x1xf32>
    %696 = vector.broadcast %695 : vector<16x1xf32> to vector<16x16xf32>
    %697 = arith.mulf %692, %696 : vector<16x16xf32>
    %698 = vector.extract_strided_slice %13 {offsets = [0, 24], sizes = [16, 8], strides = [1, 1]} : vector<16x32xf32> to vector<16x8xf32>
    %cst_266 = arith.constant dense<0.000000e+00> : vector<16x8xf32>
    %699 = tpu.matmul %697, %698, %cst_266 {dimension_numbers = #tpu.dot_dimension_numbers<[1], [0], [0], [1], [0, 0, 1, 1], [], []>} : vector<16x16xf32>, vector<16x8xf32>, vector<16x8xf32> -> vector<16x8xf32>
    %700 = tpu.concatenate %651, %667, %683, %699 in 1 : vector<16x8xf32>, vector<16x8xf32>, vector<16x8xf32>, vector<16x8xf32> -> vector<16x32xf32>
    %cst_267 = arith.constant dense<0.000000e+00> : vector<16x32xf32>
    %701 = tpu.matmul %700, %635, %cst_267 {dimension_numbers = #tpu.dot_dimension_numbers<[1], [0], [0], [1], [0, 0, 1, 1], [], []>} : vector<16x32xf32>, vector<32x32xf32>, vector<16x32xf32> -> vector<16x32xf32>
    %c7_268 = arith.constant 7 : index
    %c0_269 = arith.constant 0 : index
    %702 = vector.load %arg7[%c7_268, %c0_269] : memref<18x64xf32, #tpu.memory_space<vmem>>, vector<1x32xf32>
    %703 = vector.broadcast %702 : vector<1x32xf32> to vector<16x32xf32>
    %704 = arith.addf %701, %703 : vector<16x32xf32>
    %705 = arith.addf %627, %704 : vector<16x32xf32>
    %cst_270 = arith.constant dense<0.000000e+00> : vector<16xf32>
    %706 = vector.multi_reduction <add>, %705, %cst_270 [1] : vector<16x32xf32> to vector<16xf32>
    %707 = vector.shape_cast %706 : vector<16xf32> to vector<16x1xf32>
    %cst_271 = arith.constant 3.200000e+01 : f32
    %708 = vector.broadcast %cst_271 : f32 to vector<16x1xf32>
    %709 = arith.divf %707, %708 : vector<16x1xf32>
    %710 = vector.broadcast %709 : vector<16x1xf32> to vector<16x32xf32>
    %711 = arith.subf %705, %710 : vector<16x32xf32>
    %712 = arith.mulf %711, %711 : vector<16x32xf32>
    %cst_272 = arith.constant dense<0.000000e+00> : vector<16xf32>
    %713 = vector.multi_reduction <add>, %712, %cst_272 [1] : vector<16x32xf32> to vector<16xf32>
    %714 = vector.shape_cast %713 : vector<16xf32> to vector<16x1xf32>
    %cst_273 = arith.constant 3.200000e+01 : f32
    %715 = vector.broadcast %cst_273 : f32 to vector<16x1xf32>
    %716 = arith.divf %714, %715 : vector<16x1xf32>
    %717 = vector.broadcast %709 : vector<16x1xf32> to vector<16x32xf32>
    %718 = arith.subf %705, %717 : vector<16x32xf32>
    %cst_274 = arith.constant 9.99999974E-6 : f32
    %719 = vector.broadcast %cst_274 : f32 to vector<16x1xf32>
    %720 = arith.addf %716, %719 : vector<16x1xf32>
    %721 = math.rsqrt %720 : vector<16x1xf32>
    %722 = vector.broadcast %721 : vector<16x1xf32> to vector<16x32xf32>
    %723 = arith.mulf %718, %722 : vector<16x32xf32>
    %c11_275 = arith.constant 11 : index
    %c0_276 = arith.constant 0 : index
    %724 = vector.load %arg7[%c11_275, %c0_276] : memref<18x64xf32, #tpu.memory_space<vmem>>, vector<1x32xf32>
    %725 = vector.broadcast %724 : vector<1x32xf32> to vector<16x32xf32>
    %726 = arith.mulf %723, %725 : vector<16x32xf32>
    %c12_277 = arith.constant 12 : index
    %c0_278 = arith.constant 0 : index
    %727 = vector.load %arg7[%c12_277, %c0_278] : memref<18x64xf32, #tpu.memory_space<vmem>>, vector<1x32xf32>
    %728 = vector.broadcast %727 : vector<1x32xf32> to vector<16x32xf32>
    %729 = arith.addf %726, %728 : vector<16x32xf32>
    %c0_279 = arith.constant 0 : index
    %c0_280 = arith.constant 0 : index
    %730 = vector.load %arg6[%c0_279, %c0_280] : memref<32x64xf32, #tpu.memory_space<vmem>>, vector<32x64xf32>
    %cst_281 = arith.constant dense<0.000000e+00> : vector<16x64xf32>
    %731 = tpu.matmul %729, %730, %cst_281 {dimension_numbers = #tpu.dot_dimension_numbers<[1], [0], [0], [1], [0, 0, 1, 1], [], []>} : vector<16x32xf32>, vector<32x64xf32>, vector<16x64xf32> -> vector<16x64xf32>
    %c17_282 = arith.constant 17 : index
    %c0_283 = arith.constant 0 : index
    %732 = vector.load %arg7[%c17_282, %c0_283] : memref<18x64xf32, #tpu.memory_space<vmem>>, vector<1x64xf32>
    %733 = vector.broadcast %732 : vector<1x64xf32> to vector<16x64xf32>
    %734 = arith.addf %731, %733 : vector<16x64xf32>
    %cst_284 = arith.constant 0.000000e+00 : f32
    %735 = vector.broadcast %cst_284 : f32 to vector<16x64xf32>
    %736 = arith.maximumf %734, %735 : vector<16x64xf32>
    %c256_285 = arith.constant 256 : index
    %c0_286 = arith.constant 0 : index
    %737 = vector.load %arg5[%c256_285, %c0_286] : memref<320x32xf32, #tpu.memory_space<vmem>>, vector<64x32xf32>
    %cst_287 = arith.constant dense<0.000000e+00> : vector<16x32xf32>
    %738 = tpu.matmul %736, %737, %cst_287 {dimension_numbers = #tpu.dot_dimension_numbers<[1], [0], [0], [1], [0, 0, 1, 1], [], []>} : vector<16x64xf32>, vector<64x32xf32>, vector<16x32xf32> -> vector<16x32xf32>
    %c8_288 = arith.constant 8 : index
    %c0_289 = arith.constant 0 : index
    %739 = vector.load %arg7[%c8_288, %c0_289] : memref<18x64xf32, #tpu.memory_space<vmem>>, vector<1x32xf32>
    %740 = vector.broadcast %739 : vector<1x32xf32> to vector<16x32xf32>
    %741 = arith.addf %738, %740 : vector<16x32xf32>
    %742 = arith.addf %729, %741 : vector<16x32xf32>
    %cst_290 = arith.constant dense<0.000000e+00> : vector<16xf32>
    %743 = vector.multi_reduction <add>, %742, %cst_290 [1] : vector<16x32xf32> to vector<16xf32>
    %744 = vector.shape_cast %743 : vector<16xf32> to vector<16x1xf32>
    %cst_291 = arith.constant 3.200000e+01 : f32
    %745 = vector.broadcast %cst_291 : f32 to vector<16x1xf32>
    %746 = arith.divf %744, %745 : vector<16x1xf32>
    %747 = vector.broadcast %746 : vector<16x1xf32> to vector<16x32xf32>
    %748 = arith.subf %742, %747 : vector<16x32xf32>
    %749 = arith.mulf %748, %748 : vector<16x32xf32>
    %cst_292 = arith.constant dense<0.000000e+00> : vector<16xf32>
    %750 = vector.multi_reduction <add>, %749, %cst_292 [1] : vector<16x32xf32> to vector<16xf32>
    %751 = vector.shape_cast %750 : vector<16xf32> to vector<16x1xf32>
    %cst_293 = arith.constant 3.200000e+01 : f32
    %752 = vector.broadcast %cst_293 : f32 to vector<16x1xf32>
    %753 = arith.divf %751, %752 : vector<16x1xf32>
    %754 = vector.broadcast %746 : vector<16x1xf32> to vector<16x32xf32>
    %755 = arith.subf %742, %754 : vector<16x32xf32>
    %cst_294 = arith.constant 9.99999974E-6 : f32
    %756 = vector.broadcast %cst_294 : f32 to vector<16x1xf32>
    %757 = arith.addf %753, %756 : vector<16x1xf32>
    %758 = math.rsqrt %757 : vector<16x1xf32>
    %759 = vector.broadcast %758 : vector<16x1xf32> to vector<16x32xf32>
    %760 = arith.mulf %755, %759 : vector<16x32xf32>
    %c13_295 = arith.constant 13 : index
    %c0_296 = arith.constant 0 : index
    %761 = vector.load %arg7[%c13_295, %c0_296] : memref<18x64xf32, #tpu.memory_space<vmem>>, vector<1x32xf32>
    %762 = vector.broadcast %761 : vector<1x32xf32> to vector<16x32xf32>
    %763 = arith.mulf %760, %762 : vector<16x32xf32>
    %c14_297 = arith.constant 14 : index
    %c0_298 = arith.constant 0 : index
    %764 = vector.load %arg7[%c14_297, %c0_298] : memref<18x64xf32, #tpu.memory_space<vmem>>, vector<1x32xf32>
    %765 = vector.broadcast %764 : vector<1x32xf32> to vector<16x32xf32>
    %766 = arith.addf %763, %765 : vector<16x32xf32>
    %cst_299 = arith.constant dense<0.000000e+00> : vector<16xf32>
    %767 = vector.multi_reduction <add>, %766, %cst_299 [1] : vector<16x32xf32> to vector<16xf32>
    %768 = vector.shape_cast %767 : vector<16xf32> to vector<16x1xf32>
    %cst_300 = arith.constant 3.200000e+01 : f32
    %769 = vector.broadcast %cst_300 : f32 to vector<16x1xf32>
    %770 = arith.divf %768, %769 : vector<16x1xf32>
    %771 = vector.broadcast %770 : vector<16x1xf32> to vector<16x32xf32>
    %772 = arith.subf %766, %771 : vector<16x32xf32>
    %773 = arith.mulf %772, %772 : vector<16x32xf32>
    %cst_301 = arith.constant dense<0.000000e+00> : vector<16xf32>
    %774 = vector.multi_reduction <add>, %773, %cst_301 [1] : vector<16x32xf32> to vector<16xf32>
    %775 = vector.shape_cast %774 : vector<16xf32> to vector<16x1xf32>
    %cst_302 = arith.constant 3.200000e+01 : f32
    %776 = vector.broadcast %cst_302 : f32 to vector<16x1xf32>
    %777 = arith.divf %775, %776 : vector<16x1xf32>
    %778 = vector.broadcast %770 : vector<16x1xf32> to vector<16x32xf32>
    %779 = arith.subf %766, %778 : vector<16x32xf32>
    %cst_303 = arith.constant 9.99999974E-6 : f32
    %780 = vector.broadcast %cst_303 : f32 to vector<16x1xf32>
    %781 = arith.addf %777, %780 : vector<16x1xf32>
    %782 = math.rsqrt %781 : vector<16x1xf32>
    %783 = vector.broadcast %782 : vector<16x1xf32> to vector<16x32xf32>
    %784 = arith.mulf %779, %783 : vector<16x32xf32>
    %c15 = arith.constant 15 : index
    %c0_304 = arith.constant 0 : index
    %785 = vector.load %arg7[%c15, %c0_304] : memref<18x64xf32, #tpu.memory_space<vmem>>, vector<1x32xf32>
    %786 = vector.broadcast %785 : vector<1x32xf32> to vector<16x32xf32>
    %787 = arith.mulf %784, %786 : vector<16x32xf32>
    %c16 = arith.constant 16 : index
    %c0_305 = arith.constant 0 : index
    %788 = vector.load %arg7[%c16, %c0_305] : memref<18x64xf32, #tpu.memory_space<vmem>>, vector<1x32xf32>
    %789 = vector.broadcast %788 : vector<1x32xf32> to vector<16x32xf32>
    %790 = arith.addf %787, %789 : vector<16x32xf32>
    %c0_306 = arith.constant 0 : index
    %c0_307 = arith.constant 0 : index
    %791 = vector.load %arg8[%c0_306, %c0_307] : memref<16x32xf32, #tpu.memory_space<vmem>>, vector<16x32xf32>
    tpu.vector_store %arg8[%c0_306, %c0_307], %790 {strides = array<i32>} : memref<16x32xf32, #tpu.memory_space<vmem>>, vector<16x32xf32>,
    return
  }
  func.func @transform_0(%arg0: i32) -> (i32, i32) {
    %c0_i32 = arith.constant 0 : i32
    %c0_i32_0 = arith.constant 0 : i32
    %c0_i32_1 = arith.constant 0 : i32
    return %c0_i32, %c0_i32_0 : i32, i32
  }
  func.func @transform_1(%arg0: i32) -> (i32, i32) {
    %c0_i32 = arith.constant 0 : i32
    %c0_i32_0 = arith.constant 0 : i32
    %c0_i32_1 = arith.constant 0 : i32
    return %c0_i32, %c0_i32_0 : i32, i32
  }
  func.func @transform_2(%arg0: i32) -> (i32, i32) {
    %c0_i32 = arith.constant 0 : i32
    %c0_i32_0 = arith.constant 0 : i32
    %c0_i32_1 = arith.constant 0 : i32
    return %c0_i32, %c0_i32_0 : i32, i32
  }
  func.func @transform_3(%arg0: i32) -> (i32, i32) {
    %c0_i32 = arith.constant 0 : i32
    %c0_i32_0 = arith.constant 0 : i32
    %c0_i32_1 = arith.constant 0 : i32
    return %c0_i32, %c0_i32_0 : i32, i32
  }
  func.func @transform_4(%arg0: i32) -> (i32, i32) {
    %c0_i32 = arith.constant 0 : i32
    %c0_i32_0 = arith.constant 0 : i32
    %c0_i32_1 = arith.constant 0 : i32
    return %c0_i32, %c0_i32_0 : i32, i32
  }
  func.func @transform_5(%arg0: i32) -> (i32, i32) {
    %c0_i32 = arith.constant 0 : i32
    %c0_i32_0 = arith.constant 0 : i32
    %c0_i32_1 = arith.constant 0 : i32
    return %c0_i32, %c0_i32_0 : i32, i32
  }
  func.func @transform_6(%arg0: i32) -> (i32, i32) {
    %c0_i32 = arith.constant 0 : i32
    %c0_i32_0 = arith.constant 0 : i32
    %c0_i32_1 = arith.constant 0 : i32
    return %c0_i32, %c0_i32_0 : i32, i32
  }
  func.func @transform_7(%arg0: i32) -> (i32, i32) {
    %c0_i32 = arith.constant 0 : i32
    %c0_i32_0 = arith.constant 0 : i32
    %c0_i32_1 = arith.constant 0 : i32
    return %c0_i32, %c0_i32_0 : i32, i32
  }
}

</mosaic_0001>

<bundles_post_ra>
// kernel: tpu_custom_call.1
= control target key start
LH: loop header
LB: loop body
LE: loop exit
PB: predicated region body
PF: predicated region fallthrough
CT: control target
= control target key end

     0   :  { %vm44_vm0 = vcmask 261120   ;;  %s10677_s0 = inlined_call_operand.vmem [shape: f32[16,32], index: 0, kind: input, shape index: {}]   ;;  %s10678_s1 = inlined_call_operand.vmem [shape: f32[16,32], index: 1, kind: input, shape index: {}]   ;;  %s10679_s2 = inlined_call_operand.vmem [shape: f32[16,16], index: 2, kind: input, shape index: {}]   ;;  %s10680_s3 = inlined_call_operand.vmem [shape: f32[16,16], index: 3, kind: input, shape index: {}]   ;;  %s10681_s4 = inlined_call_operand.vmem [shape: f32[320,32], index: 4, kind: input, shape index: {}]   ;;  %s10682_s5 = inlined_call_operand.vmem [shape: f32[32,64], index: 5, kind: input, shape index: {}]   ;;  %s10683_s6 = inlined_call_operand.vmem [shape: f32[18,64], index: 6, kind: input, shape index: {}]   ;;  %s10684_s7 = inlined_call_operand.hbm [shape: f32[16,32], index: 7, kind: output, shape index: {}]  }
   0x1   :  { %v38_v0 = vld [vmem:[%s10681_s4 + $0xb8] sm:$0xff]  ;;  %v37_v1 = vld [vmem:[%s10681_s4 + $0xb0] sm:$0xff]  ;;  %v29_v2 = vld [vmem:[%s10678_s1] sm:$0xff] }
   0x2   :  { %7999 = vmatprep.subr.mxu1 %v38_v0  ;;  %v36_v3 = vld [vmem:[%s10681_s4 + $0xa8] sm:$0xff]  ;;  %8007 = vmatprep.mubr.msk.f32.mxu1 %vm44_vm0, %v29_v2  ;;  %v213_v4 = vld [vmem:[%s10681_s4 + $0x18] sm:$0xff]  ;;  %v212_v5 = vld [vmem:[%s10681_s4 + $0x10] sm:$0xff] }
   0x3   :  { %8000 = vmatpush3.msra.mxu1 %v38_v0  ;;  %8021 = vmatprep.subr.mxu0 %v213_v4  ;;  %v35_v6 = vld [vmem:[%s10681_s4 + $0xa0] sm:$0xff]  ;;  %v211_v7 = vld [vmem:[%s10681_s4 + $0x8] sm:$0xff]  ;;  %v129_v9 = vld [vmem:[%s10681_s4 + $0xd8] sm:$0xff] }
   0x4   :  { %8001 = vmatprep.subr.mxu1 %v37_v1  ;;  %8022 = vmatpush3.msra.mxu0 %v213_v4  ;;  %v30_v8 = vld [vmem:[%s10678_s1 + $0x8] sm:$0xff] }
   0x5   :  { %8002 = vmatpush3.msra.mxu1 %v37_v1  ;;  %8023 = vmatprep.subr.mxu0 %v212_v5 }
   0x6   :  { %8003 = vmatprep.subr.mxu1 %v36_v3  ;;  %8024 = vmatpush3.msra.mxu0 %v212_v5 }
   0x7   :  { %8004 = vmatpush3.msra.mxu1 %v36_v3 }
   0x8   :  { %12 = vsyncpa [#allocation3], 0  ;;  %8005 = vmatprep.subr.mxu1 %v35_v6  ;;  %8025 = vmatprep.subr.mxu0 %v211_v7  ;;  %v128_v10 = vld [vmem:[%s10681_s4 + $0xd0] sm:$0xff]  ;;  %v210_v11 = vld [vmem:[%s10681_s4] sm:$0xff]  ;;  %vm474_vm1 = vcmask 64512   ;;  %s9015_s22 = smov 120  }
   0x9   :  { %8006 = vmatpush3.msra.mxu1 %v35_v6  ;;  %8026 = vmatpush3.msra.mxu0 %v211_v7  ;;  %v127_v12 = vld [vmem:[%s10681_s4 + $0xc8] sm:$0xff]  ;;  %v9108_v13 = vld [vmem:[%s10677_s0] sm:$0xff]  ;;  %v305_v16 = vld [vmem:[%s10681_s4 + $0x38] sm:$0xff]  ;;  %vm562_vm2 = vcmask 130048   ;;  %s9016_s14 = smov 112   ;;  %s9017_s15 = smov 104  }
   0xa   :  { %8008 = vmatmul.mubr.msk.f32.vlgmr.msra.gmra.mxu1 %vm44_vm0, %v30_v8  ;;  %8010 = vmatprep.subr.mxu1 %v129_v9  ;;  %v9113_v14 = vld [vmem:[%s10677_s0 + $0x8] sm:$0xff]  ;;  %v126_v15 = vld [vmem:[%s10681_s4 + $0xc0] sm:$0xff]  ;;  %v304_v17 = vld [vmem:[%s10681_s4 + $0x30] sm:$0xff]  ;;  %s9018_s1 = smov 8   ;;  %s9019_s25 = smov 16   ;;  %vm1296_vm3 = vcmask 195584  }
   0xb   :  { %8011 = vmatpush3.msra.mxu1 %v129_v9  ;;  %8018 = vmatprep.mubr.msk.f32.mxu1 %vm44_vm0, %v29_v2  ;;  %v303_v18 = vld [vmem:[%s10681_s4 + $0x28] sm:$0xff]  ;;  %v302_v19 = vld [vmem:[%s10681_s4 + $0x20] sm:$0xff]  ;;  %v389_v36 = vld [vmem:[%s10681_s4 + $0x58] sm:$0xff]  ;;  %s9020_s0 = smov 24   ;;  %vm2579_vm4 = vcmask 523264   ;;  %s9021_s27 = smov [#allocation2]  }
   0xc   :  { %8012 = vmatprep.subr.mxu1 %v128_v10  ;;  %8027 = vmatprep.subr.mxu0 %v210_v11  ;;  %v9146_v21 = vld [vmem:[%s10683_s6 + $0x5] ss:$0 sm:$0xff]  ;;  %v7431_v25 = vld [vmem:[%s10683_s6] ss:$0 sm:$0xff]  ;;  %v9159_v28 = vld [vmem:[%s10683_s6 + $0x6] ss:$0 sm:$0xff] }
   0xd   :  { %8013 = vmatpush3.msra.mxu1 %v128_v10  ;;  %8028 = vmatpush3.msra.mxu0 %v210_v11  ;;  %v7434_v35 = vld [vmem:[%s10683_s6 + $0x1] ss:$0 sm:$0xff]  ;;  %v388_v37 = vld [vmem:[%s10681_s4 + $0x50] sm:$0xff]  ;;  %v387_v40 = vld [vmem:[%s10681_s4 + $0x48] sm:$0xff]  ;;  %s7414_s28 = sshll.u32 %s9021_s27, 4  ;;  %s7415_s28 = int_to_ptr.vmem [resolvable:$true] %s7414_s28 }
   0xe   :  { %8014 = vmatprep.subr.mxu1 %v127_v12  ;;  %8029 = vmatprep.mubr.msk.f32.mxu0 %vm44_vm0, %v9108_v13  ;;  %v386_v43 = vld [vmem:[%s10681_s4 + $0x40] sm:$0xff]  ;;  %v9221_v50 = vld [vmem:[%s10679_s2 + $0x8] sm:$0xff]  ;;  %s8993_s29 = scalar_lea.vmem %s7415_s28, 256  ;;  %p8998_p1 = scmp.lt.s32.totalorder %s7415_s28, %s7415_s28 }
   0xf   :  { %8015 = vmatpush3.msra.mxu1 %v127_v12  ;;  %8030 = vmatmul.mubr.msk.f32.vlgmr.msra.gmra.mxu0 %vm44_vm0, %v9113_v14  ;;  %v7437_v48 = vld [vmem:[%s10683_s6 + $0x2] ss:$0 sm:$0xff]  ;;  %p8994_p0 = scmp.ne.s32.totalorder %s7415_s28, %s8993_s29  ;;  %p8999_p2 = scmp.lt.s32.totalorder %s8993_s29, %s8993_s29 }
  0x10   :  { %8016 = vmatprep.subr.mxu1 %v126_v15  ;;  %8051 = vmatprep.mubr.msk.f32.mxu0 %vm44_vm0, %v9108_v13  ;;  %v9228_v53 = vld [vmem:[%s10679_s2] sm:$0xff] }
  0x11   :  { %8017 = vmatpush3.msra.mxu1 %v126_v15  ;;  %8043 = vmatprep.subr.mxu0 %v389_v36  ;;  %p9000_p3 = por %p8999_p2, %p8998_p1 }
  0x12   :  { %8019 = vmatmul.mubr.msk.f32.vlgmr.msra.gmra.mxu1 %vm44_vm0, %v30_v8  ;;  %8032 = vmatprep.subr.mxu1 %v305_v16 }
  0x13   :  { %8033 = vmatpush3.msra.mxu1 %v305_v16  ;;  %8040 = vmatprep.mubr.msk.f32.mxu1 %vm44_vm0, %v9108_v13  ;;  %p9001_p4 = pnand %p9000_p3, %p8994_p0 }
  0x14   :  { %8034 = vmatprep.subr.mxu1 %v304_v17  ;;  %8044 = vmatpush3.msra.mxu0 %v389_v36 }
  0x15   :  { %8035 = vmatpush3.msra.mxu1 %v304_v17  ;;  %8045 = vmatprep.subr.mxu0 %v388_v37 }
  0x16   :  { %8036 = vmatprep.subr.mxu1 %v303_v18  ;;  %8046 = vmatpush3.msra.mxu0 %v388_v37 }
  0x17   :  { %8037 = vmatpush3.msra.mxu1 %v303_v18  ;;  %8047 = vmatprep.subr.mxu0 %v387_v40 }
  0x18   :  { %8038 = vmatprep.subr.mxu1 %v302_v19  ;;  %8048 = vmatpush3.msra.mxu0 %v387_v40 }
  0x19   :  { %8039 = vmatpush3.msra.mxu1 %v302_v19  ;;  %8049 = vmatprep.subr.mxu0 %v386_v43 }
  0x1a   :  { %8041 = vmatmul.mubr.msk.f32.vlgmr.msra.gmra.mxu1 %vm44_vm0, %v9113_v14  ;;  %8050 = vmatpush3.msra.mxu0 %v386_v43 }
  0x1b   :  { %8052 = vmatmul.mubr.msk.f32.vlgmr.msra.gmra.mxu0 %vm44_vm0, %v9113_v14 }
  0xca   :  { %v9141_v20 = vpop.f32.mrf.mxu1 }
  0xcc   :  { %v117_v22 = vpop.f32.mrf.mxu1 }
  0xcd   :  { %v9149_v23 = vadd.f32 %v9146_v21, %v117_v22 }
  0xcf   :  { %v8031_v24 = vpop.f32.mrf.mxu0 }
  0xd0   :  { %v297_v29 = vadd.f32 %v8031_v24, %v7431_v25 }
  0xd1   :  { %v291_v26 = vpop.f32.mrf.mxu0 }
  0xd2   :  { %v9154_v27 = vpop.f32.mrf.mxu1  ;;  %v292_v30 = vadd.f32 %v7431_v25, %v291_v26  ;;  %v9166_v34 = vmul.f32 0.35355338, %v297_v29 }
  0xd4   :  { %v201_v31 = vpop.f32.mrf.mxu1  ;;  %v9161_v32 = vmul.f32 0.35355338, %v292_v30 }
  0xd5   :  { %v9164_v33 = vadd.f32 %v9159_v28, %v201_v31 }
  0xd6   :  { %666 = vrot.lane.b32.xlu1 %v9161_v32, %s9015_s22  ;;  %8058 = vmatprep.mubr.msk.f32.mxu1 %vm474_vm1, %v9161_v32 }
  0xda   :  { %v8042_v38 = vpop.f32.mrf.mxu1  ;;  %668 = vrot.lane.b32.xlu1 %v9166_v34, %s9015_s22 }
  0xdb   :  { %v9183_v39 = vadd.f32 %v8042_v38, %v7434_v35  ;;  %v8053_v49 = vpop.f32.mrf.mxu0 }
  0xdc   :  { %v377_v41 = vpop.f32.mrf.mxu1  ;;  %v9223_v51 = vadd.f32 %v8053_v49, %v7437_v48 }
  0xdd   :  { %v9188_v42 = vadd.f32 %v7434_v35, %v377_v41  ;;  %672 = vrot.lane.b32.xlu0 %v9183_v39, %s9015_s22  ;;  %8054 = vmatprep.subr.msk.mxu1 %vm474_vm1, %v9183_v39  ;;  %v461_v59 = vpop.f32.mrf.mxu0 }
  0xde   :  { %8055 = vmatpush3.xpose.msk.msra.mxu1 %vm474_vm1, %v9183_v39  ;;  %8061 = vmatprep.subr.mxu0 %v9223_v51  ;;  %v9238_v60 = vadd.f32 %v7437_v48, %v461_v59 }
  0xdf   :  { %8056 = vmatprep.subr.msk.mxu1 %vm474_vm1, %v9188_v42  ;;  %8062 = vmatpush3.msra.mxu0 %v9223_v51 }
  0xe0   :  { %8063 = vmatprep.subr.mxu0 %v9238_v60 }
  0xe1   :  { %670 = vrot.lane.b32.xlu0 %v9188_v42, %s9015_s22  ;;  %8064 = vmatpush3.msra.mxu0 %v9238_v60 }
  0xe2   :  { %8057 = vmatpush3.xpose.msk.msra.mxu1 %vm474_vm1, %v9188_v42 }
  0xe5   :  { %8059 = vmatmul.mubr.msk.f32.vlgmr.msra.gmra.mxu1 %vm474_vm1, %v9166_v34 }
 0x148   :  { %v667_v44 = vpop.permute.xlu1 %666 }
 0x149   :  { %8072 = vmatprep.mubr.msk.f32.mxu1 %vm474_vm1, %v667_v44 }
 0x14c   :  { %v669_v47 = vpop.permute.xlu1 %668 }
 0x14f   :  { %v673_v45 = vpop.permute.xlu0 %672 }
 0x150   :  { %8068 = vmatprep.subr.msk.mxu1 %vm474_vm1, %v673_v45 }
 0x151   :  { %8069 = vmatpush3.xpose.msk.msra.mxu1 %vm474_vm1, %v673_v45 }
 0x153   :  { %v671_v46 = vpop.permute.xlu0 %670 }
 0x154   :  { %8070 = vmatprep.subr.msk.mxu1 %vm474_vm1, %v671_v46 }
 0x155   :  { %8071 = vmatpush3.xpose.msk.msra.mxu1 %vm474_vm1, %v671_v46 }
 0x158   :  { %8073 = vmatmul.mubr.msk.f32.vlgmr.msra.gmra.mxu1 %vm474_vm1, %v669_v47 }
 0x1a5   :  { %v8060_v52 = vpop.f32.mrf.mxu1 }
 0x1a6   :  { %v559_v54 = vadd.f32 %v8060_v52, %v9221_v50 }
 0x1a7   :  { %v553_v55 = vpop.f32.mrf.mxu1 }
 0x1a8   :  { %v554_v56 = vadd.f32 %v553_v55, %v9228_v53  ;;  %v566_v57 = vsel %vm562_vm2, %v559_v54, -inf }
 0x1a9   :  { %567 = vmax.xlane.f32.xlu1 %v566_v57 }
 0x1aa   :  { %v563_v58 = vsel %vm562_vm2, %v554_v56, -inf }
 0x1ab   :  { %564 = vmax.xlane.f32.xlu0 %v563_v58 }
 0x1ba   :  { %783 = vrot.lane.b32.xlu1 %v9223_v51, %s9015_s22 }
 0x218   :  { %v8074_v61 = vpop.f32.mrf.mxu1 }
 0x219   :  { %v754_v0 = vadd.f32 %v8074_v61, %v9221_v50 }
 0x21a   :  { %v748_v62 = vpop.f32.mrf.mxu1 }
 0x21b   :  { %v749_v63 = vadd.f32 %v748_v62, %v9228_v53  ;;  %v760_v2 = vsel %vm562_vm2, %v754_v0, -inf }
 0x21d   :  { %v757_v1 = vsel %vm562_vm2, %v749_v63, -inf }
 0x21e   :  { %758 = vmax.xlane.f32.xlu0 %v757_v1 }
 0x222   :  { %761 = vmax.xlane.f32.xlu0 %v760_v2 }
 0x232   :  { %v568_v3 = vpop.xlane.xlu1 %567 }
 0x233   :  { %v570_v4 = vsub.f32 %v559_v54, %v568_v3 }
 0x234   :  { %v565_v5 = vpop.xlane.xlu0 %564 }
 0x235   :  { %v573_v6 = vmul.f32 1.442695, %v570_v4  ;;  %v569_v7 = vsub.f32 %v554_v56, %v565_v5 }
 0x236   :  { %v784_v15 = vpop.permute.xlu1 %783 }
 0x237   :  { %8653 = vpow2.f32 %v573_v6  ;;  %v571_v8 = vmul.f32 1.442695, %v569_v7  ;;  %8075 = vmatprep.subr.mxu0 %v784_v15 }
 0x239   :  { %8655 = vpow2.f32 %v571_v8 }
 0x244   :  { %v8654_v9 = vpop.eup %8653 }
 0x245   :  { %v578_v10 = vsel %vm562_vm2, %v8654_v9, 0.0 }
 0x246   :  { %v8656_v11 = vpop.eup %8655  ;;  %579 = vadd.xlane.f32.xlu0 %v578_v10 }
 0x247   :  { %v575_v12 = vsel %vm562_vm2, %v8656_v11, 0.0 }
 0x248   :  { %576 = vadd.xlane.f32.xlu1 %v575_v12 }
 0x259   :  { %874 = vrot.lane.b32.xlu1 %v9183_v39, %s9016_s14 }
 0x25d   :  { %872 = vrot.lane.b32.xlu1 %v9188_v42, %s9016_s14 }
 0x2a7   :  { %v759_v16 = vpop.xlane.xlu0 %758 }
 0x2a8   :  { %v763_v17 = vsub.f32 %v749_v63, %v759_v16 }
 0x2aa   :  { %v765_v18 = vmul.f32 1.442695, %v763_v17 }
 0x2ab   :  { %v762_v19 = vpop.xlane.xlu0 %761 }
 0x2ac   :  { %8657 = vpow2.f32 %v765_v18  ;;  %v764_v22 = vsub.f32 %v754_v0, %v762_v19 }
 0x2ae   :  { %v767_v24 = vmul.f32 1.442695, %v764_v22 }
 0x2b0   :  { %8659 = vpow2.f32 %v767_v24 }
 0x2b9   :  { %v8658_v25 = vpop.eup %8657 }
 0x2ba   :  { %v769_v26 = vsel %vm562_vm2, %v8658_v25, 0.0 }
 0x2bb   :  { %770 = vadd.xlane.f32.xlu1 %v769_v26 }
 0x2bd   :  { %v8660_v29 = vpop.eup %8659 }
 0x2be   :  { %v772_v30 = vsel %vm562_vm2, %v8660_v29, 0.0 }
 0x2bf   :  { %773 = vadd.xlane.f32.xlu0 %v772_v30  ;;  %v1429_v30 = vld [vmem:[%s10681_s4 + $0x88] sm:$0xff] }
 0x2cc   :  { %870 = vrot.lane.b32.xlu1 %v9166_v34, %s9016_s14 }
 0x2cf   :  { %v580_v31 = vpop.xlane.xlu0 %579 }
 0x2d0   :  { %8661 = vrcp.f32 %v580_v31  ;;  %v1428_v31 = vld [vmem:[%s10681_s4 + $0x80] sm:$0xff] }
 0x2d1   :  { %v577_v35 = vpop.xlane.xlu1 %576 }
 0x2d2   :  { %8663 = vrcp.f32 %v577_v35  ;;  %v9318_v35 = vadd.f32 %v9154_v27, %v9159_v28 }
 0x2d5   :  { %781 = vrot.lane.b32.xlu0 %v9238_v60, %s9015_s22  ;;  %v875_v41 = vpop.permute.xlu1 %874 }
 0x2d9   :  { %868 = vrot.lane.b32.xlu0 %v9161_v32, %s9016_s14  ;;  %v873_v43 = vpop.permute.xlu1 %872 }
 0x2dd   :  { %v8662_v36 = vpop.eup %8661 }
 0x2de   :  { %v584_v40 = vmul.f32 %v8662_v36, %v8654_v9 }
 0x2df   :  { %v8664_v37 = vpop.eup %8663 }
 0x2e0   :  { %v583_v38 = vmul.f32 %v8664_v37, %v8656_v11 }
 0x2e2   :  { %8065 = vmatprep.mubr.msk.f32.mxu0 %vm562_vm2, %v583_v38 }
 0x2e3   :  { %8066 = vmatmul.mubr.msk.f32.vlgmr.msra.gmra.mxu0 %vm562_vm2, %v584_v40 }
 0x2e4   :  { %8076 = vmatpush3.msra.mxu0 %v784_v15 }
 0x344   :  { %v771_v44 = vpop.xlane.xlu1 %770 }
 0x345   :  { %8665 = vrcp.f32 %v771_v44 }
 0x348   :  { %v774_v45 = vpop.xlane.xlu0 %773  ;;  %v871_v55 = vpop.permute.xlu1 %870 }
 0x349   :  { %8667 = vrcp.f32 %v774_v45 }
 0x34c   :  { %v782_v46 = vpop.permute.xlu0 %781 }
 0x34d   :  { %8077 = vmatprep.subr.mxu0 %v782_v46 }
 0x34e   :  { %8078 = vmatpush3.msra.mxu0 %v782_v46 }
 0x34f   :  { %8082 = vmatprep.subr.msk.mxu0 %vm474_vm1, %v875_v41 }
 0x350   :  { %v869_v54 = vpop.permute.xlu0 %868 }
 0x352   :  { %v8666_v47 = vpop.eup %8665 }
 0x353   :  { %v777_v48 = vmul.f32 %v8666_v47, %v8658_v25  ;;  %v1431_v25 = vld [vmem:[%s10681_s4 + $0x98] sm:$0xff] }
 0x355   :  { %8079 = vmatprep.mubr.msk.f32.mxu0 %vm562_vm2, %v777_v48 }
 0x356   :  { %v8668_v49 = vpop.eup %8667 }
 0x357   :  { %v778_v52 = vmul.f32 %v8668_v49, %v8660_v29  ;;  %v1430_v29 = vld [vmem:[%s10681_s4 + $0x90] sm:$0xff] }
 0x359   :  { %8080 = vmatmul.mubr.msk.f32.vlgmr.msra.gmra.mxu0 %vm562_vm2, %v778_v52 }
 0x35a   :  { %8083 = vmatpush3.xpose.msk.msra.mxu0 %vm474_vm1, %v875_v41  ;;  %8086 = vmatprep.mubr.msk.f32.mxu0 %vm474_vm1, %v869_v54 }
 0x35b   :  { %8084 = vmatprep.subr.msk.mxu0 %vm474_vm1, %v873_v43 }
 0x35e   :  { %8085 = vmatpush3.xpose.msk.msra.mxu0 %vm474_vm1, %v873_v43 }
 0x361   :  { %8087 = vmatmul.mubr.msk.f32.vlgmr.msra.gmra.mxu0 %vm474_vm1, %v871_v55 }
 0x3a3   :  { %v9270_v56 = vpop.f32.mrf.mxu0 }
 0x3a5   :  { %v9272_v57 = vpop.f32.mrf.mxu0 }
 0x419   :  { %v9274_v58 = vpop.f32.mrf.mxu0 }
 0x41b   :  { %v9276_v59 = vpop.f32.mrf.mxu0 }
 0x421   :  { %v8088_v61 = vpop.f32.mrf.mxu0 }
 0x422   :  { %v956_v62 = vadd.f32 %v8088_v61, %v9221_v50  ;;  %v473_v61 = vld [vmem:[%s10681_s4 + $0x78] sm:$0xff] }
 0x423   :  { %v950_v63 = vpop.f32.mrf.mxu0 }
 0x424   :  { %v951_v0 = vadd.f32 %v950_v63, %v9228_v53  ;;  %v962_v1 = vsel %vm562_vm2, %v956_v62, -inf }
 0x425   :  { %963 = vmax.xlane.f32.xlu1 %v962_v1 }
 0x426   :  { %v959_v2 = vsel %vm562_vm2, %v951_v0, -inf }
 0x427   :  { %960 = vmax.xlane.f32.xlu0 %v959_v2  ;;  %v471_v2 = vld [vmem:[%s10681_s4 + $0x68] sm:$0xff] }
 0x436   :  { %983 = vrot.lane.b32.xlu1 %v9223_v51, %s9016_s14 }
 0x43a   :  { %1074 = vrot.lane.b32.xlu1 %v9183_v39, %s9017_s15 }
 0x43e   :  { %1072 = vrot.lane.b32.xlu1 %v9188_v42, %s9017_s15 }
 0x442   :  { %1070 = vrot.lane.b32.xlu1 %v9166_v34, %s9017_s15 }
 0x4ae   :  { %v964_v3 = vpop.xlane.xlu1 %963 }
 0x4af   :  { %v966_v4 = vsub.f32 %v956_v62, %v964_v3  ;;  %v470_v3 = vld [vmem:[%s10681_s4 + $0x60] sm:$0xff] }
 0x4b0   :  { %v961_v5 = vpop.xlane.xlu0 %960 }
 0x4b1   :  { %v969_v6 = vmul.f32 1.442695, %v966_v4  ;;  %v965_v7 = vsub.f32 %v951_v0, %v961_v5  ;;  %v9353_v4 = vadd.f32 %v9141_v20, %v9146_v21 }
 0x4b2   :  { %v984_v8 = vpop.permute.xlu1 %983 }
 0x4b3   :  { %8669 = vpow2.f32 %v969_v6  ;;  %v967_v9 = vmul.f32 1.442695, %v965_v7  ;;  %8089 = vmatprep.subr.mxu1 %v984_v8 }
 0x4b4   :  { %8090 = vmatpush3.msra.mxu1 %v984_v8 }
 0x4b5   :  { %8671 = vpow2.f32 %v967_v9 }
 0x4b6   :  { %v1075_v16 = vpop.permute.xlu1 %1074 }
 0x4c0   :  { %v8670_v10 = vpop.eup %8669 }
 0x4c1   :  { %v974_v39 = vsel %vm562_vm2, %v8670_v10, 0.0 }
 0x4c2   :  { %v8672_v11 = vpop.eup %8671  ;;  %975 = vadd.xlane.f32.xlu0 %v974_v39 }
 0x4c3   :  { %v971_v42 = vsel %vm562_vm2, %v8672_v11, 0.0 }
 0x4c6   :  { %972 = vadd.xlane.f32.xlu0 %v971_v42 }
 0x4dc   :  { %981 = vrot.lane.b32.xlu0 %v9238_v60, %s9016_s14 }
 0x4e0   :  { %1068 = vrot.lane.b32.xlu0 %v9161_v32, %s9017_s15  ;;  %v1073_v32 = vpop.permute.xlu1 %1072 }
 0x4e4   :  { %v1071_v26 = vpop.permute.xlu1 %1070 }
 0x54b   :  { %v976_v34 = vpop.xlane.xlu0 %975 }
 0x54c   :  { %8673 = vrcp.f32 %v976_v34 }
 0x54f   :  { %v973_v12 = vpop.xlane.xlu0 %972 }
 0x550   :  { %8675 = vrcp.f32 %v973_v12 }
 0x553   :  { %v982_v15 = vpop.permute.xlu0 %981 }
 0x554   :  { %8091 = vmatprep.subr.mxu1 %v982_v15 }
 0x555   :  { %8092 = vmatpush3.msra.mxu1 %v982_v15 }
 0x556   :  { %8096 = vmatprep.subr.msk.mxu1 %vm474_vm1, %v1075_v16 }
 0x557   :  { %v1069_v24 = vpop.permute.xlu0 %1068 }
 0x559   :  { %v8674_v17 = vpop.eup %8673 }
 0x55a   :  { %v980_v22 = vmul.f32 %v8674_v17, %v8670_v10 }
 0x55d   :  { %v8676_v18 = vpop.eup %8675 }
 0x55e   :  { %v979_v19 = vmul.f32 %v8676_v18, %v8672_v11 }
 0x560   :  { %8093 = vmatprep.mubr.msk.f32.mxu1 %vm562_vm2, %v979_v19 }
 0x561   :  { %8094 = vmatmul.mubr.msk.f32.vlgmr.msra.gmra.mxu1 %vm562_vm2, %v980_v22 }
 0x562   :  { %8097 = vmatpush3.xpose.msk.msra.mxu1 %vm474_vm1, %v1075_v16  ;;  %8100 = vmatprep.mubr.msk.f32.mxu1 %vm474_vm1, %v1069_v24 }
 0x563   :  { %8098 = vmatprep.subr.msk.mxu1 %vm474_vm1, %v1073_v32 }
 0x566   :  { %8099 = vmatpush3.xpose.msk.msra.mxu1 %vm474_vm1, %v1073_v32 }
 0x567   :  { %8121 = vmatprep.subr.mxu1 %v1431_v25 }
 0x569   :  { %8101 = vmatmul.mubr.msk.f32.vlgmr.msra.gmra.mxu1 %vm474_vm1, %v1071_v26 }
 0x56a   :  { %8122 = vmatpush3.msra.mxu1 %v1431_v25 }
 0x56b   :  { %8123 = vmatprep.subr.mxu1 %v1430_v29 }
 0x56c   :  { %8124 = vmatpush3.msra.mxu1 %v1430_v29 }
 0x56d   :  { %8125 = vmatprep.subr.mxu1 %v1429_v30 }
 0x56e   :  { %8126 = vmatpush3.msra.mxu1 %v1429_v30 }
 0x56f   :  { %8127 = vmatprep.subr.mxu1 %v1428_v31 }
 0x570   :  { %8128 = vmatpush3.msra.mxu1 %v1428_v31 }
 0x571   :  { %8139 = vmatprep.subr.mxu1 %v9318_v35 }
 0x621   :  { %v8095_v36 = vpop.f32.mrf.mxu1 }
 0x623   :  { %v1059_v37 = vpop.f32.mrf.mxu1 }
 0x629   :  { %v8102_v38 = vpop.f32.mrf.mxu1 }
 0x62a   :  { %v1156_v40 = vadd.f32 %v8102_v38, %v9221_v50 }
 0x62b   :  { %v1150_v41 = vpop.f32.mrf.mxu1 }
 0x62c   :  { %v1151_v43 = vadd.f32 %v1150_v41, %v9228_v53  ;;  %v1162_v44 = vsel %vm562_vm2, %v1156_v40, -inf }
 0x62d   :  { %1163 = vmax.xlane.f32.xlu1 %v1162_v44 }
 0x62e   :  { %v1159_v45 = vsel %vm562_vm2, %v1151_v43, -inf }
 0x62f   :  { %1160 = vmax.xlane.f32.xlu0 %v1159_v45 }
 0x63e   :  { %1183 = vrot.lane.b32.xlu1 %v9223_v51, %s9017_s15 }
 0x642   :  { %1270 = vrot.lane.b32.xlu1 %v9276_v59, %s9018_s1 }
 0x646   :  { %1272 = vrot.lane.b32.xlu1 %v9274_v58, %s9018_s1 }
 0x64a   :  { %1280 = vrot.lane.b32.xlu1 %v8095_v36, %s9019_s25 }
 0x6b6   :  { %v1164_v27 = vpop.xlane.xlu1 %1163 }
 0x6b7   :  { %v1166_v28 = vsub.f32 %v1156_v40, %v1164_v27 }
 0x6b8   :  { %v1161_v50 = vpop.xlane.xlu0 %1160 }
 0x6b9   :  { %v1169_v53 = vmul.f32 1.442695, %v1166_v28  ;;  %v1165_v46 = vsub.f32 %v1151_v43, %v1161_v50  ;;  %v7467_v50 = vld [vmem:[%s10683_s6 + $0x9] ss:$0 sm:$0xff] }
 0x6ba   :  { %v1184_v47 = vpop.permute.xlu1 %1183 }
 0x6bb   :  { %8677 = vpow2.f32 %v1169_v53  ;;  %v1167_v48 = vmul.f32 1.442695, %v1165_v46  ;;  %8103 = vmatprep.subr.mxu0 %v1184_v47  ;;  %v7468_v46 = vld [vmem:[%s10683_s6 + $0xa] ss:$0 sm:$0xff] }
 0x6bc   :  { %8104 = vmatpush3.msra.mxu0 %v1184_v47 }
 0x6bd   :  { %8679 = vpow2.f32 %v1167_v48 }
 0x6be   :  { %v1271_v7 = vpop.permute.xlu1 %1270 }
 0x6bf   :  { %v1292_v20 = vsel %vm474_vm1, %v9272_v57, %v1271_v7 }
 0x6c2   :  { %v1273_v8 = vpop.permute.xlu1 %1272 }
 0x6c3   :  { %v1293_v39 = vsel %vm474_vm1, %v9270_v56, %v1273_v8  ;;  %v7464_v56 = vld [vmem:[%s10683_s6 + $0x3] ss:$0 sm:$0xff] }
 0x6c6   :  { %v1281_v9 = vpop.permute.xlu1 %1280 }
 0x6c7   :  { %v1295_v34 = vsel %vm562_vm2, %v1293_v39, %v1281_v9 }
 0x6c8   :  { %v8678_v51 = vpop.eup %8677 }
 0x6c9   :  { %v1174_v49 = vsel %vm562_vm2, %v8678_v51, 0.0 }
 0x6ca   :  { %v8680_v52 = vpop.eup %8679  ;;  %1175 = vadd.xlane.f32.xlu0 %v1174_v49 }
 0x6cb   :  { %v1171_v54 = vsel %vm562_vm2, %v8680_v52, 0.0 }
 0x6ce   :  { %1172 = vadd.xlane.f32.xlu0 %v1171_v54 }
 0x6e4   :  { %1181 = vrot.lane.b32.xlu0 %v9238_v60, %s9017_s15  ;;  %v472_v60 = vld [vmem:[%s10681_s4 + $0x70] sm:$0xff] }
 0x6e8   :  { %1278 = vrot.lane.b32.xlu0 %v1059_v37, %s9019_s25 }
 0x753   :  { %v1176_v55 = vpop.xlane.xlu0 %1175 }
 0x754   :  { %8681 = vrcp.f32 %v1176_v55  ;;  %v7469_v55 = vld [vmem:[%s10683_s6 + $0x4] ss:$0 sm:$0xff] }
 0x757   :  { %v1173_v58 = vpop.xlane.xlu0 %1172 }
 0x758   :  { %8683 = vrcp.f32 %v1173_v58 }
 0x75b   :  { %v1182_v59 = vpop.permute.xlu0 %1181 }
 0x75c   :  { %8105 = vmatprep.subr.mxu0 %v1182_v59 }
 0x75d   :  { %8106 = vmatpush3.msra.mxu0 %v1182_v59 }
 0x75e   :  { %8110 = vmatprep.subr.mxu0 %v473_v61 }
 0x75f   :  { %v1279_v10 = vpop.permute.xlu0 %1278 }
 0x760   :  { %v1294_v11 = vsel %vm562_vm2, %v1292_v20, %v1279_v10 }
 0x761   :  { %v8682_v62 = vpop.eup %8681 }
 0x762   :  { %v1180_v1 = vmul.f32 %v8682_v62, %v8678_v51 }
 0x765   :  { %v8684_v63 = vpop.eup %8683 }
 0x766   :  { %v1179_v0 = vmul.f32 %v8684_v63, %v8680_v52 }
 0x768   :  { %8107 = vmatprep.mubr.msk.f32.mxu0 %vm562_vm2, %v1179_v0 }
 0x769   :  { %8108 = vmatmul.mubr.msk.f32.vlgmr.msra.gmra.mxu0 %vm562_vm2, %v1180_v1  ;;  %v9415_v1 = vld [vmem:[%s10680_s3 + $0x8] sm:$0xff] }
 0x76a   :  { %8111 = vmatpush3.msra.mxu0 %v473_v61 }
 0x76b   :  { %8112 = vmatprep.subr.mxu0 %v472_v60 }
 0x76c   :  { %8113 = vmatpush3.msra.mxu0 %v472_v60 }
 0x76d   :  { %8114 = vmatprep.subr.mxu0 %v471_v2 }
 0x76e   :  { %8115 = vmatpush3.msra.mxu0 %v471_v2  ;;  %v9420_v2 = vld [vmem:[%s10680_s3] sm:$0xff] }
 0x76f   :  { %8116 = vmatprep.subr.mxu0 %v470_v3 }
 0x770   :  { %8117 = vmatpush3.msra.mxu0 %v470_v3 }
 0x771   :  { %8132 = vmatprep.subr.msk.mxu0 %vm474_vm1, %v9353_v4 }
 0x829   :  { %v8109_v5 = vpop.f32.mrf.mxu0 }
 0x82a   :  { %1288 = vrot.lane.b32.xlu1 %v8109_v5, %s9020_s0 }
 0x82b   :  { %v1259_v6 = vpop.f32.mrf.mxu0 }
 0x82c   :  { %1286 = vrot.lane.b32.xlu0 %v1259_v6, %s9020_s0 }
 0x89c   :  { %v1289_v21 = vpop.permute.xlu1 %1288 }
 0x89d   :  { %v1298_v15 = vsel %vm1296_vm3, %v1295_v34, %v1289_v21 }
 0x89e   :  { %v1287_v42 = vpop.permute.xlu0 %1286 }
 0x89f   :  { %v1297_v12 = vsel %vm1296_vm3, %v1294_v11, %v1287_v42 }
 0x8a0   :  { %8118 = vmatprep.mubr.msk.f32.mxu0 %vm44_vm0, %v1297_v12 }
 0x8a1   :  { %8119 = vmatmul.mubr.msk.f32.vlgmr.msra.gmra.mxu0 %vm44_vm0, %v1298_v15 }
 0x8a2   :  { %8133 = vmatpush3.xpose.msk.msra.mxu0 %vm474_vm1, %v9353_v4 }
 0x8a3   :  { %8134 = vmatprep.subr.msk.mxu0 %vm474_vm1, %v9149_v23 }
 0x8a6   :  { %8135 = vmatpush3.xpose.msk.msra.mxu0 %vm474_vm1, %v9149_v23 }
 0x961   :  { %v8120_v57 = vpop.f32.mrf.mxu0 }
 0x962   :  { %v1382_v16 = vadd.f32 %v8120_v57, %v7464_v56 }
 0x963   :  { %v1376_v17 = vpop.f32.mrf.mxu0 }
 0x964   :  { %v1377_v18 = vadd.f32 %v7464_v56, %v1376_v17  ;;  %v1386_v19 = vadd.f32 %v1382_v16, %v9113_v14 }
 0x966   :  { %v1390_v22 = vsel %vm44_vm0, %v1386_v19, 0.0  ;;  %v1385_v24 = vadd.f32 %v1377_v18, %v9108_v13 }
 0x967   :  { %1391 = vadd.xlane.f32.xlu1 %v1390_v22 }
 0x968   :  { %v1387_v32 = vsel %vm44_vm0, %v1385_v24, 0.0 }
 0x969   :  { %1388 = vadd.xlane.f32.xlu0 %v1387_v32 }
 0x9f0   :  { %v1392_v25 = vpop.xlane.xlu1 %1391 }
 0x9f1   :  { %v1395_v26 = vmul.f32 0.03125, %v1392_v25 }
 0x9f2   :  { %v1389_v29 = vpop.xlane.xlu0 %1388 }
 0x9f3   :  { %v1394_v30 = vmul.f32 0.03125, %v1389_v29  ;;  %v1397_v31 = vsub.f32 %v1386_v19, %v1395_v26 }
 0x9f5   :  { %v1396_v36 = vsub.f32 %v1385_v24, %v1394_v30  ;;  %v1399_v40 = vmul.f32 %v1397_v31, %v1397_v31 }
 0x9f7   :  { %v1398_v37 = vmul.f32 %v1396_v36, %v1396_v36  ;;  %v1403_v14 = vsel %vm44_vm0, %v1399_v40, 0.0 }
 0x9f9   :  { %v1400_v38 = vsel %vm44_vm0, %v1398_v37, 0.0 }
 0x9fa   :  { %1401 = vadd.xlane.f32.xlu0 %v1400_v38 }
 0x9fe   :  { %1404 = vadd.xlane.f32.xlu0 %v1403_v14 }
 0xa83   :  { %v1402_v41 = vpop.xlane.xlu0 %1401 }
 0xa84   :  { %v1406_v13 = vmul.f32 0.03125, %v1402_v41 }
 0xa86   :  { %v1408_v43 = vadd.f32 1e-05, %v1406_v13 }
 0xa87   :  { %v1405_v44 = vpop.xlane.xlu0 %1404 }
 0xa88   :  { %8685 = vrsqrt.f32 %v1408_v43  ;;  %v1407_v45 = vmul.f32 0.03125, %v1405_v44 }
 0xa8a   :  { %v1409_v27 = vadd.f32 1e-05, %v1407_v45 }
 0xa8c   :  { %8687 = vrsqrt.f32 %v1409_v27 }
 0xa95   :  { %v8686_v28 = vpop.eup %8685 }
 0xa96   :  { %v1412_v53 = vmul.f32 %v8686_v28, %v1396_v36 }
 0xa98   :  { %v1419_v47 = vmul.f32 %v7467_v50, %v1412_v53 }
 0xa99   :  { %v8688_v48 = vpop.eup %8687 }
 0xa9a   :  { %v9390_v51 = vadd.f32 %v7468_v46, %v1419_v47  ;;  %v1413_v49 = vmul.f32 %v8688_v48, %v1397_v31 }
 0xa9c   :  { %8129 = vmatprep.mubr.msk.f32.mxu1 %vm44_vm0, %v9390_v51  ;;  %v1420_v52 = vmul.f32 %v7467_v50, %v1413_v49 }
 0xa9e   :  { %v9394_v54 = vadd.f32 %v7468_v46, %v1420_v52 }
 0xaa0   :  { %8130 = vmatmul.mubr.msk.f32.vlgmr.msra.gmra.mxu1 %vm44_vm0, %v9394_v54 }
 0xaa1   :  { %8140 = vmatpush3.msra.mxu1 %v9318_v35 }
 0xaa2   :  { %8141 = vmatprep.subr.mxu1 %v9164_v33 }
 0xaa3   :  { %8142 = vmatpush3.msra.mxu1 %v9164_v33 }
 0xb60   :  { %v8131_v58 = vpop.f32.mrf.mxu1 }
 0xb61   :  { %v1515_v59 = vadd.f32 %v8131_v58, %v7469_v55 }
 0xb62   :  { %v1509_v61 = vpop.f32.mrf.mxu1 }
 0xb63   :  { %v1510_v62 = vadd.f32 %v7469_v55, %v1509_v61  ;;  %v9406_v0 = vmul.f32 0.35355338, %v1515_v59 }
 0xb65   :  { %v9404_v63 = vmul.f32 0.35355338, %v1510_v62 }
 0xb67   :  { %8136 = vmatprep.mubr.msk.f32.mxu0 %vm474_vm1, %v9404_v63 }
 0xb68   :  { %8137 = vmatmul.mubr.msk.f32.vlgmr.msra.gmra.mxu0 %vm474_vm1, %v9406_v0 }
 0xc28   :  { %v8138_v60 = vpop.f32.mrf.mxu0 }
 0xc29   :  { %v1608_v3 = vadd.f32 %v8138_v60, %v9415_v1 }
 0xc2a   :  { %v1602_v5 = vpop.f32.mrf.mxu0 }
 0xc2b   :  { %v1603_v6 = vadd.f32 %v1602_v5, %v9420_v2  ;;  %v1614_v7 = vsel %vm562_vm2, %v1608_v3, -inf }
 0xc2c   :  { %1615 = vmax.xlane.f32.xlu0 %v1614_v7 }
 0xc2d   :  { %v1611_v8 = vsel %vm562_vm2, %v1603_v6, -inf }
 0xc2e   :  { %1612 = vmax.xlane.f32.xlu1 %v1611_v8 }
 0xc3f   :  { %1720 = vrot.lane.b32.xlu1 %v9353_v4, %s9015_s22 }
 0xc43   :  { %1714 = vrot.lane.b32.xlu1 %v9404_v63, %s9015_s22 }
 0xcb5   :  { %v1616_v9 = vpop.xlane.xlu0 %1615 }
 0xcb6   :  { %v1618_v10 = vsub.f32 %v1608_v3, %v1616_v9 }
 0xcb7   :  { %v1613_v20 = vpop.xlane.xlu1 %1612 }
 0xcb8   :  { %v1621_v21 = vmul.f32 1.442695, %v1618_v10  ;;  %v1617_v39 = vsub.f32 %v1603_v6, %v1613_v20 }
 0xcba   :  { %8689 = vpow2.f32 %v1621_v21  ;;  %v1619_v11 = vmul.f32 1.442695, %v1617_v39 }
 0xcbb   :  { %v9430_v42 = vpop.permute.xlu1 %1720 }
 0xcbc   :  { %8691 = vpow2.f32 %v1619_v11  ;;  %8146 = vmatprep.subr.msk.mxu1 %vm474_vm1, %v9430_v42 }
 0xcbf   :  { %v1715_v57 = vpop.permute.xlu1 %1714 }
 0xcc7   :  { %v8690_v34 = vpop.eup %8689 }
 0xcc8   :  { %v1626_v12 = vsel %vm562_vm2, %v8690_v34, 0.0 }
 0xcc9   :  { %v8692_v15 = vpop.eup %8691  ;;  %1627 = vadd.xlane.f32.xlu0 %v1626_v12 }
 0xcca   :  { %v1623_v56 = vsel %vm562_vm2, %v8692_v15, 0.0 }
 0xccb   :  { %1624 = vadd.xlane.f32.xlu1 %v1623_v56 }
 0xcdc   :  { %1716 = vrot.lane.b32.xlu1 %v9406_v0, %s9015_s22 }
 0xcdf   :  { %1718 = vrot.lane.b32.xlu0 %v9149_v23, %s9015_s22 }
 0xd52   :  { %v1628_v16 = vpop.xlane.xlu0 %1627 }
 0xd53   :  { %8693 = vrcp.f32 %v1628_v16 }
 0xd54   :  { %v1625_v17 = vpop.xlane.xlu1 %1624 }
 0xd55   :  { %8695 = vrcp.f32 %v1625_v17 }
 0xd56   :  { %v9442_v32 = vpop.permute.xlu0 %1718 }
 0xd58   :  { %v1717_v25 = vpop.permute.xlu1 %1716 }
 0xd60   :  { %v8694_v18 = vpop.eup %8693 }
 0xd61   :  { %v1632_v24 = vmul.f32 %v8694_v18, %v8690_v34 }
 0xd62   :  { %v8696_v19 = vpop.eup %8695 }
 0xd63   :  { %v1631_v22 = vmul.f32 %v8696_v19, %v8692_v15 }
 0xd65   :  { %8143 = vmatprep.mubr.msk.f32.mxu1 %vm562_vm2, %v1631_v22 }
 0xd66   :  { %8144 = vmatmul.mubr.msk.f32.vlgmr.msra.gmra.mxu1 %vm562_vm2, %v1632_v24 }
 0xd67   :  { %8147 = vmatpush3.xpose.msk.msra.mxu1 %vm474_vm1, %v9430_v42  ;;  %8150 = vmatprep.mubr.msk.f32.mxu1 %vm474_vm1, %v1715_v57 }
 0xd68   :  { %8148 = vmatprep.subr.msk.mxu1 %vm474_vm1, %v9442_v32 }
 0xd6b   :  { %8149 = vmatpush3.xpose.msk.msra.mxu1 %vm474_vm1, %v9442_v32 }
 0xd6e   :  { %8151 = vmatmul.mubr.msk.f32.vlgmr.msra.gmra.mxu1 %vm474_vm1, %v1717_v25 }
 0xe26   :  { %v9452_v26 = vpop.f32.mrf.mxu1 }
 0xe28   :  { %v9454_v29 = vpop.f32.mrf.mxu1 }
 0xe2e   :  { %v8152_v30 = vpop.f32.mrf.mxu1 }
 0xe2f   :  { %v1802_v31 = vadd.f32 %v8152_v30, %v9415_v1 }
 0xe30   :  { %v1796_v36 = vpop.f32.mrf.mxu1 }
 0xe31   :  { %v1797_v37 = vadd.f32 %v1796_v36, %v9420_v2  ;;  %v1808_v38 = vsel %vm562_vm2, %v1802_v31, -inf }
 0xe32   :  { %1809 = vmax.xlane.f32.xlu1 %v1808_v38 }
 0xe33   :  { %v1805_v40 = vsel %vm562_vm2, %v1797_v37, -inf }
 0xe34   :  { %1806 = vmax.xlane.f32.xlu0 %v1805_v40 }
 0xe43   :  { %1831 = vrot.lane.b32.xlu1 %v9318_v35, %s9015_s22 }
 0xe47   :  { %1922 = vrot.lane.b32.xlu1 %v9353_v4, %s9016_s14 }
 0xe4b   :  { %1920 = vrot.lane.b32.xlu1 %v9149_v23, %s9016_s14 }
 0xe4f   :  { %1918 = vrot.lane.b32.xlu1 %v9406_v0, %s9016_s14 }
 0xebb   :  { %v1810_v14 = vpop.xlane.xlu1 %1809 }
 0xebc   :  { %v1812_v41 = vsub.f32 %v1802_v31, %v1810_v14 }
 0xebd   :  { %v1807_v13 = vpop.xlane.xlu0 %1806 }
 0xebe   :  { %v1815_v43 = vmul.f32 1.442695, %v1812_v41  ;;  %v1811_v44 = vsub.f32 %v1797_v37, %v1807_v13 }
 0xebf   :  { %v9468_v45 = vpop.permute.xlu1 %1831 }
 0xec0   :  { %8697 = vpow2.f32 %v1815_v43  ;;  %v1813_v27 = vmul.f32 1.442695, %v1811_v44  ;;  %8153 = vmatprep.subr.mxu0 %v9468_v45 }
 0xec1   :  { %8154 = vmatpush3.msra.mxu0 %v9468_v45 }
 0xec2   :  { %8699 = vpow2.f32 %v1813_v27 }
 0xec3   :  { %v9481_v52 = vpop.permute.xlu1 %1922 }
 0xec7   :  { %v9488_v60 = vpop.permute.xlu1 %1920 }
 0xecb   :  { %v1919_v3 = vpop.permute.xlu1 %1918 }
 0xecd   :  { %v8698_v28 = vpop.eup %8697 }
 0xece   :  { %v1820_v50 = vsel %vm562_vm2, %v8698_v28, 0.0 }
 0xecf   :  { %v8700_v53 = vpop.eup %8699  ;;  %1821 = vadd.xlane.f32.xlu0 %v1820_v50 }
 0xed0   :  { %v1817_v46 = vsel %vm562_vm2, %v8700_v53, 0.0 }
 0xed3   :  { %1818 = vadd.xlane.f32.xlu0 %v1817_v46 }
 0xee9   :  { %1829 = vrot.lane.b32.xlu0 %v9164_v33, %s9015_s22 }
 0xeed   :  { %1916 = vrot.lane.b32.xlu0 %v9404_v63, %s9016_s14 }
 0xf58   :  { %v1822_v47 = vpop.xlane.xlu0 %1821 }
 0xf59   :  { %8701 = vrcp.f32 %v1822_v47 }
 0xf5c   :  { %v1819_v48 = vpop.xlane.xlu0 %1818 }
 0xf5d   :  { %8703 = vrcp.f32 %v1819_v48 }
 0xf60   :  { %v9478_v49 = vpop.permute.xlu0 %1829 }
 0xf61   :  { %8155 = vmatprep.subr.mxu0 %v9478_v49 }
 0xf62   :  { %8156 = vmatpush3.msra.mxu0 %v9478_v49 }
 0xf63   :  { %8160 = vmatprep.subr.msk.mxu0 %vm474_vm1, %v9481_v52 }
 0xf64   :  { %v1917_v62 = vpop.permute.xlu0 %1916 }
 0xf66   :  { %v8702_v55 = vpop.eup %8701 }
 0xf67   :  { %v1826_v61 = vmul.f32 %v8702_v55, %v8698_v28 }
 0xf6a   :  { %v8704_v58 = vpop.eup %8703 }
 0xf6b   :  { %v1825_v59 = vmul.f32 %v8704_v58, %v8700_v53 }
 0xf6d   :  { %8157 = vmatprep.mubr.msk.f32.mxu0 %vm562_vm2, %v1825_v59 }
 0xf6e   :  { %8158 = vmatmul.mubr.msk.f32.vlgmr.msra.gmra.mxu0 %vm562_vm2, %v1826_v61 }
 0xf6f   :  { %8161 = vmatpush3.xpose.msk.msra.mxu0 %vm474_vm1, %v9481_v52  ;;  %8164 = vmatprep.mubr.msk.f32.mxu0 %vm474_vm1, %v1917_v62 }
 0xf70   :  { %8162 = vmatprep.subr.msk.mxu0 %vm474_vm1, %v9488_v60 }
 0xf73   :  { %8163 = vmatpush3.xpose.msk.msra.mxu0 %vm474_vm1, %v9488_v60 }
 0xf76   :  { %8165 = vmatmul.mubr.msk.f32.vlgmr.msra.gmra.mxu0 %vm474_vm1, %v1919_v3 }
0x102e   :  { %v9498_v5 = vpop.f32.mrf.mxu0 }
0x1030   :  { %v9500_v6 = vpop.f32.mrf.mxu0 }
0x1036   :  { %v8166_v7 = vpop.f32.mrf.mxu0 }
0x1037   :  { %v2004_v8 = vadd.f32 %v8166_v7, %v9415_v1 }
0x1038   :  { %v1998_v9 = vpop.f32.mrf.mxu0 }
0x1039   :  { %v1999_v10 = vadd.f32 %v1998_v9, %v9420_v2  ;;  %v2010_v20 = vsel %vm562_vm2, %v2004_v8, -inf }
0x103a   :  { %2011 = vmax.xlane.f32.xlu1 %v2010_v20  ;;  %v1523_v20 = vld [vmem:[%s10681_s4 + $0xf8] sm:$0xff] }
0x103b   :  { %v2007_v21 = vsel %vm562_vm2, %v1999_v10, -inf }
0x103c   :  { %2008 = vmax.xlane.f32.xlu0 %v2007_v21  ;;  %v1522_v21 = vld [vmem:[%s10681_s4 + $0xf0] sm:$0xff] }
0x104b   :  { %2031 = vrot.lane.b32.xlu1 %v9318_v35, %s9016_s14 }
0x104f   :  { %2122 = vrot.lane.b32.xlu1 %v9353_v4, %s9017_s15 }
0x1053   :  { %2120 = vrot.lane.b32.xlu1 %v9149_v23, %s9017_s15 }
0x1057   :  { %2118 = vrot.lane.b32.xlu1 %v9406_v0, %s9017_s15 }
0x10c3   :  { %v2012_v39 = vpop.xlane.xlu1 %2011 }
0x10c4   :  { %v2014_v11 = vsub.f32 %v2004_v8, %v2012_v39  ;;  %v1521_v39 = vld [vmem:[%s10681_s4 + $0xe8] sm:$0xff] }
0x10c5   :  { %v2009_v34 = vpop.xlane.xlu0 %2008 }
0x10c6   :  { %v2017_v12 = vmul.f32 1.442695, %v2014_v11  ;;  %v2013_v15 = vsub.f32 %v1999_v10, %v2009_v34  ;;  %v1520_v11 = vld [vmem:[%s10681_s4 + $0xe0] sm:$0xff] }
0x10c7   :  { %v9514_v56 = vpop.permute.xlu1 %2031 }
0x10c8   :  { %8705 = vpow2.f32 %v2017_v12  ;;  %v2015_v57 = vmul.f32 1.442695, %v2013_v15  ;;  %8167 = vmatprep.subr.mxu1 %v9514_v56 }
0x10c9   :  { %8168 = vmatpush3.msra.mxu1 %v9514_v56 }
0x10ca   :  { %8707 = vpow2.f32 %v2015_v57 }
0x10cb   :  { %v9527_v25 = vpop.permute.xlu1 %2122 }
0x10cf   :  { %v9534_v38 = vpop.permute.xlu1 %2120 }
0x10d3   :  { %v2119_v40 = vpop.permute.xlu1 %2118 }
0x10d5   :  { %v8706_v16 = vpop.eup %8705 }
0x10d6   :  { %v2022_v17 = vsel %vm562_vm2, %v8706_v16, 0.0 }
0x10d7   :  { %v8708_v18 = vpop.eup %8707  ;;  %2023 = vadd.xlane.f32.xlu0 %v2022_v17 }
0x10d8   :  { %v2019_v0 = vsel %vm562_vm2, %v8708_v18, 0.0 }
0x10db   :  { %2020 = vadd.xlane.f32.xlu0 %v2019_v0 }
0x10f1   :  { %2029 = vrot.lane.b32.xlu0 %v9164_v33, %s9016_s14 }
0x10f5   :  { %2116 = vrot.lane.b32.xlu0 %v9404_v63, %s9017_s15 }
0x1160   :  { %v2024_v19 = vpop.xlane.xlu0 %2023 }
0x1161   :  { %8709 = vrcp.f32 %v2024_v19 }
0x1164   :  { %v2021_v22 = vpop.xlane.xlu0 %2020 }
0x1165   :  { %8711 = vrcp.f32 %v2021_v22 }
0x1168   :  { %v9524_v24 = vpop.permute.xlu0 %2029 }
0x1169   :  { %8169 = vmatprep.subr.mxu1 %v9524_v24 }
0x116a   :  { %8170 = vmatpush3.msra.mxu1 %v9524_v24 }
0x116b   :  { %8174 = vmatprep.subr.msk.mxu1 %vm474_vm1, %v9527_v25 }
0x116c   :  { %v2117_v63 = vpop.permute.xlu0 %2116 }
0x116e   :  { %v8710_v30 = vpop.eup %8709 }
0x116f   :  { %v2028_v37 = vmul.f32 %v8710_v30, %v8706_v16 }
0x1172   :  { %v8712_v31 = vpop.eup %8711 }
0x1173   :  { %v2027_v36 = vmul.f32 %v8712_v31, %v8708_v18 }
0x1175   :  { %8171 = vmatprep.mubr.msk.f32.mxu1 %vm562_vm2, %v2027_v36 }
0x1176   :  { %8172 = vmatmul.mubr.msk.f32.vlgmr.msra.gmra.mxu1 %vm562_vm2, %v2028_v37 }
0x1177   :  { %8175 = vmatpush3.xpose.msk.msra.mxu1 %vm474_vm1, %v9527_v25  ;;  %8178 = vmatprep.mubr.msk.f32.mxu1 %vm474_vm1, %v2117_v63 }
0x1178   :  { %8176 = vmatprep.subr.msk.mxu1 %vm474_vm1, %v9534_v38 }
0x117b   :  { %8177 = vmatpush3.xpose.msk.msra.mxu1 %vm474_vm1, %v9534_v38 }
0x117e   :  { %8179 = vmatmul.mubr.msk.f32.vlgmr.msra.gmra.mxu1 %vm474_vm1, %v2119_v40 }
0x1236   :  { %v8173_v14 = vpop.f32.mrf.mxu1 }
0x1238   :  { %v2107_v41 = vpop.f32.mrf.mxu1 }
0x123e   :  { %v8180_v13 = vpop.f32.mrf.mxu1 }
0x123f   :  { %v2204_v43 = vadd.f32 %v8180_v13, %v9415_v1 }
0x1240   :  { %v2198_v44 = vpop.f32.mrf.mxu1 }
0x1241   :  { %v2199_v27 = vadd.f32 %v2198_v44, %v9420_v2  ;;  %v2210_v28 = vsel %vm562_vm2, %v2204_v43, -inf }
0x1242   :  { %2211 = vmax.xlane.f32.xlu1 %v2210_v28 }
0x1243   :  { %v2207_v50 = vsel %vm562_vm2, %v2199_v27, -inf }
0x1244   :  { %2208 = vmax.xlane.f32.xlu0 %v2207_v50 }
0x1253   :  { %2231 = vrot.lane.b32.xlu1 %v9318_v35, %s9017_s15 }
0x1257   :  { %2318 = vrot.lane.b32.xlu1 %v9500_v6, %s9018_s1 }
0x125b   :  { %2320 = vrot.lane.b32.xlu1 %v9498_v5, %s9018_s1 }
0x125f   :  { %2328 = vrot.lane.b32.xlu1 %v8173_v14, %s9019_s25 }
0x12cb   :  { %v2212_v1 = vpop.xlane.xlu1 %2211 }
0x12cc   :  { %v2214_v53 = vsub.f32 %v2204_v43, %v2212_v1 }
0x12cd   :  { %v2209_v2 = vpop.xlane.xlu0 %2208 }
0x12ce   :  { %v2217_v46 = vmul.f32 1.442695, %v2214_v53  ;;  %v2213_v47 = vsub.f32 %v2199_v27, %v2209_v2 }
0x12cf   :  { %v9555_v48 = vpop.permute.xlu1 %2231 }
0x12d0   :  { %8713 = vpow2.f32 %v2217_v46  ;;  %v2215_v55 = vmul.f32 1.442695, %v2213_v47  ;;  %8181 = vmatprep.subr.mxu0 %v9555_v48 }
0x12d1   :  { %8182 = vmatpush3.msra.mxu0 %v9555_v48 }
0x12d2   :  { %8715 = vpow2.f32 %v2215_v55 }
0x12d3   :  { %v2319_v15 = vpop.permute.xlu1 %2318 }
0x12d4   :  { %v2340_v18 = vsel %vm474_vm1, %v9454_v29, %v2319_v15  ;;  %v7496_v29 = vld [vmem:[%s10683_s6 + $0x7] ss:$0 sm:$0xff] }
0x12d7   :  { %v2321_v57 = vpop.permute.xlu1 %2320 }
0x12d8   :  { %v2341_v19 = vsel %vm474_vm1, %v9452_v26, %v2321_v57  ;;  %v7500_v57 = vld [vmem:[%s10683_s6 + $0xc] ss:$0 sm:$0xff] }
0x12db   :  { %v2329_v16 = vpop.permute.xlu1 %2328 }
0x12dc   :  { %v2343_v31 = vsel %vm562_vm2, %v2341_v19, %v2329_v16 }
0x12dd   :  { %v8714_v58 = vpop.eup %8713 }
0x12de   :  { %v2222_v59 = vsel %vm562_vm2, %v8714_v58, 0.0 }
0x12df   :  { %v8716_v61 = vpop.eup %8715  ;;  %2223 = vadd.xlane.f32.xlu0 %v2222_v59  ;;  %v2475_v59 = vld [vmem:[%s10682_s5 + $0x8] sm:$0xff] }
0x12e0   :  { %v2219_v62 = vsel %vm562_vm2, %v8716_v61, 0.0 }
0x12e3   :  { %2220 = vadd.xlane.f32.xlu0 %v2219_v62  ;;  %v8885_v62 = vld [vmem:[%s10681_s4 + $0x18] sm:$0xff] }
0x12f9   :  { %2229 = vrot.lane.b32.xlu0 %v9164_v33, %s9017_s15 }
0x12fd   :  { %2326 = vrot.lane.b32.xlu0 %v2107_v41, %s9019_s25 }
0x1368   :  { %v2224_v3 = vpop.xlane.xlu0 %2223 }
0x1369   :  { %8717 = vrcp.f32 %v2224_v3  ;;  %v2573_v3 = vld [vmem:[%s10681_s4 + $0x138] sm:$0xff] }
0x136c   :  { %v2221_v5 = vpop.xlane.xlu0 %2220 }
0x136d   :  { %8719 = vrcp.f32 %v2221_v5  ;;  %v2572_v5 = vld [vmem:[%s10681_s4 + $0x130] sm:$0xff] }
0x1370   :  { %v9564_v6 = vpop.permute.xlu0 %2229 }
0x1371   :  { %8183 = vmatprep.subr.mxu0 %v9564_v6 }
0x1372   :  { %8184 = vmatpush3.msra.mxu0 %v9564_v6 }
0x1373   :  { %8188 = vmatprep.subr.mxu0 %v1523_v20 }
0x1374   :  { %v2327_v17 = vpop.permute.xlu0 %2326 }
0x1375   :  { %v2342_v22 = vsel %vm562_vm2, %v2340_v18, %v2327_v17 }
0x1376   :  { %v8718_v7 = vpop.eup %8717 }
0x1377   :  { %v2228_v10 = vmul.f32 %v8718_v7, %v8714_v58  ;;  %v2476_v58 = vld [vmem:[%s10682_s5 + $0x10] sm:$0xff]  ;;  %v2571_v7 = vld [vmem:[%s10681_s4 + $0x128] sm:$0xff] }
0x137a   :  { %v8720_v8 = vpop.eup %8719 }
0x137b   :  { %v2227_v9 = vmul.f32 %v8720_v8, %v8716_v61  ;;  %v2474_v61 = vld [vmem:[%s10682_s5] sm:$0xff] }
0x137c   :  { %v2570_v8 = vld [vmem:[%s10681_s4 + $0x120] sm:$0xff] }
0x137d   :  { %8185 = vmatprep.mubr.msk.f32.mxu0 %vm562_vm2, %v2227_v9 }
0x137e   :  { %8186 = vmatmul.mubr.msk.f32.vlgmr.msra.gmra.mxu0 %vm562_vm2, %v2228_v10 }
0x137f   :  { %8189 = vmatpush3.msra.mxu0 %v1523_v20 }
0x1380   :  { %8190 = vmatprep.subr.mxu0 %v1522_v21 }
0x1381   :  { %8191 = vmatpush3.msra.mxu0 %v1522_v21 }
0x1382   :  { %8192 = vmatprep.subr.mxu0 %v1521_v39 }
0x1383   :  { %8193 = vmatpush3.msra.mxu0 %v1521_v39 }
0x1384   :  { %8194 = vmatprep.subr.mxu0 %v1520_v11 }
0x1385   :  { %8195 = vmatpush3.msra.mxu0 %v1520_v11 }
0x1386   :  { %8210 = vmatprep.subr.mxu0 %v2573_v3 }
0x143e   :  { %v8187_v34 = vpop.f32.mrf.mxu0 }
0x143f   :  { %2336 = vrot.lane.b32.xlu1 %v8187_v34, %s9020_s0 }
0x1440   :  { %v2307_v12 = vpop.f32.mrf.mxu0 }
0x1441   :  { %2334 = vrot.lane.b32.xlu0 %v2307_v12, %s9020_s0  ;;  %v7499_v12 = vld [vmem:[%s10683_s6 + $0xb] ss:$0 sm:$0xff] }
0x14b1   :  { %v2337_v0 = vpop.permute.xlu1 %2336 }
0x14b2   :  { %v2345_v37 = vsel %vm1296_vm3, %v2343_v31, %v2337_v0  ;;  %v8887_v31 = vld [vmem:[%s10681_s4 + $0x8] sm:$0xff] }
0x14b3   :  { %v2335_v30 = vpop.permute.xlu0 %2334 }
0x14b4   :  { %v2344_v36 = vsel %vm1296_vm3, %v2342_v22, %v2335_v30  ;;  %v8886_v30 = vld [vmem:[%s10681_s4 + $0x10] sm:$0xff] }
0x14b5   :  { %8196 = vmatprep.mubr.msk.f32.mxu0 %vm44_vm0, %v2344_v36  ;;  %v8888_v36 = vld [vmem:[%s10681_s4] sm:$0xff] }
0x14b6   :  { %8197 = vmatmul.mubr.msk.f32.vlgmr.msra.gmra.mxu0 %vm44_vm0, %v2345_v37  ;;  %v9650_v37 = vld [vmem:[%s10681_s4 + $0x38] sm:$0xff] }
0x14b7   :  { %8211 = vmatpush3.msra.mxu0 %v2573_v3 }
0x14b8   :  { %8212 = vmatprep.subr.mxu0 %v2572_v5 }
0x14b9   :  { %8213 = vmatpush3.msra.mxu0 %v2572_v5 }
0x14ba   :  { %8214 = vmatprep.subr.mxu0 %v2571_v7 }
0x14bb   :  { %8215 = vmatpush3.msra.mxu0 %v2571_v7 }
0x14bc   :  { %8216 = vmatprep.subr.mxu0 %v2570_v8 }
0x14bd   :  { %8217 = vmatpush3.msra.mxu0 %v2570_v8 }
0x1576   :  { %v8198_v63 = vpop.f32.mrf.mxu0 }
0x1577   :  { %v2429_v40 = vadd.f32 %v8198_v63, %v7496_v29  ;;  %v2568_v63 = vld [vmem:[%s10681_s4 + $0x110] sm:$0xff] }
0x1578   :  { %v2423_v26 = vpop.f32.mrf.mxu0 }
0x1579   :  { %v2424_v14 = vadd.f32 %v7496_v29, %v2423_v26  ;;  %v2433_v41 = vadd.f32 %v2429_v40, %v9394_v54  ;;  %v2569_v29 = vld [vmem:[%s10681_s4 + $0x118] sm:$0xff]  ;;  %v2567_v40 = vld [vmem:[%s10681_s4 + $0x108] sm:$0xff]  ;;  %v2566_v26 = vld [vmem:[%s10681_s4 + $0x100] sm:$0xff] }
0x157a   :  { %8218 = vmatprep.subr.mxu0 %v2569_v29 }
0x157b   :  { %v2437_v13 = vsel %vm44_vm0, %v2433_v41, 0.0  ;;  %v2432_v43 = vadd.f32 %v2424_v14, %v9390_v51  ;;  %v2477_v51 = vld [vmem:[%s10682_s5 + $0x18] sm:$0xff]  ;;  %8219 = vmatpush3.msra.mxu0 %v2569_v29  ;;  %v7508_v29 = vld [vmem:[%s10683_s6 + $0xe] ss:$0 sm:$0xff] }
0x157c   :  { %2438 = vadd.xlane.f32.xlu1 %v2437_v13  ;;  %8199 = vmatprep.subr.mxu1 %v2477_v51  ;;  %v8890_v14 = vld [vmem:[%s10681_s4 + $0x58] sm:$0xff] }
0x157d   :  { %v2434_v44 = vsel %vm44_vm0, %v2432_v43, 0.0  ;;  %8200 = vmatpush3.msra.mxu1 %v2477_v51  ;;  %8220 = vmatprep.subr.mxu0 %v2568_v63 }
0x157e   :  { %2435 = vadd.xlane.f32.xlu0 %v2434_v44  ;;  %8201 = vmatprep.subr.mxu1 %v2476_v58 }
0x157f   :  { %8202 = vmatpush3.msra.mxu1 %v2476_v58  ;;  %8221 = vmatpush3.msra.mxu0 %v2568_v63 }
0x1580   :  { %8203 = vmatprep.subr.mxu1 %v2475_v59  ;;  %8222 = vmatprep.subr.mxu0 %v2567_v40 }
0x1581   :  { %8204 = vmatpush3.msra.mxu1 %v2475_v59  ;;  %8223 = vmatpush3.msra.mxu0 %v2567_v40 }
0x1582   :  { %8205 = vmatprep.subr.mxu1 %v2474_v61  ;;  %8224 = vmatprep.subr.mxu0 %v2566_v26 }
0x1583   :  { %8206 = vmatpush3.msra.mxu1 %v2474_v61  ;;  %8225 = vmatpush3.msra.mxu0 %v2566_v26  ;;  %v8894_v26 = vld [vmem:[%s10681_s4 + $0x30] sm:$0xff] }
0x1584   :  { %8229 = vmatprep.subr.mxu1 %v8885_v62  ;;  %8251 = vmatprep.subr.mxu0 %v8890_v14 }
0x1605   :  { %v2439_v27 = vpop.xlane.xlu1 %2438 }
0x1606   :  { %v2441_v28 = vmul.f32 0.03125, %v2439_v27 }
0x1607   :  { %v2436_v50 = vpop.xlane.xlu0 %2435 }
0x1608   :  { %v2440_v1 = vmul.f32 0.03125, %v2436_v50  ;;  %v2443_v53 = vsub.f32 %v2433_v41, %v2441_v28  ;;  %v7501_v41 = vld [vmem:[%s10683_s6 + $0x11] ss:$0 sm:$0xff] }
0x160a   :  { %v2442_v2 = vsub.f32 %v2432_v43, %v2440_v1  ;;  %v2445_v55 = vmul.f32 %v2443_v53, %v2443_v53  ;;  %v8891_v1 = vld [vmem:[%s10681_s4 + $0x50] sm:$0xff] }
0x160c   :  { %v2444_v46 = vmul.f32 %v2442_v2, %v2442_v2  ;;  %v2449_v54 = vsel %vm44_vm0, %v2445_v55, 0.0 }
0x160e   :  { %v2446_v47 = vsel %vm44_vm0, %v2444_v46, 0.0  ;;  %v7504_v46 = vld [vmem:[%s10683_s6 + $0x8] ss:$0 sm:$0xff] }
0x160f   :  { %2447 = vadd.xlane.f32.xlu0 %v2446_v47 }
0x1613   :  { %2450 = vadd.xlane.f32.xlu0 %v2449_v54 }
0x1698   :  { %v2448_v9 = vpop.xlane.xlu0 %2447 }
0x1699   :  { %v2452_v10 = vmul.f32 0.03125, %v2448_v9 }
0x169b   :  { %v2454_v20 = vadd.f32 1e-05, %v2452_v10 }
0x169c   :  { %v2451_v21 = vpop.xlane.xlu0 %2450 }
0x169d   :  { %8721 = vrsqrt.f32 %v2454_v20  ;;  %v2453_v39 = vmul.f32 0.03125, %v2451_v21 }
0x169f   :  { %v2455_v11 = vadd.f32 1e-05, %v2453_v39 }
0x16a1   :  { %8723 = vrsqrt.f32 %v2455_v11 }
0x16aa   :  { %v8722_v34 = vpop.eup %8721 }
0x16ab   :  { %v2458_v15 = vmul.f32 %v8722_v34, %v2442_v2  ;;  %v8893_v2 = vld [vmem:[%s10681_s4 + $0x40] sm:$0xff] }
0x16ad   :  { %v2465_v16 = vmul.f32 %v7499_v12, %v2458_v15 }
0x16ae   :  { %v8724_v17 = vpop.eup %8723 }
0x16af   :  { %v2472_v18 = vadd.f32 %v7500_v57, %v2465_v16  ;;  %v2459_v0 = vmul.f32 %v8724_v17, %v2443_v53  ;;  %v8892_v53 = vld [vmem:[%s10681_s4 + $0x48] sm:$0xff] }
0x16b1   :  { %8207 = vmatprep.mubr.msk.f32.mxu1 %vm44_vm0, %v2472_v18  ;;  %v2466_v19 = vmul.f32 %v7499_v12, %v2459_v0  ;;  %v7507_v0 = vld [vmem:[%s10683_s6 + $0xd] ss:$0 sm:$0xff] }
0x16b3   :  { %v2473_v22 = vadd.f32 %v7500_v57, %v2466_v19 }
0x16b5   :  { %8208 = vmatmul.mubr.msk.f32.vlgmr.msra.gmra.mxu1 %vm44_vm0, %v2473_v22 }
0x16b6   :  { %8230 = vmatpush3.msra.mxu1 %v8885_v62 }
0x16b7   :  { %8231 = vmatprep.subr.mxu1 %v8886_v30 }
0x16b8   :  { %8232 = vmatpush3.msra.mxu1 %v8886_v30 }
0x16b9   :  { %8233 = vmatprep.subr.mxu1 %v8887_v31 }
0x16ba   :  { %8234 = vmatpush3.msra.mxu1 %v8887_v31 }
0x16bb   :  { %8235 = vmatprep.subr.mxu1 %v8888_v36 }
0x16bc   :  { %8236 = vmatpush3.msra.mxu1 %v8888_v36 }
0x16bd   :  { %8240 = vmatprep.subr.mxu1 %v9650_v37 }
0x1775   :  { %v8209_v13 = vpop.f32.mrf.mxu1 }
0x1776   :  { %v2561_v43 = vadd.f32 %v8209_v13, %v7501_v41 }
0x1777   :  { %v2555_v44 = vpop.f32.mrf.mxu1 }
0x1778   :  { %v2556_v27 = vadd.f32 %v7501_v41, %v2555_v44  ;;  %v2565_v50 = vmax.f32 %v2561_v43, 0.0  ;;  %v8896_v41 = vld [vmem:[%s10681_s4 + $0x20] sm:$0xff] }
0x1779   :  { %v8897_v43 = vld [vmem:[%s10683_s6 + $0x2] ss:$0 sm:$0xff] }
0x177a   :  { %v2564_v28 = vmax.f32 %v2556_v27, 0.0 }
0x177c   :  { %8226 = vmatprep.mubr.msk.f32.mxu0 %vm2579_vm4, %v2564_v28 }
0x177d   :  { %8227 = vmatmul.mubr.msk.f32.vlgmr.msra.gmra.mxu0 %vm2579_vm4, %v2565_v50  ;;  %v8898_v50 = vld [vmem:[%s10683_s6] ss:$0 sm:$0xff] }
0x177e   :  { %8252 = vmatpush3.msra.mxu0 %v8890_v14  ;;  %v8895_v14 = vld [vmem:[%s10681_s4 + $0x28] sm:$0xff] }
0x177f   :  { %8253 = vmatprep.subr.mxu0 %v8891_v1 }
0x1780   :  { %8254 = vmatpush3.msra.mxu0 %v8891_v1 }
0x1781   :  { %8255 = vmatprep.subr.mxu0 %v8892_v53 }
0x1782   :  { %8256 = vmatpush3.msra.mxu0 %v8892_v53 }
0x1783   :  { %8257 = vmatprep.subr.mxu0 %v8893_v2 }
0x1784   :  { %8258 = vmatpush3.msra.mxu0 %v8893_v2 }
0x183d   :  { %v8228_v47 = vpop.f32.mrf.mxu0 }
0x183e   :  { %v2658_v55 = vadd.f32 %v8228_v47, %v7504_v46  ;;  %v8899_v47 = vld [vmem:[%s10683_s6 + $0x1] ss:$0 sm:$0xff] }
0x183f   :  { %v2652_v54 = vpop.f32.mrf.mxu0 }
0x1840   :  { %v2653_v51 = vadd.f32 %v7504_v46, %v2652_v54  ;;  %v2662_v58 = vadd.f32 %v2658_v55, %v2473_v22 }
0x1842   :  { %v2666_v59 = vsel %vm44_vm0, %v2662_v58, 0.0  ;;  %v2661_v61 = vadd.f32 %v2653_v51, %v2472_v18 }
0x1843   :  { %2667 = vadd.xlane.f32.xlu0 %v2666_v59 }
0x1844   :  { %v2663_v62 = vsel %vm44_vm0, %v2661_v61, 0.0 }
0x1845   :  { %2664 = vadd.xlane.f32.xlu1 %v2663_v62 }
0x18cc   :  { %v2668_v3 = vpop.xlane.xlu0 %2667 }
0x18cd   :  { %v2670_v5 = vmul.f32 0.03125, %v2668_v3 }
0x18ce   :  { %v2665_v7 = vpop.xlane.xlu1 %2664 }
0x18cf   :  { %v2672_v8 = vsub.f32 %v2662_v58, %v2670_v5  ;;  %v2669_v9 = vmul.f32 0.03125, %v2665_v7 }
0x18d1   :  { %v2671_v10 = vsub.f32 %v2661_v61, %v2669_v9  ;;  %v2674_v20 = vmul.f32 %v2672_v8, %v2672_v8 }
0x18d3   :  { %v2678_v21 = vsel %vm44_vm0, %v2674_v20, 0.0  ;;  %v2673_v39 = vmul.f32 %v2671_v10, %v2671_v10  ;;  %v9781_v20 = vld [vmem:[%s10679_s2] sm:$0xff] }
0x18d4   :  { %2679 = vadd.xlane.f32.xlu0 %v2678_v21 }
0x18d5   :  { %v2675_v11 = vsel %vm44_vm0, %v2673_v39, 0.0 }
0x18d6   :  { %2676 = vadd.xlane.f32.xlu1 %v2675_v11 }
0x195d   :  { %v2680_v34 = vpop.xlane.xlu0 %2679 }
0x195e   :  { %v2682_v12 = vmul.f32 0.03125, %v2680_v34 }
0x195f   :  { %v2677_v15 = vpop.xlane.xlu1 %2676 }
0x1960   :  { %v2684_v57 = vadd.f32 1e-05, %v2682_v12  ;;  %v2681_v16 = vmul.f32 0.03125, %v2677_v15 }
0x1962   :  { %8725 = vrsqrt.f32 %v2684_v57  ;;  %v2683_v17 = vadd.f32 1e-05, %v2681_v16 }
0x1964   :  { %8727 = vrsqrt.f32 %v2683_v17 }
0x196f   :  { %v8726_v18 = vpop.eup %8725 }
0x1970   :  { %v2688_v19 = vmul.f32 %v8726_v18, %v2672_v8  ;;  %v9775_v8 = vld [vmem:[%s10679_s2 + $0x8] sm:$0xff] }
0x1971   :  { %v8728_v22 = vpop.eup %8727 }
0x1972   :  { %v2687_v30 = vmul.f32 %v8728_v22, %v2671_v10  ;;  %v2695_v31 = vmul.f32 %v7507_v0, %v2688_v19 }
0x1974   :  { %v2694_v36 = vmul.f32 %v7507_v0, %v2687_v30  ;;  %v9697_v40 = vadd.f32 %v7508_v29, %v2695_v31 }
0x1976   :  { %v9695_v63 = vadd.f32 %v7508_v29, %v2694_v36 }
0x1978   :  { %8237 = vmatprep.mubr.msk.f32.mxu1 %vm44_vm0, %v9695_v63  ;;  %8259 = vmatprep.mubr.msk.f32.mxu0 %vm44_vm0, %v9695_v63 }
0x1979   :  { %8238 = vmatmul.mubr.msk.f32.vlgmr.msra.gmra.mxu1 %vm44_vm0, %v9697_v40  ;;  %8260 = vmatmul.mubr.msk.f32.vlgmr.msra.gmra.mxu0 %vm44_vm0, %v9697_v40 }
0x197a   :  { %8241 = vmatpush3.msra.mxu1 %v9650_v37  ;;  %8248 = vmatprep.mubr.msk.f32.mxu1 %vm44_vm0, %v9695_v63 }
0x197b   :  { %8242 = vmatprep.subr.mxu1 %v8894_v26 }
0x197c   :  { %8243 = vmatpush3.msra.mxu1 %v8894_v26 }
0x197d   :  { %8244 = vmatprep.subr.mxu1 %v8895_v14 }
0x197e   :  { %8245 = vmatpush3.msra.mxu1 %v8895_v14 }
0x197f   :  { %8246 = vmatprep.subr.mxu1 %v8896_v41 }
0x1980   :  { %8247 = vmatpush3.msra.mxu1 %v8896_v41 }
0x1981   :  { %8249 = vmatmul.mubr.msk.f32.vlgmr.msra.gmra.mxu1 %vm44_vm0, %v9697_v40 }
0x1a39   :  { %v8239_v37 = vpop.f32.mrf.mxu1  ;;  %v8261_v13 = vpop.f32.mrf.mxu0 }
0x1a3a   :  { %v9724_v44 = vadd.f32 %v8897_v43, %v8261_v13  ;;  %v2781_v58 = vadd.f32 %v8898_v50, %v8239_v37 }
0x1a3b   :  { %v2775_v27 = vpop.f32.mrf.mxu1  ;;  %v2927_v28 = vpop.f32.mrf.mxu0 }
0x1a3c   :  { %v2776_v1 = vadd.f32 %v8898_v50, %v2775_v27  ;;  %v9729_v53 = vadd.f32 %v8897_v43, %v2927_v28  ;;  %8269 = vmatprep.subr.mxu0 %v9724_v44  ;;  %v9760_v59 = vmul.f32 0.35355338, %v2781_v58 }
0x1a3d   :  { %8270 = vmatpush3.msra.mxu0 %v9724_v44 }
0x1a3e   :  { %v9733_v2 = vmul.f32 0.35355338, %v2776_v1  ;;  %8271 = vmatprep.subr.mxu0 %v9729_v53 }
0x1a3f   :  { %8272 = vmatpush3.msra.mxu0 %v9729_v53 }
0x1a40   :  { %8266 = vmatprep.mubr.msk.f32.mxu1 %vm474_vm1, %v9733_v2 }
0x1a41   :  { %v8250_v46 = vpop.f32.mrf.mxu1 }
0x1a42   :  { %v9742_v55 = vadd.f32 %v8899_v47, %v8250_v46 }
0x1a43   :  { %v2852_v54 = vpop.f32.mrf.mxu1 }
0x1a44   :  { %v9744_v51 = vadd.f32 %v8899_v47, %v2852_v54  ;;  %3132 = vrot.lane.b32.xlu1 %v9742_v55, %s9015_s22  ;;  %8262 = vmatprep.subr.msk.mxu1 %vm474_vm1, %v9742_v55 }
0x1a45   :  { %8263 = vmatpush3.xpose.msk.msra.mxu1 %vm474_vm1, %v9742_v55 }
0x1a46   :  { %3130 = vrot.lane.b32.xlu0 %v9744_v51, %s9015_s22  ;;  %8264 = vmatprep.subr.msk.mxu1 %vm474_vm1, %v9744_v51 }
0x1a48   :  { %3126 = vrot.lane.b32.xlu1 %v9733_v2, %s9015_s22 }
0x1a49   :  { %8265 = vmatpush3.xpose.msk.msra.mxu1 %vm474_vm1, %v9744_v51 }
0x1a4c   :  { %3128 = vrot.lane.b32.xlu1 %v9760_v59, %s9015_s22  ;;  %8267 = vmatmul.mubr.msk.f32.vlgmr.msra.gmra.mxu1 %vm474_vm1, %v9760_v59 }
0x1ab6   :  { %v3133_v61 = vpop.permute.xlu1 %3132 }
0x1ab7   :  { %8276 = vmatprep.subr.msk.mxu1 %vm474_vm1, %v3133_v61 }
0x1ab8   :  { %v3131_v62 = vpop.permute.xlu0 %3130  ;;  %8277 = vmatpush3.xpose.msk.msra.mxu1 %vm474_vm1, %v3133_v61 }
0x1ab9   :  { %8278 = vmatprep.subr.msk.mxu1 %vm474_vm1, %v3131_v62 }
0x1aba   :  { %v3127_v3 = vpop.permute.xlu1 %3126 }
0x1abb   :  { %8280 = vmatprep.mubr.msk.f32.mxu1 %vm474_vm1, %v3127_v3 }
0x1abc   :  { %8279 = vmatpush3.xpose.msk.msra.mxu1 %vm474_vm1, %v3131_v62 }
0x1abe   :  { %v3129_v5 = vpop.permute.xlu1 %3128 }
0x1abf   :  { %8281 = vmatmul.mubr.msk.f32.vlgmr.msra.gmra.mxu1 %vm474_vm1, %v3129_v5 }
0x1b0c   :  { %v8268_v7 = vpop.f32.mrf.mxu1 }
0x1b0d   :  { %v3020_v9 = vadd.f32 %v9775_v8, %v8268_v7 }
0x1b0e   :  { %v3014_v10 = vpop.f32.mrf.mxu1 }
0x1b0f   :  { %v3015_v21 = vadd.f32 %v9781_v20, %v3014_v10  ;;  %v3026_v39 = vsel %vm562_vm2, %v3020_v9, -inf }
0x1b10   :  { %3027 = vmax.xlane.f32.xlu1 %v3026_v39 }
0x1b11   :  { %v3023_v11 = vsel %vm562_vm2, %v3015_v21, -inf }
0x1b12   :  { %3024 = vmax.xlane.f32.xlu0 %v3023_v11 }
0x1b21   :  { %3243 = vrot.lane.b32.xlu1 %v9724_v44, %s9015_s22 }
0x1b7f   :  { %v8282_v34 = vpop.f32.mrf.mxu1 }
0x1b80   :  { %v3214_v57 = vadd.f32 %v9775_v8, %v8282_v34 }
0x1b81   :  { %v3208_v12 = vpop.f32.mrf.mxu1 }
0x1b82   :  { %v3209_v15 = vadd.f32 %v9781_v20, %v3208_v12  ;;  %v3220_v17 = vsel %vm562_vm2, %v3214_v57, -inf }
0x1b84   :  { %v3217_v16 = vsel %vm562_vm2, %v3209_v15, -inf }
0x1b85   :  { %3218 = vmax.xlane.f32.xlu0 %v3217_v16 }
0x1b89   :  { %3221 = vmax.xlane.f32.xlu0 %v3220_v17 }
0x1b99   :  { %v3028_v18 = vpop.xlane.xlu1 %3027 }
0x1b9a   :  { %v3030_v0 = vsub.f32 %v3020_v9, %v3028_v18 }
0x1b9b   :  { %v3025_v19 = vpop.xlane.xlu0 %3024 }
0x1b9c   :  { %v3033_v22 = vmul.f32 1.442695, %v3030_v0  ;;  %v3029_v30 = vsub.f32 %v3015_v21, %v3025_v19 }
0x1b9d   :  { %v3244_v31 = vpop.permute.xlu1 %3243 }
0x1b9e   :  { %8729 = vpow2.f32 %v3033_v22  ;;  %v3031_v36 = vmul.f32 1.442695, %v3029_v30  ;;  %8283 = vmatprep.subr.mxu0 %v3244_v31 }
0x1ba0   :  { %8731 = vpow2.f32 %v3031_v36 }
0x1bab   :  { %v8730_v29 = vpop.eup %8729 }
0x1bac   :  { %v3038_v26 = vsel %vm562_vm2, %v8730_v29, 0.0 }
0x1bad   :  { %v8732_v14 = vpop.eup %8731  ;;  %3039 = vadd.xlane.f32.xlu0 %v3038_v26 }
0x1bae   :  { %v3035_v41 = vsel %vm562_vm2, %v8732_v14, 0.0 }
0x1baf   :  { %3036 = vadd.xlane.f32.xlu1 %v3035_v41 }
0x1bc0   :  { %3334 = vrot.lane.b32.xlu1 %v9742_v55, %s9016_s14 }
0x1bc4   :  { %3332 = vrot.lane.b32.xlu1 %v9744_v51, %s9016_s14 }
0x1c0e   :  { %v3219_v37 = vpop.xlane.xlu0 %3218 }
0x1c0f   :  { %v3223_v13 = vsub.f32 %v3209_v15, %v3219_v37 }
0x1c11   :  { %v3225_v43 = vmul.f32 1.442695, %v3223_v13 }
0x1c12   :  { %v3222_v27 = vpop.xlane.xlu0 %3221 }
0x1c13   :  { %8733 = vpow2.f32 %v3225_v43  ;;  %v3224_v28 = vsub.f32 %v3214_v57, %v3222_v27 }
0x1c15   :  { %v3227_v50 = vmul.f32 1.442695, %v3224_v28 }
0x1c17   :  { %8735 = vpow2.f32 %v3227_v50 }
0x1c20   :  { %v8734_v1 = vpop.eup %8733 }
0x1c21   :  { %v3229_v46 = vsel %vm562_vm2, %v8734_v1, 0.0 }
0x1c22   :  { %3230 = vadd.xlane.f32.xlu1 %v3229_v46 }
0x1c24   :  { %v8736_v47 = vpop.eup %8735 }
0x1c25   :  { %v3232_v54 = vsel %vm562_vm2, %v8736_v47, 0.0 }
0x1c26   :  { %3233 = vadd.xlane.f32.xlu0 %v3232_v54 }
0x1c33   :  { %3330 = vrot.lane.b32.xlu1 %v9760_v59, %s9016_s14 }
0x1c36   :  { %v3040_v58 = vpop.xlane.xlu0 %3039 }
0x1c37   :  { %8737 = vrcp.f32 %v3040_v58 }
0x1c38   :  { %v3037_v61 = vpop.xlane.xlu1 %3036 }
0x1c39   :  { %8739 = vrcp.f32 %v3037_v61 }
0x1c3c   :  { %3241 = vrot.lane.b32.xlu0 %v9729_v53, %s9015_s22  ;;  %v3335_v9 = vpop.permute.xlu1 %3334 }
0x1c40   :  { %3328 = vrot.lane.b32.xlu0 %v9733_v2, %s9016_s14  ;;  %v3333_v10 = vpop.permute.xlu1 %3332 }
0x1c44   :  { %v8738_v62 = vpop.eup %8737 }
0x1c45   :  { %v3044_v7 = vmul.f32 %v8738_v62, %v8730_v29 }
0x1c46   :  { %v8740_v3 = vpop.eup %8739 }
0x1c47   :  { %v3043_v5 = vmul.f32 %v8740_v3, %v8732_v14 }
0x1c49   :  { %8273 = vmatprep.mubr.msk.f32.mxu0 %vm562_vm2, %v3043_v5 }
0x1c4a   :  { %8274 = vmatmul.mubr.msk.f32.vlgmr.msra.gmra.mxu0 %vm562_vm2, %v3044_v7 }
0x1c4b   :  { %8284 = vmatpush3.msra.mxu0 %v3244_v31 }
0x1cab   :  { %v3231_v21 = vpop.xlane.xlu1 %3230 }
0x1cac   :  { %8741 = vrcp.f32 %v3231_v21  ;;  %v8903_v21 = vld [vmem:[%s10681_s4 + $0x90] sm:$0xff] }
0x1caf   :  { %v3234_v39 = vpop.xlane.xlu0 %3233  ;;  %v3331_v17 = vpop.permute.xlu1 %3330 }
0x1cb0   :  { %8743 = vrcp.f32 %v3234_v39  ;;  %v8904_v39 = vld [vmem:[%s10681_s4 + $0x88] sm:$0xff] }
0x1cb3   :  { %v3242_v11 = vpop.permute.xlu0 %3241 }
0x1cb4   :  { %8285 = vmatprep.subr.mxu0 %v3242_v11 }
0x1cb5   :  { %8286 = vmatpush3.msra.mxu0 %v3242_v11  ;;  %v8905_v11 = vld [vmem:[%s10681_s4 + $0x80] sm:$0xff] }
0x1cb6   :  { %8290 = vmatprep.subr.msk.mxu0 %vm474_vm1, %v3335_v9 }
0x1cb7   :  { %v3329_v16 = vpop.permute.xlu0 %3328 }
0x1cb9   :  { %v8742_v34 = vpop.eup %8741 }
0x1cba   :  { %v3237_v12 = vmul.f32 %v8742_v34, %v8734_v1 }
0x1cbc   :  { %8287 = vmatprep.mubr.msk.f32.mxu0 %vm562_vm2, %v3237_v12 }
0x1cbd   :  { %v8744_v15 = vpop.eup %8743 }
0x1cbe   :  { %v3238_v57 = vmul.f32 %v8744_v15, %v8736_v47 }
0x1cc0   :  { %8288 = vmatmul.mubr.msk.f32.vlgmr.msra.gmra.mxu0 %vm562_vm2, %v3238_v57 }
0x1cc1   :  { %8291 = vmatpush3.xpose.msk.msra.mxu0 %vm474_vm1, %v3335_v9  ;;  %8294 = vmatprep.mubr.msk.f32.mxu0 %vm474_vm1, %v3329_v16  ;;  %v8902_v9 = vld [vmem:[%s10681_s4 + $0x98] sm:$0xff] }
0x1cc2   :  { %8292 = vmatprep.subr.msk.mxu0 %vm474_vm1, %v3333_v10 }
0x1cc5   :  { %8293 = vmatpush3.xpose.msk.msra.mxu0 %vm474_vm1, %v3333_v10 }
0x1cc8   :  { %8295 = vmatmul.mubr.msk.f32.vlgmr.msra.gmra.mxu0 %vm474_vm1, %v3331_v17 }
0x1d0a   :  { %v9816_v18 = vpop.f32.mrf.mxu0 }
0x1d0c   :  { %v9818_v0 = vpop.f32.mrf.mxu0 }
0x1d80   :  { %v9820_v19 = vpop.f32.mrf.mxu0 }
0x1d82   :  { %v9822_v22 = vpop.f32.mrf.mxu0 }
0x1d88   :  { %v8296_v30 = vpop.f32.mrf.mxu0 }
0x1d89   :  { %v3416_v31 = vadd.f32 %v9775_v8, %v8296_v30 }
0x1d8a   :  { %v3410_v36 = vpop.f32.mrf.mxu0 }
0x1d8b   :  { %v3411_v29 = vadd.f32 %v9781_v20, %v3410_v36  ;;  %v3422_v26 = vsel %vm562_vm2, %v3416_v31, -inf }
0x1d8c   :  { %3423 = vmax.xlane.f32.xlu1 %v3422_v26 }
0x1d8d   :  { %v3419_v14 = vsel %vm562_vm2, %v3411_v29, -inf }
0x1d8e   :  { %3420 = vmax.xlane.f32.xlu0 %v3419_v14 }
0x1d9d   :  { %3443 = vrot.lane.b32.xlu1 %v9724_v44, %s9016_s14 }
0x1da1   :  { %3534 = vrot.lane.b32.xlu1 %v9742_v55, %s9017_s15 }
0x1da5   :  { %3532 = vrot.lane.b32.xlu1 %v9744_v51, %s9017_s15 }
0x1da9   :  { %3530 = vrot.lane.b32.xlu1 %v9760_v59, %s9017_s15 }
0x1e15   :  { %v3424_v41 = vpop.xlane.xlu1 %3423 }
0x1e16   :  { %v3426_v37 = vsub.f32 %v3416_v31, %v3424_v41 }
0x1e17   :  { %v3421_v13 = vpop.xlane.xlu0 %3420 }
0x1e18   :  { %v3429_v43 = vmul.f32 1.442695, %v3426_v37  ;;  %v3425_v27 = vsub.f32 %v3411_v29, %v3421_v13 }
0x1e19   :  { %v3444_v28 = vpop.permute.xlu1 %3443 }
0x1e1a   :  { %8745 = vpow2.f32 %v3429_v43  ;;  %v3427_v50 = vmul.f32 1.442695, %v3425_v27  ;;  %8297 = vmatprep.subr.mxu1 %v3444_v28 }
0x1e1b   :  { %8298 = vmatpush3.msra.mxu1 %v3444_v28  ;;  %v8906_v28 = vld [vmem:[%s10681_s4 + $0x78] sm:$0xff] }
0x1e1c   :  { %8747 = vpow2.f32 %v3427_v50 }
0x1e1d   :  { %v3535_v58 = vpop.permute.xlu1 %3534 }
0x1e27   :  { %v8746_v1 = vpop.eup %8745 }
0x1e28   :  { %v3434_v55 = vsel %vm562_vm2, %v8746_v1, 0.0 }
0x1e29   :  { %v8748_v46 = vpop.eup %8747  ;;  %3435 = vadd.xlane.f32.xlu0 %v3434_v55 }
0x1e2a   :  { %v3431_v51 = vsel %vm562_vm2, %v8748_v46, 0.0 }
0x1e2d   :  { %3432 = vadd.xlane.f32.xlu0 %v3431_v51  ;;  %v8908_v51 = vld [vmem:[%s10681_s4 + $0x68] sm:$0xff] }
0x1e43   :  { %3441 = vrot.lane.b32.xlu0 %v9729_v53, %s9016_s14 }
0x1e47   :  { %3528 = vrot.lane.b32.xlu0 %v9733_v2, %s9017_s15  ;;  %v3533_v2 = vpop.permute.xlu1 %3532 }
0x1e4b   :  { %v3531_v10 = vpop.permute.xlu1 %3530 }
0x1eb2   :  { %v3436_v59 = vpop.xlane.xlu0 %3435 }
0x1eb3   :  { %8749 = vrcp.f32 %v3436_v59  ;;  %v8909_v59 = vld [vmem:[%s10681_s4 + $0x60] sm:$0xff] }
0x1eb6   :  { %v3433_v47 = vpop.xlane.xlu0 %3432 }
0x1eb7   :  { %8751 = vrcp.f32 %v3433_v47 }
0x1eba   :  { %v3442_v54 = vpop.permute.xlu0 %3441 }
0x1ebb   :  { %8299 = vmatprep.subr.mxu1 %v3442_v54 }
0x1ebc   :  { %8300 = vmatpush3.msra.mxu1 %v3442_v54 }
0x1ebd   :  { %8304 = vmatprep.subr.msk.mxu1 %vm474_vm1, %v3535_v58 }
0x1ebe   :  { %v3529_v7 = vpop.permute.xlu0 %3528 }
0x1ec0   :  { %v8750_v61 = vpop.eup %8749 }
0x1ec1   :  { %v3440_v5 = vmul.f32 %v8750_v61, %v8746_v1 }
0x1ec4   :  { %v8752_v62 = vpop.eup %8751 }
0x1ec5   :  { %v3439_v3 = vmul.f32 %v8752_v62, %v8748_v46 }
0x1ec7   :  { %8301 = vmatprep.mubr.msk.f32.mxu1 %vm562_vm2, %v3439_v3 }
0x1ec8   :  { %8302 = vmatmul.mubr.msk.f32.vlgmr.msra.gmra.mxu1 %vm562_vm2, %v3440_v5 }
0x1ec9   :  { %8305 = vmatpush3.xpose.msk.msra.mxu1 %vm474_vm1, %v3535_v58  ;;  %8308 = vmatprep.mubr.msk.f32.mxu1 %vm474_vm1, %v3529_v7 }
0x1eca   :  { %8306 = vmatprep.subr.msk.mxu1 %vm474_vm1, %v3533_v2 }
0x1ecd   :  { %8307 = vmatpush3.xpose.msk.msra.mxu1 %vm474_vm1, %v3533_v2 }
0x1ece   :  { %8329 = vmatprep.subr.mxu1 %v8902_v9 }
0x1ed0   :  { %8309 = vmatmul.mubr.msk.f32.vlgmr.msra.gmra.mxu1 %vm474_vm1, %v3531_v10 }
0x1ed1   :  { %8330 = vmatpush3.msra.mxu1 %v8902_v9 }
0x1ed2   :  { %8331 = vmatprep.subr.mxu1 %v8903_v21 }
0x1ed3   :  { %8332 = vmatpush3.msra.mxu1 %v8903_v21 }
0x1ed4   :  { %8333 = vmatprep.subr.mxu1 %v8904_v39 }
0x1ed5   :  { %8334 = vmatpush3.msra.mxu1 %v8904_v39 }
0x1ed6   :  { %8335 = vmatprep.subr.mxu1 %v8905_v11 }
0x1ed7   :  { %8336 = vmatpush3.msra.mxu1 %v8905_v11 }
0x1ed8   :  { %8347 = vmatprep.subr.mxu1 %v9318_v35 }
0x1f88   :  { %v8303_v34 = vpop.f32.mrf.mxu1 }
0x1f8a   :  { %v3519_v12 = vpop.f32.mrf.mxu1 }
0x1f90   :  { %v8310_v15 = vpop.f32.mrf.mxu1 }
0x1f91   :  { %v3616_v57 = vadd.f32 %v9775_v8, %v8310_v15 }
0x1f92   :  { %v3610_v16 = vpop.f32.mrf.mxu1 }
0x1f93   :  { %v3611_v17 = vadd.f32 %v9781_v20, %v3610_v16  ;;  %v3622_v30 = vsel %vm562_vm2, %v3616_v57, -inf }
0x1f94   :  { %3623 = vmax.xlane.f32.xlu1 %v3622_v30 }
0x1f95   :  { %v3619_v31 = vsel %vm562_vm2, %v3611_v17, -inf }
0x1f96   :  { %3620 = vmax.xlane.f32.xlu0 %v3619_v31 }
0x1fa5   :  { %3643 = vrot.lane.b32.xlu1 %v9724_v44, %s9017_s15 }
0x1fa9   :  { %3730 = vrot.lane.b32.xlu1 %v9822_v22, %s9018_s1 }
0x1fad   :  { %3732 = vrot.lane.b32.xlu1 %v9820_v19, %s9018_s1 }
0x1fb1   :  { %3740 = vrot.lane.b32.xlu1 %v8303_v34, %s9019_s25 }
0x201d   :  { %v3624_v8 = vpop.xlane.xlu1 %3623 }
0x201e   :  { %v3626_v36 = vsub.f32 %v3616_v57, %v3624_v8 }
0x201f   :  { %v3621_v20 = vpop.xlane.xlu0 %3620 }
0x2020   :  { %v3629_v29 = vmul.f32 1.442695, %v3626_v36  ;;  %v3625_v26 = vsub.f32 %v3611_v17, %v3621_v20 }
0x2021   :  { %v3644_v14 = vpop.permute.xlu1 %3643 }
0x2022   :  { %8753 = vpow2.f32 %v3629_v29  ;;  %v3627_v41 = vmul.f32 1.442695, %v3625_v26  ;;  %8311 = vmatprep.subr.mxu0 %v3644_v14 }
0x2023   :  { %8312 = vmatpush3.msra.mxu0 %v3644_v14 }
0x2024   :  { %8755 = vpow2.f32 %v3627_v41 }
0x2025   :  { %v3731_v58 = vpop.permute.xlu1 %3730 }
0x2026   :  { %v3752_v5 = vsel %vm474_vm1, %v9818_v0, %v3731_v58  ;;  %v8910_v0 = vld [vmem:[%s10683_s6 + $0x3] ss:$0 sm:$0xff]  ;;  %v8913_v58 = vld [vmem:[%s10683_s6 + $0x4] ss:$0 sm:$0xff] }
0x2029   :  { %v3733_v61 = vpop.permute.xlu1 %3732 }
0x202a   :  { %v3753_v2 = vsel %vm474_vm1, %v9816_v18, %v3733_v61 }
0x202d   :  { %v3741_v62 = vpop.permute.xlu1 %3740 }
0x202e   :  { %v3755_v21 = vsel %vm562_vm2, %v3753_v2, %v3741_v62 }
0x202f   :  { %v8754_v44 = vpop.eup %8753 }
0x2030   :  { %v3634_v37 = vsel %vm562_vm2, %v8754_v44, 0.0 }
0x2031   :  { %v8756_v22 = vpop.eup %8755  ;;  %3635 = vadd.xlane.f32.xlu0 %v3634_v37 }
0x2032   :  { %v3631_v19 = vsel %vm562_vm2, %v8756_v22, 0.0 }
0x2035   :  { %3632 = vadd.xlane.f32.xlu0 %v3631_v19 }
0x204b   :  { %3641 = vrot.lane.b32.xlu0 %v9729_v53, %s9017_s15  ;;  %v8907_v53 = vld [vmem:[%s10681_s4 + $0x70] sm:$0xff] }
0x204f   :  { %3738 = vrot.lane.b32.xlu0 %v3519_v12, %s9019_s25 }
0x20ba   :  { %v3636_v13 = vpop.xlane.xlu0 %3635 }
0x20bb   :  { %8757 = vrcp.f32 %v3636_v13 }
0x20be   :  { %v3633_v43 = vpop.xlane.xlu0 %3632 }
0x20bf   :  { %8759 = vrcp.f32 %v3633_v43 }
0x20c2   :  { %v3642_v27 = vpop.permute.xlu0 %3641 }
0x20c3   :  { %8313 = vmatprep.subr.mxu0 %v3642_v27 }
0x20c4   :  { %8314 = vmatpush3.msra.mxu0 %v3642_v27 }
0x20c5   :  { %8318 = vmatprep.subr.mxu0 %v8906_v28 }
0x20c6   :  { %v3739_v3 = vpop.permute.xlu0 %3738 }
0x20c7   :  { %v3754_v9 = vsel %vm562_vm2, %v3752_v5, %v3739_v3 }
0x20c8   :  { %v8758_v50 = vpop.eup %8757 }
0x20c9   :  { %v3640_v46 = vmul.f32 %v8758_v50, %v8754_v44  ;;  %v8911_v50 = vld [vmem:[%s10683_s6 + $0x9] ss:$0 sm:$0xff] }
0x20cc   :  { %v8760_v1 = vpop.eup %8759 }
0x20cd   :  { %v3639_v55 = vmul.f32 %v8760_v1, %v8756_v22 }
0x20cf   :  { %8315 = vmatprep.mubr.msk.f32.mxu0 %vm562_vm2, %v3639_v55 }
0x20d0   :  { %8316 = vmatmul.mubr.msk.f32.vlgmr.msra.gmra.mxu0 %vm562_vm2, %v3640_v46  ;;  %v8912_v46 = vld [vmem:[%s10683_s6 + $0xa] ss:$0 sm:$0xff] }
0x20d1   :  { %8319 = vmatpush3.msra.mxu0 %v8906_v28 }
0x20d2   :  { %8320 = vmatprep.subr.mxu0 %v8907_v53 }
0x20d3   :  { %8321 = vmatpush3.msra.mxu0 %v8907_v53 }
0x20d4   :  { %8322 = vmatprep.subr.mxu0 %v8908_v51 }
0x20d5   :  { %8323 = vmatpush3.msra.mxu0 %v8908_v51 }
0x20d6   :  { %8324 = vmatprep.subr.mxu0 %v8909_v59 }
0x20d7   :  { %8325 = vmatpush3.msra.mxu0 %v8909_v59 }
0x20d8   :  { %8340 = vmatprep.subr.msk.mxu0 %vm474_vm1, %v9353_v4 }
0x2190   :  { %v8317_v47 = vpop.f32.mrf.mxu0 }
0x2191   :  { %3748 = vrot.lane.b32.xlu1 %v8317_v47, %s9020_s0 }
0x2192   :  { %v3719_v54 = vpop.f32.mrf.mxu0 }
0x2193   :  { %3746 = vrot.lane.b32.xlu0 %v3719_v54, %s9020_s0 }
0x2203   :  { %v3749_v7 = vpop.permute.xlu1 %3748 }
0x2204   :  { %v3757_v11 = vsel %vm1296_vm3, %v3755_v21, %v3749_v7 }
0x2205   :  { %v3747_v10 = vpop.permute.xlu0 %3746 }
0x2206   :  { %v3756_v39 = vsel %vm1296_vm3, %v3754_v9, %v3747_v10  ;;  %v9961_v9 = vld [vmem:[%s10680_s3 + $0x8] sm:$0xff] }
0x2207   :  { %8326 = vmatprep.mubr.msk.f32.mxu0 %vm44_vm0, %v3756_v39  ;;  %v9967_v39 = vld [vmem:[%s10680_s3] sm:$0xff] }
0x2208   :  { %8327 = vmatmul.mubr.msk.f32.vlgmr.msra.gmra.mxu0 %vm44_vm0, %v3757_v11 }
0x2209   :  { %8341 = vmatpush3.xpose.msk.msra.mxu0 %vm474_vm1, %v9353_v4 }
0x220a   :  { %8342 = vmatprep.subr.msk.mxu0 %vm474_vm1, %v9149_v23 }
0x220d   :  { %8343 = vmatpush3.xpose.msk.msra.mxu0 %vm474_vm1, %v9149_v23 }
0x220e   :  { %8361 = vmatprep.subr.mxu0 %v9468_v45 }
0x22c8   :  { %v8328_v18 = vpop.f32.mrf.mxu0 }
0x22c9   :  { %v3836_v34 = vadd.f32 %v8910_v0, %v8328_v18 }
0x22ca   :  { %v3830_v12 = vpop.f32.mrf.mxu0 }
0x22cb   :  { %v3840_v15 = vadd.f32 %v3836_v34, %v9697_v40  ;;  %v3831_v57 = vadd.f32 %v8910_v0, %v3830_v12 }
0x22cd   :  { %v3839_v16 = vadd.f32 %v3831_v57, %v9695_v63  ;;  %v3844_v17 = vsel %vm44_vm0, %v3840_v15, 0.0 }
0x22ce   :  { %3845 = vadd.xlane.f32.xlu1 %v3844_v17 }
0x22cf   :  { %v3841_v30 = vsel %vm44_vm0, %v3839_v16, 0.0 }
0x22d0   :  { %3842 = vadd.xlane.f32.xlu0 %v3841_v30 }
0x2357   :  { %v3846_v31 = vpop.xlane.xlu1 %3845 }
0x2358   :  { %v3848_v8 = vmul.f32 0.03125, %v3846_v31 }
0x2359   :  { %v3843_v36 = vpop.xlane.xlu0 %3842 }
0x235a   :  { %v3847_v20 = vmul.f32 0.03125, %v3843_v36  ;;  %v3850_v29 = vsub.f32 %v3840_v15, %v3848_v8 }
0x235c   :  { %v3849_v26 = vsub.f32 %v3839_v16, %v3847_v20  ;;  %v3852_v44 = vmul.f32 %v3850_v29, %v3850_v29 }
0x235e   :  { %v3851_v14 = vmul.f32 %v3849_v26, %v3849_v26  ;;  %v3856_v40 = vsel %vm44_vm0, %v3852_v44, 0.0 }
0x2360   :  { %v3853_v41 = vsel %vm44_vm0, %v3851_v14, 0.0 }
0x2361   :  { %3854 = vadd.xlane.f32.xlu0 %v3853_v41 }
0x2365   :  { %3857 = vadd.xlane.f32.xlu0 %v3856_v40 }
0x23ea   :  { %v3855_v63 = vpop.xlane.xlu0 %3854 }
0x23eb   :  { %v3859_v37 = vmul.f32 0.03125, %v3855_v63 }
0x23ed   :  { %v3861_v22 = vadd.f32 1e-05, %v3859_v37 }
0x23ee   :  { %v3858_v19 = vpop.xlane.xlu0 %3857 }
0x23ef   :  { %8761 = vrsqrt.f32 %v3861_v22  ;;  %v3860_v13 = vmul.f32 0.03125, %v3858_v19 }
0x23f1   :  { %v3862_v43 = vadd.f32 1e-05, %v3860_v13 }
0x23f3   :  { %8763 = vrsqrt.f32 %v3862_v43 }
0x23fc   :  { %v8762_v27 = vpop.eup %8761 }
0x23fd   :  { %v3865_v28 = vmul.f32 %v8762_v27, %v3849_v26 }
0x23ff   :  { %v3867_v1 = vmul.f32 %v8911_v50, %v3865_v28 }
0x2400   :  { %v8764_v55 = vpop.eup %8763 }
0x2401   :  { %v9929_v53 = vadd.f32 %v8912_v46, %v3867_v1  ;;  %v3866_v51 = vmul.f32 %v8764_v55, %v3850_v29 }
0x2403   :  { %8337 = vmatprep.mubr.msk.f32.mxu1 %vm44_vm0, %v9929_v53  ;;  %v3868_v59 = vmul.f32 %v8911_v50, %v3866_v51 }
0x2405   :  { %v9933_v47 = vadd.f32 %v8912_v46, %v3868_v59 }
0x2407   :  { %8338 = vmatmul.mubr.msk.f32.vlgmr.msra.gmra.mxu1 %vm44_vm0, %v9933_v47 }
0x2408   :  { %8348 = vmatpush3.msra.mxu1 %v9318_v35 }
0x2409   :  { %8349 = vmatprep.subr.mxu1 %v9164_v33 }
0x240a   :  { %8350 = vmatpush3.msra.mxu1 %v9164_v33 }
0x240b   :  { %8354 = vmatprep.subr.msk.mxu1 %vm474_vm1, %v9430_v42 }
0x24c7   :  { %v8339_v54 = vpop.f32.mrf.mxu1 }
0x24c8   :  { %v3949_v61 = vadd.f32 %v8913_v58, %v8339_v54 }
0x24c9   :  { %v3943_v62 = vpop.f32.mrf.mxu1 }
0x24ca   :  { %v3944_v3 = vadd.f32 %v8913_v58, %v3943_v62  ;;  %v9947_v7 = vmul.f32 0.35355338, %v3949_v61 }
0x24cc   :  { %v9945_v5 = vmul.f32 0.35355338, %v3944_v3 }
0x24ce   :  { %8344 = vmatprep.mubr.msk.f32.mxu0 %vm474_vm1, %v9945_v5 }
0x24cf   :  { %8345 = vmatmul.mubr.msk.f32.vlgmr.msra.gmra.mxu0 %vm474_vm1, %v9947_v7 }
0x24d0   :  { %8362 = vmatpush3.msra.mxu0 %v9468_v45 }
0x24d1   :  { %8363 = vmatprep.subr.mxu0 %v9478_v49 }
0x24d2   :  { %8364 = vmatpush3.msra.mxu0 %v9478_v49 }
0x24d3   :  { %8368 = vmatprep.subr.msk.mxu0 %vm474_vm1, %v9481_v52 }
0x258f   :  { %v8346_v2 = vpop.f32.mrf.mxu0 }
0x2590   :  { %v4032_v10 = vadd.f32 %v9961_v9, %v8346_v2 }
0x2591   :  { %v4026_v21 = vpop.f32.mrf.mxu0 }
0x2592   :  { %v4027_v11 = vadd.f32 %v9967_v39, %v4026_v21  ;;  %v4038_v18 = vsel %vm562_vm2, %v4032_v10, -inf }
0x2593   :  { %4039 = vmax.xlane.f32.xlu0 %v4038_v18 }
0x2594   :  { %v4035_v0 = vsel %vm562_vm2, %v4027_v11, -inf }
0x2595   :  { %4036 = vmax.xlane.f32.xlu1 %v4035_v0 }
0x261c   :  { %v4040_v34 = vpop.xlane.xlu0 %4039 }
0x261d   :  { %v4042_v12 = vsub.f32 %v4032_v10, %v4040_v34 }
0x261e   :  { %v4037_v15 = vpop.xlane.xlu1 %4036 }
0x261f   :  { %v4045_v57 = vmul.f32 1.442695, %v4042_v12  ;;  %v4041_v16 = vsub.f32 %v4027_v11, %v4037_v15  ;;  %v10025_v15 = vld [vmem:[%s10681_s4 + $0xf8] sm:$0xff] }
0x2621   :  { %8765 = vpow2.f32 %v4045_v57  ;;  %v4043_v17 = vmul.f32 1.442695, %v4041_v16 }
0x2623   :  { %8767 = vpow2.f32 %v4043_v17 }
0x262e   :  { %v8766_v30 = vpop.eup %8765 }
0x262f   :  { %v4050_v31 = vsel %vm562_vm2, %v8766_v30, 0.0 }
0x2630   :  { %v8768_v8 = vpop.eup %8767  ;;  %4051 = vadd.xlane.f32.xlu0 %v4050_v31 }
0x2631   :  { %v4047_v36 = vsel %vm562_vm2, %v8768_v8, 0.0 }
0x2632   :  { %4048 = vadd.xlane.f32.xlu1 %v4047_v36 }
0x2643   :  { %4138 = vrot.lane.b32.xlu1 %v9945_v5, %s9015_s22 }
0x2646   :  { %4140 = vrot.lane.b32.xlu0 %v9947_v7, %s9015_s22 }
0x26b9   :  { %v4052_v20 = vpop.xlane.xlu0 %4051 }
0x26ba   :  { %8769 = vrcp.f32 %v4052_v20 }
0x26bb   :  { %v4049_v29 = vpop.xlane.xlu1 %4048 }
0x26bc   :  { %8771 = vrcp.f32 %v4049_v29 }
0x26bd   :  { %v4141_v63 = vpop.permute.xlu0 %4140 }
0x26bf   :  { %v4139_v40 = vpop.permute.xlu1 %4138 }
0x26c7   :  { %v8770_v26 = vpop.eup %8769 }
0x26c8   :  { %v4056_v44 = vmul.f32 %v8770_v26, %v8766_v30 }
0x26c9   :  { %v8772_v14 = vpop.eup %8771 }
0x26ca   :  { %v4055_v41 = vmul.f32 %v8772_v14, %v8768_v8 }
0x26cc   :  { %8351 = vmatprep.mubr.msk.f32.mxu1 %vm562_vm2, %v4055_v41 }
0x26cd   :  { %8352 = vmatmul.mubr.msk.f32.vlgmr.msra.gmra.mxu1 %vm562_vm2, %v4056_v44 }
0x26ce   :  { %8355 = vmatpush3.xpose.msk.msra.mxu1 %vm474_vm1, %v9430_v42  ;;  %8358 = vmatprep.mubr.msk.f32.mxu1 %vm474_vm1, %v4139_v40 }
0x26cf   :  { %8356 = vmatprep.subr.msk.mxu1 %vm474_vm1, %v9442_v32 }
0x26d2   :  { %8357 = vmatpush3.xpose.msk.msra.mxu1 %vm474_vm1, %v9442_v32 }
0x26d3   :  { %8375 = vmatprep.subr.mxu1 %v9514_v56 }
0x26d5   :  { %8359 = vmatmul.mubr.msk.f32.vlgmr.msra.gmra.mxu1 %vm474_vm1, %v4141_v63 }
0x26d6   :  { %8376 = vmatpush3.msra.mxu1 %v9514_v56 }
0x26d7   :  { %8377 = vmatprep.subr.mxu1 %v9524_v24 }
0x26d8   :  { %8378 = vmatpush3.msra.mxu1 %v9524_v24 }
0x26d9   :  { %8382 = vmatprep.subr.msk.mxu1 %vm474_vm1, %v9527_v25 }
0x278d   :  { %v9994_v37 = vpop.f32.mrf.mxu1 }
0x278f   :  { %v9996_v22 = vpop.f32.mrf.mxu1 }
0x2795   :  { %v8360_v19 = vpop.f32.mrf.mxu1 }
0x2796   :  { %v4218_v13 = vadd.f32 %v9961_v9, %v8360_v19 }
0x2797   :  { %v4212_v43 = vpop.f32.mrf.mxu1 }
0x2798   :  { %v4213_v27 = vadd.f32 %v9967_v39, %v4212_v43  ;;  %v4224_v28 = vsel %vm562_vm2, %v4218_v13, -inf }
0x2799   :  { %4225 = vmax.xlane.f32.xlu0 %v4224_v28 }
0x279a   :  { %v4221_v50 = vsel %vm562_vm2, %v4213_v27, -inf }
0x279b   :  { %4222 = vmax.xlane.f32.xlu1 %v4221_v50 }
0x2822   :  { %v4226_v1 = vpop.xlane.xlu0 %4225 }
0x2823   :  { %v4228_v55 = vsub.f32 %v4218_v13, %v4226_v1 }
0x2824   :  { %v4223_v46 = vpop.xlane.xlu1 %4222 }
0x2825   :  { %v4231_v51 = vmul.f32 1.442695, %v4228_v55  ;;  %v4227_v59 = vsub.f32 %v4213_v27, %v4223_v46 }
0x2827   :  { %8773 = vpow2.f32 %v4231_v51  ;;  %v4229_v54 = vmul.f32 1.442695, %v4227_v59  ;;  %v8918_v59 = vld [vmem:[%s10682_s5 + $0x10] sm:$0xff] }
0x2829   :  { %8775 = vpow2.f32 %v4229_v54  ;;  %v8919_v54 = vld [vmem:[%s10682_s5 + $0x8] sm:$0xff] }
0x2834   :  { %v8774_v58 = vpop.eup %8773 }
0x2835   :  { %v4236_v61 = vsel %vm562_vm2, %v8774_v58, 0.0 }
0x2836   :  { %v8776_v62 = vpop.eup %8775  ;;  %4237 = vadd.xlane.f32.xlu0 %v4236_v61  ;;  %v10067_v61 = vld [vmem:[%s10681_s4 + $0x18] sm:$0xff] }
0x2837   :  { %v4233_v3 = vsel %vm562_vm2, %v8776_v62, 0.0 }
0x2838   :  { %4234 = vadd.xlane.f32.xlu1 %v4233_v3 }
0x2849   :  { %4324 = vrot.lane.b32.xlu1 %v9945_v5, %s9016_s14 }
0x284c   :  { %4326 = vrot.lane.b32.xlu0 %v9947_v7, %s9016_s14 }
0x28bf   :  { %v4238_v2 = vpop.xlane.xlu0 %4237 }
0x28c0   :  { %8777 = vrcp.f32 %v4238_v2 }
0x28c1   :  { %v4235_v10 = vpop.xlane.xlu1 %4234 }
0x28c2   :  { %8779 = vrcp.f32 %v4235_v10 }
0x28c3   :  { %v4327_v12 = vpop.permute.xlu0 %4326 }
0x28c5   :  { %v4325_v34 = vpop.permute.xlu1 %4324 }
0x28cd   :  { %v8778_v21 = vpop.eup %8777 }
0x28ce   :  { %v4242_v0 = vmul.f32 %v8778_v21, %v8774_v58  ;;  %v8920_v58 = vld [vmem:[%s10682_s5] sm:$0xff] }
0x28cf   :  { %v8780_v11 = vpop.eup %8779 }
0x28d0   :  { %v4241_v18 = vmul.f32 %v8780_v11, %v8776_v62 }
0x28d2   :  { %8365 = vmatprep.mubr.msk.f32.mxu0 %vm562_vm2, %v4241_v18 }
0x28d3   :  { %8366 = vmatmul.mubr.msk.f32.vlgmr.msra.gmra.mxu0 %vm562_vm2, %v4242_v0 }
0x28d4   :  { %8369 = vmatpush3.xpose.msk.msra.mxu0 %vm474_vm1, %v9481_v52  ;;  %8372 = vmatprep.mubr.msk.f32.mxu0 %vm474_vm1, %v4325_v34 }
0x28d5   :  { %8370 = vmatprep.subr.msk.mxu0 %vm474_vm1, %v9488_v60 }
0x28d8   :  { %8371 = vmatpush3.xpose.msk.msra.mxu0 %vm474_vm1, %v9488_v60 }
0x28d9   :  { %8389 = vmatprep.subr.mxu0 %v9555_v48 }
0x28db   :  { %8373 = vmatmul.mubr.msk.f32.vlgmr.msra.gmra.mxu0 %vm474_vm1, %v4327_v12 }
0x28dc   :  { %8390 = vmatpush3.msra.mxu0 %v9555_v48 }
0x28dd   :  { %8391 = vmatprep.subr.mxu0 %v9564_v6 }
0x28de   :  { %8392 = vmatpush3.msra.mxu0 %v9564_v6 }
0x28df   :  { %8396 = vmatprep.subr.mxu0 %v10025_v15 }
0x2993   :  { %v10028_v57 = vpop.f32.mrf.mxu0 }
0x2995   :  { %v10030_v16 = vpop.f32.mrf.mxu0 }
0x299b   :  { %v8374_v17 = vpop.f32.mrf.mxu0 }
0x299c   :  { %v4404_v30 = vadd.f32 %v9961_v9, %v8374_v17 }
0x299d   :  { %v4398_v31 = vpop.f32.mrf.mxu0 }
0x299e   :  { %v4399_v8 = vadd.f32 %v9967_v39, %v4398_v31  ;;  %v4410_v36 = vsel %vm562_vm2, %v4404_v30, -inf }
0x299f   :  { %4411 = vmax.xlane.f32.xlu0 %v4410_v36 }
0x29a0   :  { %v4407_v20 = vsel %vm562_vm2, %v4399_v8, -inf }
0x29a1   :  { %4408 = vmax.xlane.f32.xlu1 %v4407_v20 }
0x2a28   :  { %v4412_v29 = vpop.xlane.xlu0 %4411 }
0x2a29   :  { %v4414_v26 = vsub.f32 %v4404_v30, %v4412_v29 }
0x2a2a   :  { %v4409_v14 = vpop.xlane.xlu1 %4408 }
0x2a2b   :  { %v4417_v41 = vmul.f32 1.442695, %v4414_v26  ;;  %v4413_v44 = vsub.f32 %v4399_v8, %v4409_v14 }
0x2a2d   :  { %8781 = vpow2.f32 %v4417_v41  ;;  %v4415_v40 = vmul.f32 1.442695, %v4413_v44 }
0x2a2f   :  { %8783 = vpow2.f32 %v4415_v40 }
0x2a3a   :  { %v8782_v63 = vpop.eup %8781 }
0x2a3b   :  { %v4422_v19 = vsel %vm562_vm2, %v8782_v63, 0.0 }
0x2a3c   :  { %v8784_v13 = vpop.eup %8783  ;;  %4423 = vadd.xlane.f32.xlu0 %v4422_v19 }
0x2a3d   :  { %v4419_v43 = vsel %vm562_vm2, %v8784_v13, 0.0 }
0x2a3e   :  { %4420 = vadd.xlane.f32.xlu1 %v4419_v43 }
0x2a4f   :  { %4510 = vrot.lane.b32.xlu1 %v9945_v5, %s9017_s15  ;;  %v8917_v5 = vld [vmem:[%s10682_s5 + $0x18] sm:$0xff] }
0x2a52   :  { %4512 = vrot.lane.b32.xlu0 %v9947_v7, %s9017_s15 }
0x2ac5   :  { %v4424_v27 = vpop.xlane.xlu0 %4423 }
0x2ac6   :  { %8785 = vrcp.f32 %v4424_v27 }
0x2ac7   :  { %v4421_v28 = vpop.xlane.xlu1 %4420 }
0x2ac8   :  { %8787 = vrcp.f32 %v4421_v28 }
0x2ac9   :  { %v4513_v7 = vpop.permute.xlu0 %4512 }
0x2acb   :  { %v4511_v51 = vpop.permute.xlu1 %4510 }
0x2ad3   :  { %v8786_v50 = vpop.eup %8785 }
0x2ad4   :  { %v4428_v46 = vmul.f32 %v8786_v50, %v8782_v63  ;;  %v8924_v63 = vld [vmem:[%s10681_s4 + $0xe0] sm:$0xff] }
0x2ad5   :  { %v8788_v1 = vpop.eup %8787 }
0x2ad6   :  { %v4427_v55 = vmul.f32 %v8788_v1, %v8784_v13 }
0x2ad8   :  { %8379 = vmatprep.mubr.msk.f32.mxu1 %vm562_vm2, %v4427_v55 }
0x2ad9   :  { %8380 = vmatmul.mubr.msk.f32.vlgmr.msra.gmra.mxu1 %vm562_vm2, %v4428_v46 }
0x2ada   :  { %8383 = vmatpush3.xpose.msk.msra.mxu1 %vm474_vm1, %v9527_v25  ;;  %8386 = vmatprep.mubr.msk.f32.mxu1 %vm474_vm1, %v4511_v51 }
0x2adb   :  { %8384 = vmatprep.subr.msk.mxu1 %vm474_vm1, %v9534_v38 }
0x2ade   :  { %8385 = vmatpush3.xpose.msk.msra.mxu1 %vm474_vm1, %v9534_v38 }
0x2adf   :  { %8407 = vmatprep.subr.mxu1 %v8917_v5 }
0x2ae1   :  { %8387 = vmatmul.mubr.msk.f32.vlgmr.msra.gmra.mxu1 %vm474_vm1, %v4513_v7 }
0x2ae2   :  { %8408 = vmatpush3.msra.mxu1 %v8917_v5 }
0x2ae3   :  { %8409 = vmatprep.subr.mxu1 %v8918_v59 }
0x2ae4   :  { %8410 = vmatpush3.msra.mxu1 %v8918_v59 }
0x2ae5   :  { %8411 = vmatprep.subr.mxu1 %v8919_v54 }
0x2ae6   :  { %8412 = vmatpush3.msra.mxu1 %v8919_v54 }
0x2ae7   :  { %8413 = vmatprep.subr.mxu1 %v8920_v58 }
0x2ae8   :  { %8414 = vmatpush3.msra.mxu1 %v8920_v58  ;;  %v8928_v58 = vld [vmem:[%s10681_s4 + $0x120] sm:$0xff] }
0x2ae9   :  { %8437 = vmatprep.subr.mxu1 %v10067_v61 }
0x2b99   :  { %v8381_v62 = vpop.f32.mrf.mxu1 }
0x2b9b   :  { %v4501_v3 = vpop.f32.mrf.mxu1 }
0x2ba1   :  { %v8388_v2 = vpop.f32.mrf.mxu1 }
0x2ba2   :  { %v4590_v10 = vadd.f32 %v9961_v9, %v8388_v2  ;;  %v8931_v2 = vld [vmem:[%s10681_s4 + $0x108] sm:$0xff] }
0x2ba3   :  { %v4584_v21 = vpop.f32.mrf.mxu1 }
0x2ba4   :  { %v4585_v11 = vadd.f32 %v9967_v39, %v4584_v21  ;;  %v4596_v18 = vsel %vm562_vm2, %v4590_v10, -inf  ;;  %v10133_v21 = vld [vmem:[%s10681_s4 + $0x58] sm:$0xff] }
0x2ba5   :  { %4597 = vmax.xlane.f32.xlu0 %v4596_v18  ;;  %v8934_v18 = vld [vmem:[%s10683_s6 + $0x7] ss:$0 sm:$0xff] }
0x2ba6   :  { %v4593_v0 = vsel %vm562_vm2, %v4585_v11, -inf }
0x2ba7   :  { %4594 = vmax.xlane.f32.xlu1 %v4593_v0 }
0x2c2e   :  { %v4598_v34 = vpop.xlane.xlu0 %4597 }
0x2c2f   :  { %v4600_v12 = vsub.f32 %v4590_v10, %v4598_v34  ;;  %v8932_v10 = vld [vmem:[%s10681_s4 + $0x100] sm:$0xff] }
0x2c30   :  { %v4595_v17 = vpop.xlane.xlu1 %4594 }
0x2c31   :  { %v4603_v30 = vmul.f32 1.442695, %v4600_v12  ;;  %v4599_v31 = vsub.f32 %v4585_v11, %v4595_v17 }
0x2c33   :  { %8789 = vpow2.f32 %v4603_v30  ;;  %v4601_v8 = vmul.f32 1.442695, %v4599_v31 }
0x2c35   :  { %8791 = vpow2.f32 %v4601_v8 }
0x2c40   :  { %v8790_v36 = vpop.eup %8789 }
0x2c41   :  { %v4608_v9 = vsel %vm562_vm2, %v8790_v36, 0.0 }
0x2c42   :  { %v8792_v20 = vpop.eup %8791  ;;  %4609 = vadd.xlane.f32.xlu0 %v4608_v9 }
0x2c43   :  { %v4605_v39 = vsel %vm562_vm2, %v8792_v20, 0.0 }
0x2c44   :  { %4606 = vadd.xlane.f32.xlu1 %v4605_v39 }
0x2c55   :  { %4698 = vrot.lane.b32.xlu1 %v10030_v16, %s9018_s1  ;;  %v8923_v16 = vld [vmem:[%s10681_s4 + $0xe8] sm:$0xff] }
0x2c58   :  { %4700 = vrot.lane.b32.xlu0 %v10028_v57, %s9018_s1  ;;  %v8922_v57 = vld [vmem:[%s10681_s4 + $0xf0] sm:$0xff] }
0x2c59   :  { %4706 = vrot.lane.b32.xlu1 %v4501_v3, %s9019_s25  ;;  %v8930_v3 = vld [vmem:[%s10681_s4 + $0x110] sm:$0xff] }
0x2c5d   :  { %4708 = vrot.lane.b32.xlu1 %v8381_v62, %s9019_s25  ;;  %v8929_v62 = vld [vmem:[%s10681_s4 + $0x118] sm:$0xff] }
0x2ccb   :  { %v4610_v29 = vpop.xlane.xlu0 %4609 }
0x2ccc   :  { %8793 = vrcp.f32 %v4610_v29 }
0x2ccd   :  { %v4607_v26 = vpop.xlane.xlu1 %4606 }
0x2cce   :  { %8795 = vrcp.f32 %v4607_v26 }
0x2ccf   :  { %v4701_v50 = vpop.permute.xlu0 %4700 }
0x2cd0   :  { %v4721_v46 = vsel %vm474_vm1, %v9994_v37, %v4701_v50  ;;  %v8927_v37 = vld [vmem:[%s10681_s4 + $0x128] sm:$0xff] }
0x2cd1   :  { %v4699_v43 = vpop.permute.xlu1 %4698 }
0x2cd2   :  { %v4720_v1 = vsel %vm474_vm1, %v9996_v22, %v4699_v43  ;;  %v8926_v22 = vld [vmem:[%s10681_s4 + $0x130] sm:$0xff]  ;;  %v8935_v43 = vld [vmem:[%s10683_s6 + $0xb] ss:$0 sm:$0xff] }
0x2cd5   :  { %v4707_v27 = vpop.permute.xlu1 %4706 }
0x2cd6   :  { %v4722_v51 = vsel %vm562_vm2, %v4720_v1, %v4707_v27  ;;  %v8936_v1 = vld [vmem:[%s10683_s6 + $0xc] ss:$0 sm:$0xff] }
0x2cd9   :  { %v8794_v14 = vpop.eup %8793  ;;  %v4709_v28 = vpop.permute.xlu1 %4708 }
0x2cda   :  { %v4614_v40 = vmul.f32 %v8794_v14, %v8790_v36  ;;  %v4723_v7 = vsel %vm562_vm2, %v4721_v46, %v4709_v28 }
0x2cdb   :  { %v8796_v41 = vpop.eup %8795 }
0x2cdc   :  { %v4613_v44 = vmul.f32 %v8796_v41, %v8792_v20 }
0x2cde   :  { %8393 = vmatprep.mubr.msk.f32.mxu0 %vm562_vm2, %v4613_v44 }
0x2cdf   :  { %8394 = vmatmul.mubr.msk.f32.vlgmr.msra.gmra.mxu0 %vm562_vm2, %v4614_v40 }
0x2ce0   :  { %8397 = vmatpush3.msra.mxu0 %v10025_v15  ;;  %v8925_v15 = vld [vmem:[%s10681_s4 + $0x138] sm:$0xff] }
0x2ce1   :  { %8398 = vmatprep.subr.mxu0 %v8922_v57 }
0x2ce2   :  { %8399 = vmatpush3.msra.mxu0 %v8922_v57 }
0x2ce3   :  { %8400 = vmatprep.subr.mxu0 %v8923_v16 }
0x2ce4   :  { %8401 = vmatpush3.msra.mxu0 %v8923_v16 }
0x2ce5   :  { %8402 = vmatprep.subr.mxu0 %v8924_v63 }
0x2ce6   :  { %8403 = vmatpush3.msra.mxu0 %v8924_v63 }
0x2ce7   :  { %8418 = vmatprep.subr.mxu0 %v8925_v15 }
0x2d9f   :  { %v8395_v19 = vpop.f32.mrf.mxu0 }
0x2da0   :  { %4716 = vrot.lane.b32.xlu1 %v8395_v19, %s9020_s0 }
0x2da1   :  { %v4687_v13 = vpop.f32.mrf.mxu0 }
0x2da2   :  { %4714 = vrot.lane.b32.xlu0 %v4687_v13, %s9020_s0 }
0x2e12   :  { %v4717_v55 = vpop.permute.xlu1 %4716 }
0x2e13   :  { %v4725_v54 = vsel %vm1296_vm3, %v4723_v7, %v4717_v55  ;;  %v8938_v7 = vld [vmem:[%s10681_s4 + $0x8] sm:$0xff] }
0x2e14   :  { %v4715_v5 = vpop.permute.xlu0 %4714 }
0x2e15   :  { %v4724_v59 = vsel %vm1296_vm3, %v4722_v51, %v4715_v5  ;;  %v8937_v5 = vld [vmem:[%s10681_s4 + $0x10] sm:$0xff] }
0x2e16   :  { %8404 = vmatprep.mubr.msk.f32.mxu0 %vm44_vm0, %v4724_v59  ;;  %v8939_v59 = vld [vmem:[%s10681_s4] sm:$0xff] }
0x2e17   :  { %8405 = vmatmul.mubr.msk.f32.vlgmr.msra.gmra.mxu0 %vm44_vm0, %v4725_v54 }
0x2e18   :  { %8419 = vmatpush3.msra.mxu0 %v8925_v15 }
0x2e19   :  { %8420 = vmatprep.subr.mxu0 %v8926_v22 }
0x2e1a   :  { %8421 = vmatpush3.msra.mxu0 %v8926_v22  ;;  %v8941_v22 = vld [vmem:[%s10683_s6 + $0x11] ss:$0 sm:$0xff] }
0x2e1b   :  { %8422 = vmatprep.subr.mxu0 %v8927_v37 }
0x2e1c   :  { %8423 = vmatpush3.msra.mxu0 %v8927_v37 }
0x2e1d   :  { %8424 = vmatprep.subr.mxu0 %v8928_v58 }
0x2e1e   :  { %8425 = vmatpush3.msra.mxu0 %v8928_v58 }
0x2e1f   :  { %8426 = vmatprep.subr.mxu0 %v8929_v62 }
0x2e20   :  { %8427 = vmatpush3.msra.mxu0 %v8929_v62 }
0x2e21   :  { %8428 = vmatprep.subr.mxu0 %v8930_v3 }
0x2e22   :  { %8429 = vmatpush3.msra.mxu0 %v8930_v3 }
0x2e23   :  { %8430 = vmatprep.subr.mxu0 %v8931_v2 }
0x2e24   :  { %8431 = vmatpush3.msra.mxu0 %v8931_v2 }
0x2e25   :  { %8432 = vmatprep.subr.mxu0 %v8932_v10 }
0x2e26   :  { %8433 = vmatpush3.msra.mxu0 %v8932_v10  ;;  %v8942_v10 = vld [vmem:[%s10681_s4 + $0x50] sm:$0xff] }
0x2e27   :  { %8459 = vmatprep.subr.mxu0 %v10133_v21 }
0x2ed7   :  { %v8406_v11 = vpop.f32.mrf.mxu0 }
0x2ed8   :  { %v4804_v0 = vadd.f32 %v8934_v18, %v8406_v11  ;;  %v8943_v11 = vld [vmem:[%s10681_s4 + $0x48] sm:$0xff] }
0x2ed9   :  { %v4798_v34 = vpop.f32.mrf.mxu0 }
0x2eda   :  { %v4808_v12 = vadd.f32 %v4804_v0, %v9933_v47  ;;  %v4799_v17 = vadd.f32 %v8934_v18, %v4798_v34  ;;  %v8944_v18 = vld [vmem:[%s10681_s4 + $0x40] sm:$0xff] }
0x2edc   :  { %v4807_v30 = vadd.f32 %v4799_v17, %v9929_v53  ;;  %v4812_v31 = vsel %vm44_vm0, %v4808_v12, 0.0 }
0x2edd   :  { %4813 = vadd.xlane.f32.xlu1 %v4812_v31 }
0x2ede   :  { %v4809_v8 = vsel %vm44_vm0, %v4807_v30, 0.0 }
0x2edf   :  { %4810 = vadd.xlane.f32.xlu0 %v4809_v8 }
0x2f66   :  { %v4814_v36 = vpop.xlane.xlu1 %4813 }
0x2f67   :  { %v4816_v9 = vmul.f32 0.03125, %v4814_v36 }
0x2f68   :  { %v4811_v20 = vpop.xlane.xlu0 %4810 }
0x2f69   :  { %v4815_v39 = vmul.f32 0.03125, %v4811_v20  ;;  %v4818_v29 = vsub.f32 %v4808_v12, %v4816_v9 }
0x2f6b   :  { %v4817_v26 = vsub.f32 %v4807_v30, %v4815_v39  ;;  %v4820_v44 = vmul.f32 %v4818_v29, %v4818_v29 }
0x2f6d   :  { %v4819_v14 = vmul.f32 %v4817_v26, %v4817_v26  ;;  %v4824_v47 = vsel %vm44_vm0, %v4820_v44, 0.0 }
0x2f6f   :  { %v4821_v41 = vsel %vm44_vm0, %v4819_v14, 0.0 }
0x2f70   :  { %4822 = vadd.xlane.f32.xlu0 %v4821_v41 }
0x2f74   :  { %4825 = vadd.xlane.f32.xlu0 %v4824_v47 }
0x2ff9   :  { %v4823_v53 = vpop.xlane.xlu0 %4822 }
0x2ffa   :  { %v4827_v40 = vmul.f32 0.03125, %v4823_v53 }
0x2ffc   :  { %v4829_v57 = vadd.f32 1e-05, %v4827_v40 }
0x2ffd   :  { %v4826_v16 = vpop.xlane.xlu0 %4825 }
0x2ffe   :  { %8797 = vrsqrt.f32 %v4829_v57  ;;  %v4828_v63 = vmul.f32 0.03125, %v4826_v16 }
0x3000   :  { %v4830_v15 = vadd.f32 1e-05, %v4828_v63 }
0x3002   :  { %8799 = vrsqrt.f32 %v4830_v15 }
0x300b   :  { %v8798_v19 = vpop.eup %8797 }
0x300c   :  { %v4833_v13 = vmul.f32 %v8798_v19, %v4817_v26 }
0x300e   :  { %v4835_v27 = vmul.f32 %v8935_v43, %v4833_v13 }
0x300f   :  { %v8800_v28 = vpop.eup %8799 }
0x3010   :  { %v4834_v50 = vmul.f32 %v8800_v28, %v4818_v29  ;;  %v4837_v55 = vadd.f32 %v8936_v1, %v4835_v27 }
0x3012   :  { %8415 = vmatprep.mubr.msk.f32.mxu1 %vm44_vm0, %v4837_v55  ;;  %v4836_v46 = vmul.f32 %v8935_v43, %v4834_v50  ;;  %v8946_v50 = vld [vmem:[%s10683_s6 + $0xd] ss:$0 sm:$0xff] }
0x3014   :  { %v4838_v51 = vadd.f32 %v8936_v1, %v4836_v46  ;;  %v8947_v46 = vld [vmem:[%s10683_s6 + $0xe] ss:$0 sm:$0xff] }
0x3016   :  { %8416 = vmatmul.mubr.msk.f32.vlgmr.msra.gmra.mxu1 %vm44_vm0, %v4838_v51 }
0x3017   :  { %8438 = vmatpush3.msra.mxu1 %v10067_v61  ;;  %v10166_v61 = vld [vmem:[%s10681_s4 + $0x38] sm:$0xff] }
0x3018   :  { %8439 = vmatprep.subr.mxu1 %v8937_v5 }
0x3019   :  { %8440 = vmatpush3.msra.mxu1 %v8937_v5 }
0x301a   :  { %8441 = vmatprep.subr.mxu1 %v8938_v7 }
0x301b   :  { %8442 = vmatpush3.msra.mxu1 %v8938_v7  ;;  %v8948_v7 = vld [vmem:[%s10681_s4 + $0x30] sm:$0xff] }
0x301c   :  { %8443 = vmatprep.subr.mxu1 %v8939_v59 }
0x301d   :  { %8444 = vmatpush3.msra.mxu1 %v8939_v59  ;;  %v8949_v59 = vld [vmem:[%s10681_s4 + $0x28] sm:$0xff] }
0x301e   :  { %8448 = vmatprep.subr.mxu1 %v10166_v61 }
0x30d6   :  { %v8417_v54 = vpop.f32.mrf.mxu1 }
0x30d7   :  { %v4917_v37 = vadd.f32 %v8941_v22, %v8417_v54  ;;  %v8950_v54 = vld [vmem:[%s10681_s4 + $0x20] sm:$0xff] }
0x30d8   :  { %v4911_v58 = vpop.f32.mrf.mxu1 }
0x30d9   :  { %v4912_v62 = vadd.f32 %v8941_v22, %v4911_v58  ;;  %v4921_v2 = vmax.f32 %v4917_v37, 0.0  ;;  %v8951_v37 = vld [vmem:[%s10683_s6 + $0x2] ss:$0 sm:$0xff] }
0x30db   :  { %v4920_v3 = vmax.f32 %v4912_v62, 0.0 }
0x30dd   :  { %8434 = vmatprep.mubr.msk.f32.mxu0 %vm2579_vm4, %v4920_v3 }
0x30de   :  { %8435 = vmatmul.mubr.msk.f32.vlgmr.msra.gmra.mxu0 %vm2579_vm4, %v4921_v2  ;;  %v8952_v2 = vld [vmem:[%s10683_s6] ss:$0 sm:$0xff] }
0x30df   :  { %8460 = vmatpush3.msra.mxu0 %v10133_v21  ;;  %v8945_v21 = vld [vmem:[%s10683_s6 + $0x8] ss:$0 sm:$0xff] }
0x30e0   :  { %8461 = vmatprep.subr.mxu0 %v8942_v10 }
0x30e1   :  { %8462 = vmatpush3.msra.mxu0 %v8942_v10 }
0x30e2   :  { %8463 = vmatprep.subr.mxu0 %v8943_v11 }
0x30e3   :  { %8464 = vmatpush3.msra.mxu0 %v8943_v11 }
0x30e4   :  { %8465 = vmatprep.subr.mxu0 %v8944_v18 }
0x30e5   :  { %8466 = vmatpush3.msra.mxu0 %v8944_v18 }
0x319e   :  { %v8436_v0 = vpop.f32.mrf.mxu0 }
0x319f   :  { %v5000_v34 = vadd.f32 %v8945_v21, %v8436_v0 }
0x31a0   :  { %v4994_v12 = vpop.f32.mrf.mxu0 }
0x31a1   :  { %v5004_v17 = vadd.f32 %v5000_v34, %v4838_v51  ;;  %v4995_v30 = vadd.f32 %v8945_v21, %v4994_v12  ;;  %v8953_v21 = vld [vmem:[%s10683_s6 + $0x1] ss:$0 sm:$0xff] }
0x31a3   :  { %v5003_v31 = vadd.f32 %v4995_v30, %v4837_v55  ;;  %v5008_v8 = vsel %vm44_vm0, %v5004_v17, 0.0 }
0x31a4   :  { %5009 = vadd.xlane.f32.xlu0 %v5008_v8 }
0x31a5   :  { %v5005_v36 = vsel %vm44_vm0, %v5003_v31, 0.0 }
0x31a6   :  { %5006 = vadd.xlane.f32.xlu1 %v5005_v36 }
0x322d   :  { %v5010_v9 = vpop.xlane.xlu0 %5009 }
0x322e   :  { %v5012_v20 = vmul.f32 0.03125, %v5010_v9 }
0x322f   :  { %v5007_v39 = vpop.xlane.xlu1 %5006 }
0x3230   :  { %v5014_v29 = vsub.f32 %v5004_v17, %v5012_v20  ;;  %v5011_v26 = vmul.f32 0.03125, %v5007_v39 }
0x3232   :  { %v5013_v14 = vsub.f32 %v5003_v31, %v5011_v26  ;;  %v5016_v41 = vmul.f32 %v5014_v29, %v5014_v29 }
0x3234   :  { %v5020_v44 = vsel %vm44_vm0, %v5016_v41, 0.0  ;;  %v5015_v47 = vmul.f32 %v5013_v14, %v5013_v14  ;;  %v10283_v41 = vld [vmem:[%s10679_s2] sm:$0xff] }
0x3235   :  { %5021 = vadd.xlane.f32.xlu0 %v5020_v44 }
0x3236   :  { %v5017_v53 = vsel %vm44_vm0, %v5015_v47, 0.0 }
0x3237   :  { %5018 = vadd.xlane.f32.xlu1 %v5017_v53 }
0x32be   :  { %v5022_v40 = vpop.xlane.xlu0 %5021 }
0x32bf   :  { %v5024_v57 = vmul.f32 0.03125, %v5022_v40 }
0x32c0   :  { %v5019_v16 = vpop.xlane.xlu1 %5018 }
0x32c1   :  { %v5026_v63 = vadd.f32 1e-05, %v5024_v57  ;;  %v5023_v15 = vmul.f32 0.03125, %v5019_v16 }
0x32c3   :  { %8801 = vrsqrt.f32 %v5026_v63  ;;  %v5025_v19 = vadd.f32 1e-05, %v5023_v15 }
0x32c5   :  { %8803 = vrsqrt.f32 %v5025_v19 }
0x32d0   :  { %v8802_v13 = vpop.eup %8801 }
0x32d1   :  { %v5030_v43 = vmul.f32 %v8802_v13, %v5014_v29  ;;  %v10277_v29 = vld [vmem:[%s10679_s2 + $0x8] sm:$0xff] }
0x32d2   :  { %v8804_v27 = vpop.eup %8803 }
0x32d3   :  { %v5029_v28 = vmul.f32 %v8804_v27, %v5013_v14  ;;  %v5032_v1 = vmul.f32 %v8946_v50, %v5030_v43 }
0x32d5   :  { %v5031_v55 = vmul.f32 %v8946_v50, %v5029_v28  ;;  %v10199_v5 = vadd.f32 %v8947_v46, %v5032_v1 }
0x32d7   :  { %v10197_v51 = vadd.f32 %v8947_v46, %v5031_v55 }
0x32d9   :  { %8445 = vmatprep.mubr.msk.f32.mxu1 %vm44_vm0, %v10197_v51  ;;  %8467 = vmatprep.mubr.msk.f32.mxu0 %vm44_vm0, %v10197_v51 }
0x32da   :  { %8446 = vmatmul.mubr.msk.f32.vlgmr.msra.gmra.mxu1 %vm44_vm0, %v10199_v5  ;;  %8468 = vmatmul.mubr.msk.f32.vlgmr.msra.gmra.mxu0 %vm44_vm0, %v10199_v5 }
0x32db   :  { %8449 = vmatpush3.msra.mxu1 %v10166_v61  ;;  %8456 = vmatprep.mubr.msk.f32.mxu1 %vm44_vm0, %v10197_v51 }
0x32dc   :  { %8450 = vmatprep.subr.mxu1 %v8948_v7 }
0x32dd   :  { %8451 = vmatpush3.msra.mxu1 %v8948_v7 }
0x32de   :  { %8452 = vmatprep.subr.mxu1 %v8949_v59 }
0x32df   :  { %8453 = vmatpush3.msra.mxu1 %v8949_v59 }
0x32e0   :  { %8454 = vmatprep.subr.mxu1 %v8950_v54 }
0x32e1   :  { %8455 = vmatpush3.msra.mxu1 %v8950_v54 }
0x32e2   :  { %8457 = vmatmul.mubr.msk.f32.vlgmr.msra.gmra.mxu1 %vm44_vm0, %v10199_v5 }
0x339a   :  { %v8447_v61 = vpop.f32.mrf.mxu1  ;;  %v8469_v22 = vpop.f32.mrf.mxu0 }
0x339b   :  { %v10226_v58 = vadd.f32 %v8951_v37, %v8469_v22  ;;  %v5113_v30 = vadd.f32 %v8952_v2, %v8447_v61 }
0x339c   :  { %v5107_v62 = vpop.f32.mrf.mxu1  ;;  %v5259_v3 = vpop.f32.mrf.mxu0 }
0x339d   :  { %v5108_v10 = vadd.f32 %v8952_v2, %v5107_v62  ;;  %v10231_v11 = vadd.f32 %v8951_v37, %v5259_v3  ;;  %8477 = vmatprep.subr.mxu0 %v10226_v58  ;;  %v10262_v31 = vmul.f32 0.35355338, %v5113_v30 }
0x339e   :  { %8478 = vmatpush3.msra.mxu0 %v10226_v58 }
0x339f   :  { %v10235_v18 = vmul.f32 0.35355338, %v5108_v10  ;;  %8479 = vmatprep.subr.mxu0 %v10231_v11 }
0x33a0   :  { %8480 = vmatpush3.msra.mxu0 %v10231_v11 }
0x33a1   :  { %8474 = vmatprep.mubr.msk.f32.mxu1 %vm474_vm1, %v10235_v18 }
0x33a2   :  { %v8458_v0 = vpop.f32.mrf.mxu1 }
0x33a3   :  { %v10244_v34 = vadd.f32 %v8953_v21, %v8458_v0 }
0x33a4   :  { %v5184_v12 = vpop.f32.mrf.mxu1 }
0x33a5   :  { %v10246_v17 = vadd.f32 %v8953_v21, %v5184_v12  ;;  %5464 = vrot.lane.b32.xlu1 %v10244_v34, %s9015_s22  ;;  %8470 = vmatprep.subr.msk.mxu1 %vm474_vm1, %v10244_v34 }
0x33a6   :  { %8471 = vmatpush3.xpose.msk.msra.mxu1 %vm474_vm1, %v10244_v34 }
0x33a7   :  { %5462 = vrot.lane.b32.xlu0 %v10246_v17, %s9015_s22  ;;  %8472 = vmatprep.subr.msk.mxu1 %vm474_vm1, %v10246_v17 }
0x33a9   :  { %5458 = vrot.lane.b32.xlu1 %v10235_v18, %s9015_s22 }
0x33aa   :  { %8473 = vmatpush3.xpose.msk.msra.mxu1 %vm474_vm1, %v10246_v17 }
0x33ad   :  { %5460 = vrot.lane.b32.xlu1 %v10262_v31, %s9015_s22  ;;  %8475 = vmatmul.mubr.msk.f32.vlgmr.msra.gmra.mxu1 %vm474_vm1, %v10262_v31 }
0x3417   :  { %v5465_v8 = vpop.permute.xlu1 %5464 }
0x3418   :  { %8484 = vmatprep.subr.msk.mxu1 %vm474_vm1, %v5465_v8 }
0x3419   :  { %v5463_v36 = vpop.permute.xlu0 %5462  ;;  %8485 = vmatpush3.xpose.msk.msra.mxu1 %vm474_vm1, %v5465_v8 }
0x341a   :  { %8486 = vmatprep.subr.msk.mxu1 %vm474_vm1, %v5463_v36 }
0x341b   :  { %v5459_v9 = vpop.permute.xlu1 %5458 }
0x341c   :  { %8488 = vmatprep.mubr.msk.f32.mxu1 %vm474_vm1, %v5459_v9 }
0x341d   :  { %8487 = vmatpush3.xpose.msk.msra.mxu1 %vm474_vm1, %v5463_v36 }
0x341f   :  { %v5461_v20 = vpop.permute.xlu1 %5460 }
0x3420   :  { %8489 = vmatmul.mubr.msk.f32.vlgmr.msra.gmra.mxu1 %vm474_vm1, %v5461_v20 }
0x346d   :  { %v8476_v39 = vpop.f32.mrf.mxu1 }
0x346e   :  { %v5352_v26 = vadd.f32 %v10277_v29, %v8476_v39 }
0x346f   :  { %v5346_v14 = vpop.f32.mrf.mxu1 }
0x3470   :  { %v5347_v44 = vadd.f32 %v10283_v41, %v5346_v14  ;;  %v5358_v47 = vsel %vm562_vm2, %v5352_v26, -inf }
0x3471   :  { %5359 = vmax.xlane.f32.xlu1 %v5358_v47 }
0x3472   :  { %v5355_v53 = vsel %vm562_vm2, %v5347_v44, -inf }
0x3473   :  { %5356 = vmax.xlane.f32.xlu0 %v5355_v53 }
0x3482   :  { %5575 = vrot.lane.b32.xlu1 %v10226_v58, %s9015_s22 }
0x34e0   :  { %v8490_v40 = vpop.f32.mrf.mxu1 }
0x34e1   :  { %v5546_v63 = vadd.f32 %v10277_v29, %v8490_v40 }
0x34e2   :  { %v5540_v57 = vpop.f32.mrf.mxu1 }
0x34e3   :  { %v5541_v16 = vadd.f32 %v10283_v41, %v5540_v57  ;;  %v5552_v19 = vsel %vm562_vm2, %v5546_v63, -inf }
0x34e5   :  { %v5549_v15 = vsel %vm562_vm2, %v5541_v16, -inf }
0x34e6   :  { %5550 = vmax.xlane.f32.xlu0 %v5549_v15 }
0x34ea   :  { %5553 = vmax.xlane.f32.xlu0 %v5552_v19 }
0x34fa   :  { %v5360_v13 = vpop.xlane.xlu1 %5359 }
0x34fb   :  { %v5362_v43 = vsub.f32 %v5352_v26, %v5360_v13 }
0x34fc   :  { %v5357_v27 = vpop.xlane.xlu0 %5356 }
0x34fd   :  { %v5365_v28 = vmul.f32 1.442695, %v5362_v43  ;;  %v5361_v50 = vsub.f32 %v5347_v44, %v5357_v27 }
0x34fe   :  { %v5576_v1 = vpop.permute.xlu1 %5575 }
0x34ff   :  { %8805 = vpow2.f32 %v5365_v28  ;;  %v5363_v55 = vmul.f32 1.442695, %v5361_v50  ;;  %8491 = vmatprep.subr.mxu0 %v5576_v1 }
0x3501   :  { %8807 = vpow2.f32 %v5363_v55 }
0x350c   :  { %v8806_v46 = vpop.eup %8805 }
0x350d   :  { %v5370_v7 = vsel %vm562_vm2, %v8806_v46, 0.0 }
0x350e   :  { %v8808_v59 = vpop.eup %8807  ;;  %5371 = vadd.xlane.f32.xlu0 %v5370_v7 }
0x350f   :  { %v5367_v54 = vsel %vm562_vm2, %v8808_v59, 0.0 }
0x3510   :  { %5368 = vadd.xlane.f32.xlu1 %v5367_v54 }
0x3521   :  { %5666 = vrot.lane.b32.xlu1 %v10244_v34, %s9016_s14 }
0x3525   :  { %5664 = vrot.lane.b32.xlu1 %v10246_v17, %s9016_s14 }
0x356f   :  { %v5551_v61 = vpop.xlane.xlu0 %5550 }
0x3570   :  { %v5555_v22 = vsub.f32 %v5541_v16, %v5551_v61 }
0x3572   :  { %v5557_v37 = vmul.f32 1.442695, %v5555_v22 }
0x3573   :  { %v5554_v62 = vpop.xlane.xlu0 %5553 }
0x3574   :  { %8809 = vpow2.f32 %v5557_v37  ;;  %v5556_v3 = vsub.f32 %v5546_v63, %v5554_v62 }
0x3576   :  { %v5559_v2 = vmul.f32 1.442695, %v5556_v3 }
0x3578   :  { %8811 = vpow2.f32 %v5559_v2 }
0x3581   :  { %v8810_v10 = vpop.eup %8809 }
0x3582   :  { %v5561_v0 = vsel %vm562_vm2, %v8810_v10, 0.0 }
0x3583   :  { %5562 = vadd.xlane.f32.xlu1 %v5561_v0 }
0x3585   :  { %v8812_v21 = vpop.eup %8811 }
0x3586   :  { %v5564_v12 = vsel %vm562_vm2, %v8812_v21, 0.0 }
0x3587   :  { %5565 = vadd.xlane.f32.xlu0 %v5564_v12 }
0x3594   :  { %5662 = vrot.lane.b32.xlu1 %v10262_v31, %s9016_s14 }
0x3597   :  { %v5372_v30 = vpop.xlane.xlu0 %5371 }
0x3598   :  { %8813 = vrcp.f32 %v5372_v30 }
0x3599   :  { %v5369_v8 = vpop.xlane.xlu1 %5368 }
0x359a   :  { %8815 = vrcp.f32 %v5369_v8 }
0x359d   :  { %5573 = vrot.lane.b32.xlu0 %v10231_v11, %s9015_s22  ;;  %v5667_v26 = vpop.permute.xlu1 %5666 }
0x35a1   :  { %5660 = vrot.lane.b32.xlu0 %v10235_v18, %s9016_s14  ;;  %v5665_v14 = vpop.permute.xlu1 %5664 }
0x35a5   :  { %v8814_v36 = vpop.eup %8813 }
0x35a6   :  { %v5376_v39 = vmul.f32 %v8814_v36, %v8806_v46 }
0x35a7   :  { %v8816_v9 = vpop.eup %8815 }
0x35a8   :  { %v5375_v20 = vmul.f32 %v8816_v9, %v8808_v59 }
0x35aa   :  { %8481 = vmatprep.mubr.msk.f32.mxu0 %vm562_vm2, %v5375_v20 }
0x35ab   :  { %8482 = vmatmul.mubr.msk.f32.vlgmr.msra.gmra.mxu0 %vm562_vm2, %v5376_v39 }
0x35ac   :  { %8492 = vmatpush3.msra.mxu0 %v5576_v1 }
0x360c   :  { %v5563_v44 = vpop.xlane.xlu1 %5562 }
0x360d   :  { %8817 = vrcp.f32 %v5563_v44  ;;  %v8957_v44 = vld [vmem:[%s10681_s4 + $0x90] sm:$0xff] }
0x3610   :  { %v5566_v47 = vpop.xlane.xlu0 %5565  ;;  %v5663_v19 = vpop.permute.xlu1 %5662 }
0x3611   :  { %8819 = vrcp.f32 %v5566_v47  ;;  %v8958_v47 = vld [vmem:[%s10681_s4 + $0x88] sm:$0xff] }
0x3614   :  { %v5574_v53 = vpop.permute.xlu0 %5573 }
0x3615   :  { %8493 = vmatprep.subr.mxu0 %v5574_v53 }
0x3616   :  { %8494 = vmatpush3.msra.mxu0 %v5574_v53  ;;  %v8959_v53 = vld [vmem:[%s10681_s4 + $0x80] sm:$0xff] }
0x3617   :  { %8498 = vmatprep.subr.msk.mxu0 %vm474_vm1, %v5667_v26 }
0x3618   :  { %v5661_v15 = vpop.permute.xlu0 %5660 }
0x361a   :  { %v8818_v40 = vpop.eup %8817 }
0x361b   :  { %v5569_v57 = vmul.f32 %v8818_v40, %v8810_v10 }
0x361d   :  { %8495 = vmatprep.mubr.msk.f32.mxu0 %vm562_vm2, %v5569_v57 }
0x361e   :  { %v8820_v16 = vpop.eup %8819 }
0x361f   :  { %v5570_v63 = vmul.f32 %v8820_v16, %v8812_v21 }
0x3621   :  { %8496 = vmatmul.mubr.msk.f32.vlgmr.msra.gmra.mxu0 %vm562_vm2, %v5570_v63 }
0x3622   :  { %8499 = vmatpush3.xpose.msk.msra.mxu0 %vm474_vm1, %v5667_v26  ;;  %8502 = vmatprep.mubr.msk.f32.mxu0 %vm474_vm1, %v5661_v15  ;;  %v8956_v26 = vld [vmem:[%s10681_s4 + $0x98] sm:$0xff] }
0x3623   :  { %8500 = vmatprep.subr.msk.mxu0 %vm474_vm1, %v5665_v14 }
0x3626   :  { %8501 = vmatpush3.xpose.msk.msra.mxu0 %vm474_vm1, %v5665_v14 }
0x3629   :  { %8503 = vmatmul.mubr.msk.f32.vlgmr.msra.gmra.mxu0 %vm474_vm1, %v5663_v19 }
0x366b   :  { %v10318_v13 = vpop.f32.mrf.mxu0 }
0x366d   :  { %v10320_v43 = vpop.f32.mrf.mxu0 }
0x36e1   :  { %v10322_v27 = vpop.f32.mrf.mxu0 }
0x36e3   :  { %v10324_v28 = vpop.f32.mrf.mxu0 }
0x36e9   :  { %v8504_v50 = vpop.f32.mrf.mxu0 }
0x36ea   :  { %v5748_v1 = vadd.f32 %v10277_v29, %v8504_v50 }
0x36eb   :  { %v5742_v55 = vpop.f32.mrf.mxu0 }
0x36ec   :  { %v5743_v46 = vadd.f32 %v10283_v41, %v5742_v55  ;;  %v5754_v7 = vsel %vm562_vm2, %v5748_v1, -inf }
0x36ed   :  { %5755 = vmax.xlane.f32.xlu1 %v5754_v7 }
0x36ee   :  { %v5751_v59 = vsel %vm562_vm2, %v5743_v46, -inf }
0x36ef   :  { %5752 = vmax.xlane.f32.xlu0 %v5751_v59 }
0x36fe   :  { %5775 = vrot.lane.b32.xlu1 %v10226_v58, %s9016_s14 }
0x3702   :  { %5866 = vrot.lane.b32.xlu1 %v10244_v34, %s9017_s15 }
0x3706   :  { %5864 = vrot.lane.b32.xlu1 %v10246_v17, %s9017_s15 }
0x370a   :  { %5862 = vrot.lane.b32.xlu1 %v10262_v31, %s9017_s15 }
0x3776   :  { %v5756_v54 = vpop.xlane.xlu1 %5755 }
0x3777   :  { %v5758_v61 = vsub.f32 %v5748_v1, %v5756_v54 }
0x3778   :  { %v5753_v22 = vpop.xlane.xlu0 %5752 }
0x3779   :  { %v5761_v37 = vmul.f32 1.442695, %v5758_v61  ;;  %v5757_v62 = vsub.f32 %v5743_v46, %v5753_v22 }
0x377a   :  { %v5776_v3 = vpop.permute.xlu1 %5775 }
0x377b   :  { %8821 = vpow2.f32 %v5761_v37  ;;  %v5759_v2 = vmul.f32 1.442695, %v5757_v62  ;;  %8505 = vmatprep.subr.mxu1 %v5776_v3 }
0x377c   :  { %8506 = vmatpush3.msra.mxu1 %v5776_v3  ;;  %v8960_v3 = vld [vmem:[%s10681_s4 + $0x78] sm:$0xff] }
0x377d   :  { %8823 = vpow2.f32 %v5759_v2 }
0x377e   :  { %v5867_v30 = vpop.permute.xlu1 %5866 }
0x3788   :  { %v8822_v10 = vpop.eup %8821 }
0x3789   :  { %v5766_v34 = vsel %vm562_vm2, %v8822_v10, 0.0 }
0x378a   :  { %v8824_v0 = vpop.eup %8823  ;;  %5767 = vadd.xlane.f32.xlu0 %v5766_v34 }
0x378b   :  { %v5763_v17 = vsel %vm562_vm2, %v8824_v0, 0.0 }
0x378e   :  { %5764 = vadd.xlane.f32.xlu0 %v5763_v17  ;;  %v8962_v17 = vld [vmem:[%s10681_s4 + $0x68] sm:$0xff] }
0x37a4   :  { %5773 = vrot.lane.b32.xlu0 %v10231_v11, %s9016_s14 }
0x37a8   :  { %5860 = vrot.lane.b32.xlu0 %v10235_v18, %s9017_s15  ;;  %v5865_v18 = vpop.permute.xlu1 %5864 }
0x37ac   :  { %v5863_v14 = vpop.permute.xlu1 %5862 }
0x3813   :  { %v5768_v31 = vpop.xlane.xlu0 %5767 }
0x3814   :  { %8825 = vrcp.f32 %v5768_v31  ;;  %v8963_v31 = vld [vmem:[%s10681_s4 + $0x60] sm:$0xff] }
0x3817   :  { %v5765_v21 = vpop.xlane.xlu0 %5764 }
0x3818   :  { %8827 = vrcp.f32 %v5765_v21 }
0x381b   :  { %v5774_v12 = vpop.permute.xlu0 %5773 }
0x381c   :  { %8507 = vmatprep.subr.mxu1 %v5774_v12 }
0x381d   :  { %8508 = vmatpush3.msra.mxu1 %v5774_v12 }
0x381e   :  { %8512 = vmatprep.subr.msk.mxu1 %vm474_vm1, %v5867_v30 }
0x381f   :  { %v5861_v39 = vpop.permute.xlu0 %5860 }
0x3821   :  { %v8826_v8 = vpop.eup %8825 }
0x3822   :  { %v5772_v20 = vmul.f32 %v8826_v8, %v8822_v10 }
0x3825   :  { %v8828_v36 = vpop.eup %8827 }
0x3826   :  { %v5771_v9 = vmul.f32 %v8828_v36, %v8824_v0 }
0x3828   :  { %8509 = vmatprep.mubr.msk.f32.mxu1 %vm562_vm2, %v5771_v9 }
0x3829   :  { %8510 = vmatmul.mubr.msk.f32.vlgmr.msra.gmra.mxu1 %vm562_vm2, %v5772_v20 }
0x382a   :  { %8513 = vmatpush3.xpose.msk.msra.mxu1 %vm474_vm1, %v5867_v30  ;;  %8516 = vmatprep.mubr.msk.f32.mxu1 %vm474_vm1, %v5861_v39 }
0x382b   :  { %8514 = vmatprep.subr.msk.mxu1 %vm474_vm1, %v5865_v18 }
0x382e   :  { %8515 = vmatpush3.xpose.msk.msra.mxu1 %vm474_vm1, %v5865_v18 }
0x382f   :  { %8537 = vmatprep.subr.mxu1 %v8956_v26 }
0x3831   :  { %8517 = vmatmul.mubr.msk.f32.vlgmr.msra.gmra.mxu1 %vm474_vm1, %v5863_v14 }
0x3832   :  { %8538 = vmatpush3.msra.mxu1 %v8956_v26 }
0x3833   :  { %8539 = vmatprep.subr.mxu1 %v8957_v44 }
0x3834   :  { %8540 = vmatpush3.msra.mxu1 %v8957_v44 }
0x3835   :  { %8541 = vmatprep.subr.mxu1 %v8958_v47 }
0x3836   :  { %8542 = vmatpush3.msra.mxu1 %v8958_v47 }
0x3837   :  { %8543 = vmatprep.subr.mxu1 %v8959_v53 }
0x3838   :  { %8544 = vmatpush3.msra.mxu1 %v8959_v53 }
0x3839   :  { %8555 = vmatprep.subr.mxu1 %v9318_v35 }
0x38e9   :  { %v8511_v40 = vpop.f32.mrf.mxu1 }
0x38eb   :  { %v5851_v57 = vpop.f32.mrf.mxu1 }
0x38f1   :  { %v8518_v16 = vpop.f32.mrf.mxu1 }
0x38f2   :  { %v5948_v63 = vadd.f32 %v10277_v29, %v8518_v16 }
0x38f3   :  { %v5942_v15 = vpop.f32.mrf.mxu1 }
0x38f4   :  { %v5943_v19 = vadd.f32 %v10283_v41, %v5942_v15  ;;  %v5954_v50 = vsel %vm562_vm2, %v5948_v63, -inf }
0x38f5   :  { %5955 = vmax.xlane.f32.xlu1 %v5954_v50 }
0x38f6   :  { %v5951_v1 = vsel %vm562_vm2, %v5943_v19, -inf }
0x38f7   :  { %5952 = vmax.xlane.f32.xlu0 %v5951_v1 }
0x3906   :  { %5975 = vrot.lane.b32.xlu1 %v10226_v58, %s9017_s15 }
0x390a   :  { %6062 = vrot.lane.b32.xlu1 %v10324_v28, %s9018_s1 }
0x390e   :  { %6064 = vrot.lane.b32.xlu1 %v10322_v27, %s9018_s1 }
0x3912   :  { %6072 = vrot.lane.b32.xlu1 %v8511_v40, %s9019_s25 }
0x397e   :  { %v5956_v29 = vpop.xlane.xlu1 %5955 }
0x397f   :  { %v5958_v55 = vsub.f32 %v5948_v63, %v5956_v29 }
0x3980   :  { %v5953_v41 = vpop.xlane.xlu0 %5952 }
0x3981   :  { %v5961_v46 = vmul.f32 1.442695, %v5958_v55  ;;  %v5957_v7 = vsub.f32 %v5943_v19, %v5953_v41 }
0x3982   :  { %v5976_v59 = vpop.permute.xlu1 %5975 }
0x3983   :  { %8829 = vpow2.f32 %v5961_v46  ;;  %v5959_v54 = vmul.f32 1.442695, %v5957_v7  ;;  %8519 = vmatprep.subr.mxu0 %v5976_v59 }
0x3984   :  { %8520 = vmatpush3.msra.mxu0 %v5976_v59 }
0x3985   :  { %8831 = vpow2.f32 %v5959_v54 }
0x3986   :  { %v6063_v30 = vpop.permute.xlu1 %6062 }
0x3987   :  { %v6084_v20 = vsel %vm474_vm1, %v10320_v43, %v6063_v30  ;;  %v8964_v43 = vld [vmem:[%s10683_s6 + $0x3] ss:$0 sm:$0xff] }
0x398a   :  { %v6065_v8 = vpop.permute.xlu1 %6064 }
0x398b   :  { %v6085_v18 = vsel %vm474_vm1, %v10318_v13, %v6065_v8 }
0x398e   :  { %v6073_v36 = vpop.permute.xlu1 %6072 }
0x398f   :  { %v6087_v44 = vsel %vm562_vm2, %v6085_v18, %v6073_v36 }
0x3990   :  { %v8830_v58 = vpop.eup %8829 }
0x3991   :  { %v5966_v61 = vsel %vm562_vm2, %v8830_v58, 0.0 }
0x3992   :  { %v8832_v28 = vpop.eup %8831  ;;  %5967 = vadd.xlane.f32.xlu0 %v5966_v61 }
0x3993   :  { %v5963_v27 = vsel %vm562_vm2, %v8832_v28, 0.0 }
0x3996   :  { %5964 = vadd.xlane.f32.xlu0 %v5963_v27 }
0x39ac   :  { %5973 = vrot.lane.b32.xlu0 %v10231_v11, %s9017_s15  ;;  %v8961_v11 = vld [vmem:[%s10681_s4 + $0x70] sm:$0xff] }
0x39b0   :  { %6070 = vrot.lane.b32.xlu0 %v5851_v57, %s9019_s25 }
0x3a1b   :  { %v5968_v22 = vpop.xlane.xlu0 %5967 }
0x3a1c   :  { %8833 = vrcp.f32 %v5968_v22 }
0x3a1f   :  { %v5965_v37 = vpop.xlane.xlu0 %5964 }
0x3a20   :  { %8835 = vrcp.f32 %v5965_v37 }
0x3a23   :  { %v5974_v62 = vpop.permute.xlu0 %5973 }
0x3a24   :  { %8521 = vmatprep.subr.mxu0 %v5974_v62 }
0x3a25   :  { %8522 = vmatpush3.msra.mxu0 %v5974_v62  ;;  %v8965_v62 = vld [vmem:[%s10683_s6 + $0x9] ss:$0 sm:$0xff] }
0x3a26   :  { %8526 = vmatprep.subr.mxu0 %v8960_v3 }
0x3a27   :  { %v6071_v9 = vpop.permute.xlu0 %6070 }
0x3a28   :  { %v6086_v26 = vsel %vm562_vm2, %v6084_v20, %v6071_v9 }
0x3a29   :  { %v8834_v2 = vpop.eup %8833 }
0x3a2a   :  { %v5972_v0 = vmul.f32 %v8834_v2, %v8830_v58 }
0x3a2d   :  { %v8836_v10 = vpop.eup %8835 }
0x3a2e   :  { %v5971_v34 = vmul.f32 %v8836_v10, %v8832_v28 }
0x3a30   :  { %8523 = vmatprep.mubr.msk.f32.mxu0 %vm562_vm2, %v5971_v34  ;;  %v8966_v34 = vld [vmem:[%s10683_s6 + $0xa] ss:$0 sm:$0xff] }
0x3a31   :  { %8524 = vmatmul.mubr.msk.f32.vlgmr.msra.gmra.mxu0 %vm562_vm2, %v5972_v0 }
0x3a32   :  { %8527 = vmatpush3.msra.mxu0 %v8960_v3 }
0x3a33   :  { %8528 = vmatprep.subr.mxu0 %v8961_v11 }
0x3a34   :  { %8529 = vmatpush3.msra.mxu0 %v8961_v11 }
0x3a35   :  { %8530 = vmatprep.subr.mxu0 %v8962_v17 }
0x3a36   :  { %8531 = vmatpush3.msra.mxu0 %v8962_v17 }
0x3a37   :  { %8532 = vmatprep.subr.mxu0 %v8963_v31 }
0x3a38   :  { %8533 = vmatpush3.msra.mxu0 %v8963_v31 }
0x3a39   :  { %8548 = vmatprep.subr.msk.mxu0 %vm474_vm1, %v9353_v4 }
0x3af1   :  { %v8525_v21 = vpop.f32.mrf.mxu0 }
0x3af2   :  { %6080 = vrot.lane.b32.xlu1 %v8525_v21, %s9020_s0  ;;  %v8967_v21 = vld [vmem:[%s10683_s6 + $0x4] ss:$0 sm:$0xff] }
0x3af3   :  { %v6051_v12 = vpop.f32.mrf.mxu0 }
0x3af4   :  { %6078 = vrot.lane.b32.xlu0 %v6051_v12, %s9020_s0 }
0x3b64   :  { %v6081_v39 = vpop.permute.xlu1 %6080 }
0x3b65   :  { %v6089_v53 = vsel %vm1296_vm3, %v6087_v44, %v6081_v39 }
0x3b66   :  { %v6079_v14 = vpop.permute.xlu0 %6078 }
0x3b67   :  { %v6088_v47 = vsel %vm1296_vm3, %v6086_v26, %v6079_v14 }
0x3b68   :  { %8534 = vmatprep.mubr.msk.f32.mxu0 %vm44_vm0, %v6088_v47 }
0x3b69   :  { %8535 = vmatmul.mubr.msk.f32.vlgmr.msra.gmra.mxu0 %vm44_vm0, %v6089_v53 }
0x3b6a   :  { %8549 = vmatpush3.xpose.msk.msra.mxu0 %vm474_vm1, %v9353_v4 }
0x3b6b   :  { %8550 = vmatprep.subr.msk.mxu0 %vm474_vm1, %v9149_v23 }
0x3b6e   :  { %8551 = vmatpush3.xpose.msk.msra.mxu0 %vm474_vm1, %v9149_v23 }
0x3b6f   :  { %8569 = vmatprep.subr.mxu0 %v9468_v45 }
0x3c29   :  { %v8536_v13 = vpop.f32.mrf.mxu0 }
0x3c2a   :  { %v6168_v40 = vadd.f32 %v8964_v43, %v8536_v13 }
0x3c2b   :  { %v6162_v57 = vpop.f32.mrf.mxu0 }
0x3c2c   :  { %v6172_v16 = vadd.f32 %v6168_v40, %v10199_v5  ;;  %v6163_v63 = vadd.f32 %v8964_v43, %v6162_v57 }
0x3c2e   :  { %v6171_v4 = vadd.f32 %v6163_v63, %v10197_v51  ;;  %v6176_v15 = vsel %vm44_vm0, %v6172_v16, 0.0 }
0x3c2f   :  { %6177 = vadd.xlane.f32.xlu1 %v6176_v15 }
0x3c30   :  { %v6173_v19 = vsel %vm44_vm0, %v6171_v4, 0.0 }
0x3c31   :  { %6174 = vadd.xlane.f32.xlu0 %v6173_v19 }
0x3cb8   :  { %v6178_v23 = vpop.xlane.xlu1 %6177 }
0x3cb9   :  { %v6180_v50 = vmul.f32 0.03125, %v6178_v23 }
0x3cba   :  { %v6175_v1 = vpop.xlane.xlu0 %6174 }
0x3cbb   :  { %v6179_v29 = vmul.f32 0.03125, %v6175_v1  ;;  %v6182_v55 = vsub.f32 %v6172_v16, %v6180_v50 }
0x3cbd   :  { %v6181_v41 = vsub.f32 %v6171_v4, %v6179_v29  ;;  %v6184_v59 = vmul.f32 %v6182_v55, %v6182_v55 }
0x3cbf   :  { %v6183_v46 = vmul.f32 %v6181_v41, %v6181_v41  ;;  %v6188_v5 = vsel %vm44_vm0, %v6184_v59, 0.0 }
0x3cc1   :  { %v6185_v7 = vsel %vm44_vm0, %v6183_v46, 0.0 }
0x3cc2   :  { %6186 = vadd.xlane.f32.xlu0 %v6185_v7 }
0x3cc6   :  { %6189 = vadd.xlane.f32.xlu0 %v6188_v5 }
0x3d4b   :  { %v6187_v51 = vpop.xlane.xlu0 %6186 }
0x3d4c   :  { %v6191_v54 = vmul.f32 0.03125, %v6187_v51 }
0x3d4e   :  { %v6193_v58 = vadd.f32 1e-05, %v6191_v54 }
0x3d4f   :  { %v6190_v61 = vpop.xlane.xlu0 %6189 }
0x3d50   :  { %8837 = vrsqrt.f32 %v6193_v58  ;;  %v6192_v28 = vmul.f32 0.03125, %v6190_v61 }
0x3d52   :  { %v6194_v27 = vadd.f32 1e-05, %v6192_v28 }
0x3d54   :  { %8839 = vrsqrt.f32 %v6194_v27 }
0x3d5d   :  { %v8838_v22 = vpop.eup %8837 }
0x3d5e   :  { %v6197_v37 = vmul.f32 %v8838_v22, %v6181_v41 }
0x3d60   :  { %v6199_v3 = vmul.f32 %v8965_v62, %v6197_v37 }
0x3d61   :  { %v8840_v2 = vpop.eup %8839 }
0x3d62   :  { %v6198_v10 = vmul.f32 %v8840_v2, %v6182_v55  ;;  %v10431_v0 = vadd.f32 %v8966_v34, %v6199_v3 }
0x3d64   :  { %8545 = vmatprep.mubr.msk.f32.mxu1 %vm44_vm0, %v10431_v0  ;;  %v6200_v11 = vmul.f32 %v8965_v62, %v6198_v10 }
0x3d66   :  { %v10435_v17 = vadd.f32 %v8966_v34, %v6200_v11 }
0x3d68   :  { %8546 = vmatmul.mubr.msk.f32.vlgmr.msra.gmra.mxu1 %vm44_vm0, %v10435_v17 }
0x3d69   :  { %8556 = vmatpush3.msra.mxu1 %v9318_v35  ;;  %v10463_v35 = vld [vmem:[%s10680_s3 + $0x8] sm:$0xff] }
0x3d6a   :  { %8557 = vmatprep.subr.mxu1 %v9164_v33 }
0x3d6b   :  { %8558 = vmatpush3.msra.mxu1 %v9164_v33 }
0x3d6c   :  { %8562 = vmatprep.subr.msk.mxu1 %vm474_vm1, %v9430_v42 }
0x3e28   :  { %v8547_v31 = vpop.f32.mrf.mxu1 }
0x3e29   :  { %v6281_v12 = vadd.f32 %v8967_v21, %v8547_v31 }
0x3e2a   :  { %v6275_v30 = vpop.f32.mrf.mxu1 }
0x3e2b   :  { %v6276_v8 = vadd.f32 %v8967_v21, %v6275_v30  ;;  %v10449_v9 = vmul.f32 0.35355338, %v6281_v12 }
0x3e2d   :  { %v10447_v36 = vmul.f32 0.35355338, %v6276_v8 }
0x3e2f   :  { %8552 = vmatprep.mubr.msk.f32.mxu0 %vm474_vm1, %v10447_v36 }
0x3e30   :  { %8553 = vmatmul.mubr.msk.f32.vlgmr.msra.gmra.mxu0 %vm474_vm1, %v10449_v9 }
0x3e31   :  { %8570 = vmatpush3.msra.mxu0 %v9468_v45  ;;  %v10469_v45 = vld [vmem:[%s10680_s3] sm:$0xff] }
0x3e32   :  { %8571 = vmatprep.subr.mxu0 %v9478_v49 }
0x3e33   :  { %8572 = vmatpush3.msra.mxu0 %v9478_v49 }
0x3e34   :  { %8576 = vmatprep.subr.msk.mxu0 %vm474_vm1, %v9481_v52 }
0x3ef0   :  { %v8554_v33 = vpop.f32.mrf.mxu0 }
0x3ef1   :  { %v6364_v20 = vadd.f32 %v10463_v35, %v8554_v33 }
0x3ef2   :  { %v6358_v39 = vpop.f32.mrf.mxu0 }
0x3ef3   :  { %v6359_v18 = vadd.f32 %v10469_v45, %v6358_v39  ;;  %v6370_v49 = vsel %vm562_vm2, %v6364_v20, -inf }
0x3ef4   :  { %6371 = vmax.xlane.f32.xlu0 %v6370_v49 }
0x3ef5   :  { %v6367_v26 = vsel %vm562_vm2, %v6359_v18, -inf }
0x3ef6   :  { %6368 = vmax.xlane.f32.xlu1 %v6367_v26 }
0x3f7d   :  { %v6372_v14 = vpop.xlane.xlu0 %6371 }
0x3f7e   :  { %v6374_v44 = vsub.f32 %v6364_v20, %v6372_v14 }
0x3f7f   :  { %v6369_v47 = vpop.xlane.xlu1 %6368 }
0x3f80   :  { %v6377_v53 = vmul.f32 1.442695, %v6374_v44  ;;  %v6373_v13 = vsub.f32 %v6359_v18, %v6369_v47 }
0x3f82   :  { %8841 = vpow2.f32 %v6377_v53  ;;  %v6375_v43 = vmul.f32 1.442695, %v6373_v13 }
0x3f84   :  { %8843 = vpow2.f32 %v6375_v43 }
0x3f8f   :  { %v8842_v40 = vpop.eup %8841 }
0x3f90   :  { %v6382_v57 = vsel %vm562_vm2, %v8842_v40, 0.0 }
0x3f91   :  { %v8844_v16 = vpop.eup %8843  ;;  %6383 = vadd.xlane.f32.xlu0 %v6382_v57 }
0x3f92   :  { %v6379_v63 = vsel %vm562_vm2, %v8844_v16, 0.0 }
0x3f93   :  { %6380 = vadd.xlane.f32.xlu1 %v6379_v63 }
0x3fa4   :  { %6470 = vrot.lane.b32.xlu1 %v10447_v36, %s9015_s22 }
0x3fa7   :  { %6472 = vrot.lane.b32.xlu0 %v10449_v9, %s9015_s22 }
0x401a   :  { %v6384_v4 = vpop.xlane.xlu0 %6383 }
0x401b   :  { %8845 = vrcp.f32 %v6384_v4 }
0x401c   :  { %v6381_v15 = vpop.xlane.xlu1 %6380 }
0x401d   :  { %8847 = vrcp.f32 %v6381_v15 }
0x401e   :  { %v6473_v55 = vpop.permute.xlu0 %6472 }
0x4020   :  { %v6471_v29 = vpop.permute.xlu1 %6470 }
0x4028   :  { %v8846_v19 = vpop.eup %8845 }
0x4029   :  { %v6388_v1 = vmul.f32 %v8846_v19, %v8842_v40 }
0x402a   :  { %v8848_v23 = vpop.eup %8847 }
0x402b   :  { %v6387_v50 = vmul.f32 %v8848_v23, %v8844_v16 }
0x402d   :  { %8559 = vmatprep.mubr.msk.f32.mxu1 %vm562_vm2, %v6387_v50  ;;  %v8973_v50 = vld [vmem:[%s10682_s5 + $0x8] sm:$0xff] }
0x402e   :  { %8560 = vmatmul.mubr.msk.f32.vlgmr.msra.gmra.mxu1 %vm562_vm2, %v6388_v1 }
0x402f   :  { %8563 = vmatpush3.xpose.msk.msra.mxu1 %vm474_vm1, %v9430_v42  ;;  %8566 = vmatprep.mubr.msk.f32.mxu1 %vm474_vm1, %v6471_v29 }
0x4030   :  { %8564 = vmatprep.subr.msk.mxu1 %vm474_vm1, %v9442_v32 }
0x4033   :  { %8565 = vmatpush3.xpose.msk.msra.mxu1 %vm474_vm1, %v9442_v32 }
0x4034   :  { %8583 = vmatprep.subr.mxu1 %v9514_v56 }
0x4036   :  { %8567 = vmatmul.mubr.msk.f32.vlgmr.msra.gmra.mxu1 %vm474_vm1, %v6473_v55 }
0x4037   :  { %8584 = vmatpush3.msra.mxu1 %v9514_v56 }
0x4038   :  { %8585 = vmatprep.subr.mxu1 %v9524_v24 }
0x4039   :  { %8586 = vmatpush3.msra.mxu1 %v9524_v24 }
0x403a   :  { %8590 = vmatprep.subr.msk.mxu1 %vm474_vm1, %v9527_v25 }
0x40ee   :  { %v10496_v42 = vpop.f32.mrf.mxu1 }
0x40f0   :  { %v10498_v41 = vpop.f32.mrf.mxu1 }
0x40f6   :  { %v8568_v46 = vpop.f32.mrf.mxu1 }
0x40f7   :  { %v6550_v32 = vadd.f32 %v10463_v35, %v8568_v46 }
0x40f8   :  { %v6544_v7 = vpop.f32.mrf.mxu1 }
0x40f9   :  { %v6545_v59 = vadd.f32 %v10469_v45, %v6544_v7  ;;  %v6556_v5 = vsel %vm562_vm2, %v6550_v32, -inf }
0x40fa   :  { %6557 = vmax.xlane.f32.xlu0 %v6556_v5 }
0x40fb   :  { %v6553_v56 = vsel %vm562_vm2, %v6545_v59, -inf }
0x40fc   :  { %6554 = vmax.xlane.f32.xlu1 %v6553_v56 }
0x4183   :  { %v6558_v24 = vpop.xlane.xlu0 %6557 }
0x4184   :  { %v6560_v51 = vsub.f32 %v6550_v32, %v6558_v24 }
0x4185   :  { %v6555_v54 = vpop.xlane.xlu1 %6554 }
0x4186   :  { %v6563_v58 = vmul.f32 1.442695, %v6560_v51  ;;  %v6559_v61 = vsub.f32 %v6545_v59, %v6555_v54 }
0x4188   :  { %8849 = vpow2.f32 %v6563_v58  ;;  %v6561_v28 = vmul.f32 1.442695, %v6559_v61 }
0x418a   :  { %8851 = vpow2.f32 %v6561_v28 }
0x4195   :  { %v8850_v27 = vpop.eup %8849 }
0x4196   :  { %v6568_v22 = vsel %vm562_vm2, %v8850_v27, 0.0 }
0x4197   :  { %v8852_v37 = vpop.eup %8851  ;;  %6569 = vadd.xlane.f32.xlu0 %v6568_v22 }
0x4198   :  { %v6565_v62 = vsel %vm562_vm2, %v8852_v37, 0.0 }
0x4199   :  { %6566 = vadd.xlane.f32.xlu1 %v6565_v62 }
0x41aa   :  { %6656 = vrot.lane.b32.xlu1 %v10447_v36, %s9016_s14 }
0x41ad   :  { %6658 = vrot.lane.b32.xlu0 %v10449_v9, %s9016_s14 }
0x4220   :  { %v6570_v3 = vpop.xlane.xlu0 %6569 }
0x4221   :  { %8853 = vrcp.f32 %v6570_v3 }
0x4222   :  { %v6567_v2 = vpop.xlane.xlu1 %6566 }
0x4223   :  { %8855 = vrcp.f32 %v6567_v2 }
0x4224   :  { %v6659_v12 = vpop.permute.xlu0 %6658 }
0x4226   :  { %v6657_v21 = vpop.permute.xlu1 %6656 }
0x422e   :  { %v8854_v10 = vpop.eup %8853 }
0x422f   :  { %v6574_v31 = vmul.f32 %v8854_v10, %v8850_v27 }
0x4230   :  { %v8856_v34 = vpop.eup %8855 }
0x4231   :  { %v6573_v11 = vmul.f32 %v8856_v34, %v8852_v37  ;;  %v8975_v34 = vld [vmem:[%s10681_s4 + $0xf0] sm:$0xff] }
0x4233   :  { %8573 = vmatprep.mubr.msk.f32.mxu0 %vm562_vm2, %v6573_v11  ;;  %v8976_v11 = vld [vmem:[%s10681_s4 + $0xe8] sm:$0xff] }
0x4234   :  { %8574 = vmatmul.mubr.msk.f32.vlgmr.msra.gmra.mxu0 %vm562_vm2, %v6574_v31  ;;  %v8977_v31 = vld [vmem:[%s10681_s4 + $0xe0] sm:$0xff] }
0x4235   :  { %8577 = vmatpush3.xpose.msk.msra.mxu0 %vm474_vm1, %v9481_v52  ;;  %8580 = vmatprep.mubr.msk.f32.mxu0 %vm474_vm1, %v6657_v21  ;;  %v10527_v52 = vld [vmem:[%s10681_s4 + $0xf8] sm:$0xff] }
0x4236   :  { %8578 = vmatprep.subr.msk.mxu0 %vm474_vm1, %v9488_v60  ;;  %v8978_v21 = vld [vmem:[%s10681_s4 + $0x138] sm:$0xff] }
0x4239   :  { %8579 = vmatpush3.xpose.msk.msra.mxu0 %vm474_vm1, %v9488_v60 }
0x423a   :  { %8597 = vmatprep.subr.mxu0 %v9555_v48 }
0x423c   :  { %8581 = vmatmul.mubr.msk.f32.vlgmr.msra.gmra.mxu0 %vm474_vm1, %v6659_v12 }
0x423d   :  { %8598 = vmatpush3.msra.mxu0 %v9555_v48 }
0x423e   :  { %8599 = vmatprep.subr.mxu0 %v9564_v6 }
0x423f   :  { %8600 = vmatpush3.msra.mxu0 %v9564_v6 }
0x4240   :  { %8604 = vmatprep.subr.mxu0 %v10527_v52 }
0x42f4   :  { %v10530_v30 = vpop.f32.mrf.mxu0 }
0x42f6   :  { %v10532_v60 = vpop.f32.mrf.mxu0 }
0x42fc   :  { %v8582_v8 = vpop.f32.mrf.mxu0 }
0x42fd   :  { %v6736_v33 = vadd.f32 %v10463_v35, %v8582_v8 }
0x42fe   :  { %v6730_v20 = vpop.f32.mrf.mxu0 }
0x42ff   :  { %v6731_v48 = vadd.f32 %v10469_v45, %v6730_v20  ;;  %v6742_v39 = vsel %vm562_vm2, %v6736_v33, -inf }
0x4300   :  { %6743 = vmax.xlane.f32.xlu0 %v6742_v39 }
0x4301   :  { %v6739_v6 = vsel %vm562_vm2, %v6731_v48, -inf }
0x4302   :  { %6740 = vmax.xlane.f32.xlu1 %v6739_v6 }
0x4389   :  { %v6744_v18 = vpop.xlane.xlu0 %6743 }
0x438a   :  { %v6746_v49 = vsub.f32 %v6736_v33, %v6744_v18 }
0x438b   :  { %v6741_v26 = vpop.xlane.xlu1 %6740 }
0x438c   :  { %v6749_v14 = vmul.f32 1.442695, %v6746_v49  ;;  %v6745_v44 = vsub.f32 %v6731_v48, %v6741_v26 }
0x438e   :  { %8857 = vpow2.f32 %v6749_v14  ;;  %v6747_v47 = vmul.f32 1.442695, %v6745_v44  ;;  %v8981_v44 = vld [vmem:[%s10681_s4 + $0x120] sm:$0xff] }
0x4390   :  { %8859 = vpow2.f32 %v6747_v47  ;;  %v8982_v47 = vld [vmem:[%s10681_s4 + $0x118] sm:$0xff] }
0x439b   :  { %v8858_v53 = vpop.eup %8857 }
0x439c   :  { %v6754_v13 = vsel %vm562_vm2, %v8858_v53, 0.0 }
0x439d   :  { %v8860_v43 = vpop.eup %8859  ;;  %6755 = vadd.xlane.f32.xlu0 %v6754_v13  ;;  %v8984_v13 = vld [vmem:[%s10681_s4 + $0x108] sm:$0xff] }
0x439e   :  { %v6751_v40 = vsel %vm562_vm2, %v8860_v43, 0.0 }
0x439f   :  { %6752 = vadd.xlane.f32.xlu1 %v6751_v40 }
0x43b0   :  { %6842 = vrot.lane.b32.xlu1 %v10447_v36, %s9017_s15  ;;  %v8971_v36 = vld [vmem:[%s10682_s5 + $0x18] sm:$0xff] }
0x43b3   :  { %6844 = vrot.lane.b32.xlu0 %v10449_v9, %s9017_s15 }
0x4426   :  { %v6756_v57 = vpop.xlane.xlu0 %6755 }
0x4427   :  { %8861 = vrcp.f32 %v6756_v57  ;;  %v8986_v57 = vld [vmem:[%s10683_s6 + $0x7] ss:$0 sm:$0xff] }
0x4428   :  { %v6753_v16 = vpop.xlane.xlu1 %6752 }
0x4429   :  { %8863 = vrcp.f32 %v6753_v16 }
0x442a   :  { %v6845_v9 = vpop.permute.xlu0 %6844 }
0x442c   :  { %v6843_v23 = vpop.permute.xlu1 %6842 }
0x4434   :  { %v8862_v63 = vpop.eup %8861 }
0x4435   :  { %v6760_v19 = vmul.f32 %v8862_v63, %v8858_v53  ;;  %v8983_v53 = vld [vmem:[%s10681_s4 + $0x110] sm:$0xff] }
0x4436   :  { %v8864_v4 = vpop.eup %8863 }
0x4437   :  { %v6759_v15 = vmul.f32 %v8864_v4, %v8860_v43  ;;  %v8985_v43 = vld [vmem:[%s10681_s4 + $0x100] sm:$0xff] }
0x4439   :  { %8587 = vmatprep.mubr.msk.f32.mxu1 %vm562_vm2, %v6759_v15 }
0x443a   :  { %8588 = vmatmul.mubr.msk.f32.vlgmr.msra.gmra.mxu1 %vm562_vm2, %v6760_v19 }
0x443b   :  { %8591 = vmatpush3.xpose.msk.msra.mxu1 %vm474_vm1, %v9527_v25  ;;  %8594 = vmatprep.mubr.msk.f32.mxu1 %vm474_vm1, %v6843_v23  ;;  %v8972_v25 = vld [vmem:[%s10682_s5 + $0x10] sm:$0xff] }
0x443c   :  { %8592 = vmatprep.subr.msk.mxu1 %vm474_vm1, %v9534_v38 }
0x443f   :  { %8593 = vmatpush3.xpose.msk.msra.mxu1 %vm474_vm1, %v9534_v38  ;;  %v8974_v38 = vld [vmem:[%s10682_s5] sm:$0xff] }
0x4440   :  { %8615 = vmatprep.subr.mxu1 %v8971_v36 }
0x4442   :  { %8595 = vmatmul.mubr.msk.f32.vlgmr.msra.gmra.mxu1 %vm474_vm1, %v6845_v9 }
0x4443   :  { %8616 = vmatpush3.msra.mxu1 %v8971_v36 }
0x4444   :  { %8617 = vmatprep.subr.mxu1 %v8972_v25 }
0x4445   :  { %8618 = vmatpush3.msra.mxu1 %v8972_v25 }
0x4446   :  { %8619 = vmatprep.subr.mxu1 %v8973_v50 }
0x4447   :  { %8620 = vmatpush3.msra.mxu1 %v8973_v50 }
0x4448   :  { %8621 = vmatprep.subr.mxu1 %v8974_v38 }
0x4449   :  { %8622 = vmatpush3.msra.mxu1 %v8974_v38 }
0x44fa   :  { %v8589_v1 = vpop.f32.mrf.mxu1 }
0x44fc   :  { %v6833_v29 = vpop.f32.mrf.mxu1 }
0x4502   :  { %v8596_v55 = vpop.f32.mrf.mxu1 }
0x4503   :  { %v6922_v46 = vadd.f32 %v10463_v35, %v8596_v55 }
0x4504   :  { %v6916_v32 = vpop.f32.mrf.mxu1 }
0x4505   :  { %v6917_v7 = vadd.f32 %v10469_v45, %v6916_v32  ;;  %v6928_v59 = vsel %vm562_vm2, %v6922_v46, -inf }
0x4506   :  { %6929 = vmax.xlane.f32.xlu0 %v6928_v59 }
0x4507   :  { %v6925_v5 = vsel %vm562_vm2, %v6917_v7, -inf }
0x4508   :  { %6926 = vmax.xlane.f32.xlu1 %v6925_v5 }
0x458f   :  { %v6930_v56 = vpop.xlane.xlu0 %6929 }
0x4590   :  { %v6932_v24 = vsub.f32 %v6922_v46, %v6930_v56 }
0x4591   :  { %v6927_v51 = vpop.xlane.xlu1 %6926 }
0x4592   :  { %v6935_v54 = vmul.f32 1.442695, %v6932_v24  ;;  %v6931_v58 = vsub.f32 %v6917_v7, %v6927_v51 }
0x4594   :  { %8865 = vpow2.f32 %v6935_v54  ;;  %v6933_v61 = vmul.f32 1.442695, %v6931_v58  ;;  %v8987_v58 = vld [vmem:[%s10683_s6 + $0xb] ss:$0 sm:$0xff] }
0x4596   :  { %8867 = vpow2.f32 %v6933_v61 }
0x45a1   :  { %v8866_v28 = vpop.eup %8865 }
0x45a2   :  { %v6940_v35 = vsel %vm562_vm2, %v8866_v28, 0.0 }
0x45a3   :  { %v8868_v27 = vpop.eup %8867  ;;  %6941 = vadd.xlane.f32.xlu0 %v6940_v35 }
0x45a4   :  { %v6937_v45 = vsel %vm562_vm2, %v8868_v27, 0.0 }
0x45a5   :  { %6938 = vadd.xlane.f32.xlu1 %v6937_v45 }
0x45b6   :  { %7030 = vrot.lane.b32.xlu1 %v10532_v60, %s9018_s1 }
0x45b9   :  { %7032 = vrot.lane.b32.xlu0 %v10530_v30, %s9018_s1 }
0x45ba   :  { %7038 = vrot.lane.b32.xlu1 %v6833_v29, %s9019_s25 }
0x45be   :  { %7040 = vrot.lane.b32.xlu1 %v8589_v1, %s9019_s25 }
0x462c   :  { %v6942_v22 = vpop.xlane.xlu0 %6941 }
0x462d   :  { %8869 = vrcp.f32 %v6942_v22 }
0x462e   :  { %v6939_v37 = vpop.xlane.xlu1 %6938 }
0x462f   :  { %8871 = vrcp.f32 %v6939_v37 }
0x4630   :  { %v7033_v33 = vpop.permute.xlu0 %7032 }
0x4631   :  { %v7053_v39 = vsel %vm474_vm1, %v10496_v42, %v7033_v33  ;;  %v8980_v42 = vld [vmem:[%s10681_s4 + $0x128] sm:$0xff] }
0x4632   :  { %v7031_v30 = vpop.permute.xlu1 %7030 }
0x4633   :  { %v7052_v20 = vsel %vm474_vm1, %v10498_v41, %v7031_v30  ;;  %v8979_v41 = vld [vmem:[%s10681_s4 + $0x130] sm:$0xff] }
0x4636   :  { %v7039_v60 = vpop.permute.xlu1 %7038 }
0x4637   :  { %v7054_v6 = vsel %vm562_vm2, %v7052_v20, %v7039_v60 }
0x463a   :  { %v8870_v62 = vpop.eup %8869  ;;  %v7041_v8 = vpop.permute.xlu1 %7040 }
0x463b   :  { %v6946_v10 = vmul.f32 %v8870_v62, %v8866_v28  ;;  %v7055_v49 = vsel %vm562_vm2, %v7053_v39, %v7041_v8 }
0x463c   :  { %v8872_v3 = vpop.eup %8871 }
0x463d   :  { %v6945_v2 = vmul.f32 %v8872_v3, %v8868_v27  ;;  %v8988_v27 = vld [vmem:[%s10683_s6 + $0xc] ss:$0 sm:$0xff]  ;;  %v8989_v3 = vld [vmem:[%s10683_s6 + $0x11] ss:$0 sm:$0xff] }
0x463f   :  { %8601 = vmatprep.mubr.msk.f32.mxu0 %vm562_vm2, %v6945_v2 }
0x4640   :  { %8602 = vmatmul.mubr.msk.f32.vlgmr.msra.gmra.mxu0 %vm562_vm2, %v6946_v10 }
0x4641   :  { %8605 = vmatpush3.msra.mxu0 %v10527_v52 }
0x4642   :  { %8606 = vmatprep.subr.mxu0 %v8975_v34 }
0x4643   :  { %8607 = vmatpush3.msra.mxu0 %v8975_v34 }
0x4644   :  { %8608 = vmatprep.subr.mxu0 %v8976_v11 }
0x4645   :  { %8609 = vmatpush3.msra.mxu0 %v8976_v11 }
0x4646   :  { %8610 = vmatprep.subr.mxu0 %v8977_v31 }
0x4647   :  { %8611 = vmatpush3.msra.mxu0 %v8977_v31 }
0x4648   :  { %8626 = vmatprep.subr.mxu0 %v8978_v21 }
0x4700   :  { %v8603_v12 = vpop.f32.mrf.mxu0 }
0x4701   :  { %7048 = vrot.lane.b32.xlu1 %v8603_v12, %s9020_s0  ;;  %v8990_v12 = vld [vmem:[%s10683_s6 + $0x8] ss:$0 sm:$0xff] }
0x4702   :  { %v7019_v52 = vpop.f32.mrf.mxu0 }
0x4703   :  { %7046 = vrot.lane.b32.xlu0 %v7019_v52, %s9020_s0 }
0x4773   :  { %v7049_v48 = vpop.permute.xlu1 %7048 }
0x4774   :  { %v7057_v14 = vsel %vm1296_vm3, %v7055_v49, %v7049_v48 }
0x4775   :  { %v7047_v18 = vpop.permute.xlu0 %7046 }
0x4776   :  { %v7056_v26 = vsel %vm1296_vm3, %v7054_v6, %v7047_v18 }
0x4777   :  { %8612 = vmatprep.mubr.msk.f32.mxu0 %vm44_vm0, %v7056_v26 }
0x4778   :  { %8613 = vmatmul.mubr.msk.f32.vlgmr.msra.gmra.mxu0 %vm44_vm0, %v7057_v14 }
0x4779   :  { %8627 = vmatpush3.msra.mxu0 %v8978_v21 }
0x477a   :  { %8628 = vmatprep.subr.mxu0 %v8979_v41 }
0x477b   :  { %8629 = vmatpush3.msra.mxu0 %v8979_v41 }
0x477c   :  { %8630 = vmatprep.subr.mxu0 %v8980_v42 }
0x477d   :  { %8631 = vmatpush3.msra.mxu0 %v8980_v42 }
0x477e   :  { %8632 = vmatprep.subr.mxu0 %v8981_v44 }
0x477f   :  { %8633 = vmatpush3.msra.mxu0 %v8981_v44 }
0x4780   :  { %8634 = vmatprep.subr.mxu0 %v8982_v47 }
0x4781   :  { %8635 = vmatpush3.msra.mxu0 %v8982_v47 }
0x4782   :  { %8636 = vmatprep.subr.mxu0 %v8983_v53 }
0x4783   :  { %8637 = vmatpush3.msra.mxu0 %v8983_v53 }
0x4784   :  { %8638 = vmatprep.subr.mxu0 %v8984_v13 }
0x4785   :  { %8639 = vmatpush3.msra.mxu0 %v8984_v13 }
0x4786   :  { %8640 = vmatprep.subr.mxu0 %v8985_v43 }
0x4787   :  { %8641 = vmatpush3.msra.mxu0 %v8985_v43 }
0x4838   :  { %v8614_v40 = vpop.f32.mrf.mxu0 }
0x4839   :  { %v7136_v16 = vadd.f32 %v8986_v57, %v8614_v40 }
0x483a   :  { %v7130_v63 = vpop.f32.mrf.mxu0 }
0x483b   :  { %v7140_v4 = vadd.f32 %v7136_v16, %v10435_v17  ;;  %v7131_v15 = vadd.f32 %v8986_v57, %v7130_v63 }
0x483d   :  { %v7139_v19 = vadd.f32 %v7131_v15, %v10431_v0  ;;  %v7144_v23 = vsel %vm44_vm0, %v7140_v4, 0.0 }
0x483e   :  { %7145 = vadd.xlane.f32.xlu1 %v7144_v23 }
0x483f   :  { %v7141_v36 = vsel %vm44_vm0, %v7139_v19, 0.0 }
0x4840   :  { %7142 = vadd.xlane.f32.xlu0 %v7141_v36 }
0x48c7   :  { %v7146_v9 = vpop.xlane.xlu1 %7145 }
0x48c8   :  { %v7148_v25 = vmul.f32 0.03125, %v7146_v9  ;;  %v8992_v9 = vld [vmem:[%s10683_s6 + $0xe] ss:$0 sm:$0xff] }
0x48c9   :  { %v7143_v50 = vpop.xlane.xlu0 %7142 }
0x48ca   :  { %v7147_v38 = vmul.f32 0.03125, %v7143_v50  ;;  %v7150_v1 = vsub.f32 %v7140_v4, %v7148_v25 }
0x48cc   :  { %v7149_v29 = vsub.f32 %v7139_v19, %v7147_v38  ;;  %v7152_v32 = vmul.f32 %v7150_v1, %v7150_v1  ;;  %v8991_v19 = vld [vmem:[%s10683_s6 + $0xd] ss:$0 sm:$0xff] }
0x48ce   :  { %v7151_v55 = vmul.f32 %v7149_v29, %v7149_v29  ;;  %v7156_v17 = vsel %vm44_vm0, %v7152_v32, 0.0 }
0x48d0   :  { %v7153_v46 = vsel %vm44_vm0, %v7151_v55, 0.0 }
0x48d1   :  { %7154 = vadd.xlane.f32.xlu0 %v7153_v46 }
0x48d5   :  { %7157 = vadd.xlane.f32.xlu0 %v7156_v17 }
0x495a   :  { %v7155_v0 = vpop.xlane.xlu0 %7154 }
0x495b   :  { %v7159_v7 = vmul.f32 0.03125, %v7155_v0 }
0x495d   :  { %v7161_v59 = vadd.f32 1e-05, %v7159_v7 }
0x495e   :  { %v7158_v5 = vpop.xlane.xlu0 %7157 }
0x495f   :  { %8873 = vrsqrt.f32 %v7161_v59  ;;  %v7160_v56 = vmul.f32 0.03125, %v7158_v5 }
0x4961   :  { %v7162_v24 = vadd.f32 1e-05, %v7160_v56 }
0x4963   :  { %8875 = vrsqrt.f32 %v7162_v24 }
0x496c   :  { %v8874_v51 = vpop.eup %8873 }
0x496d   :  { %v7165_v54 = vmul.f32 %v8874_v51, %v7149_v29 }
0x496f   :  { %v7167_v61 = vmul.f32 %v8987_v58, %v7165_v54 }
0x4970   :  { %v8876_v28 = vpop.eup %8875 }
0x4971   :  { %v7166_v35 = vmul.f32 %v8876_v28, %v7150_v1  ;;  %v7169_v45 = vadd.f32 %v8988_v27, %v7167_v61 }
0x4973   :  { %8623 = vmatprep.mubr.msk.f32.mxu1 %vm44_vm0, %v7169_v45  ;;  %v7168_v22 = vmul.f32 %v8987_v58, %v7166_v35 }
0x4975   :  { %v7170_v37 = vadd.f32 %v8988_v27, %v7168_v22 }
0x4977   :  { %8624 = vmatmul.mubr.msk.f32.vlgmr.msra.gmra.mxu1 %vm44_vm0, %v7170_v37 }
0x4a37   :  { %v8625_v62 = vpop.f32.mrf.mxu1 }
0x4a38   :  { %v7249_v2 = vadd.f32 %v8989_v3, %v8625_v62  ;;  %v7638_v62 = vld [vmem:[%s10683_s6 + $0x10] ss:$0 sm:$0xff] }
0x4a39   :  { %v7243_v10 = vpop.f32.mrf.mxu1 }
0x4a3a   :  { %v7244_v34 = vadd.f32 %v8989_v3, %v7243_v10  ;;  %v7253_v31 = vmax.f32 %v7249_v2, 0.0 }
0x4a3c   :  { %v7252_v11 = vmax.f32 %v7244_v34, 0.0 }
0x4a3e   :  { %8642 = vmatprep.mubr.msk.f32.mxu0 %vm2579_vm4, %v7252_v11 }
0x4a3f   :  { %8643 = vmatmul.mubr.msk.f32.vlgmr.msra.gmra.mxu0 %vm2579_vm4, %v7253_v31 }
0x4aff   :  { %v8644_v21 = vpop.f32.mrf.mxu0 }
0x4b00   :  { %v7332_v52 = vadd.f32 %v8990_v12, %v8644_v21 }
0x4b01   :  { %v7326_v30 = vpop.f32.mrf.mxu0 }
0x4b02   :  { %v7336_v60 = vadd.f32 %v7332_v52, %v7170_v37  ;;  %v7327_v8 = vadd.f32 %v8990_v12, %v7326_v30 }
0x4b04   :  { %v7335_v33 = vadd.f32 %v7327_v8, %v7169_v45  ;;  %v7340_v20 = vsel %vm44_vm0, %v7336_v60, 0.0  ;;  %v7637_v45 = vld [vmem:[%s10683_s6 + $0xf] ss:$0 sm:$0xff] }
0x4b05   :  { %7341 = vadd.xlane.f32.xlu0 %v7340_v20 }
0x4b06   :  { %v7337_v48 = vsel %vm44_vm0, %v7335_v33, 0.0 }
0x4b07   :  { %7338 = vadd.xlane.f32.xlu1 %v7337_v48 }
0x4b8e   :  { %v7342_v39 = vpop.xlane.xlu0 %7341 }
0x4b8f   :  { %v7344_v6 = vmul.f32 0.03125, %v7342_v39 }
0x4b90   :  { %v7339_v18 = vpop.xlane.xlu1 %7338 }
0x4b91   :  { %v7346_v49 = vsub.f32 %v7336_v60, %v7344_v6  ;;  %v7343_v26 = vmul.f32 0.03125, %v7339_v18 }
0x4b93   :  { %v7345_v14 = vsub.f32 %v7335_v33, %v7343_v26  ;;  %v7348_v41 = vmul.f32 %v7346_v49, %v7346_v49 }
0x4b95   :  { %v7352_v42 = vsel %vm44_vm0, %v7348_v41, 0.0  ;;  %v7347_v44 = vmul.f32 %v7345_v14, %v7345_v14 }
0x4b96   :  { %7353 = vadd.xlane.f32.xlu0 %v7352_v42 }
0x4b97   :  { %v7349_v47 = vsel %vm44_vm0, %v7347_v44, 0.0 }
0x4b98   :  { %7350 = vadd.xlane.f32.xlu1 %v7349_v47 }
0x4c1f   :  { %v7354_v53 = vpop.xlane.xlu0 %7353 }
0x4c20   :  { %v7356_v13 = vmul.f32 0.03125, %v7354_v53 }
0x4c21   :  { %v7351_v43 = vpop.xlane.xlu1 %7350 }
0x4c22   :  { %v7358_v40 = vadd.f32 1e-05, %v7356_v13  ;;  %v7355_v57 = vmul.f32 0.03125, %v7351_v43 }
0x4c24   :  { %8877 = vrsqrt.f32 %v7358_v40  ;;  %v7357_v16 = vadd.f32 1e-05, %v7355_v57 }
0x4c26   :  { %8879 = vrsqrt.f32 %v7357_v16 }
0x4c31   :  { %v8878_v63 = vpop.eup %8877 }
0x4c32   :  { %v7362_v4 = vmul.f32 %v8878_v63, %v7346_v49 }
0x4c33   :  { %v8880_v15 = vpop.eup %8879 }
0x4c34   :  { %v7364_v23 = vmul.f32 %v8991_v19, %v7362_v4  ;;  %v7361_v36 = vmul.f32 %v8880_v15, %v7345_v14 }
0x4c36   :  { %v7366_v25 = vadd.f32 %v8992_v9, %v7364_v23  ;;  %v7363_v50 = vmul.f32 %v8991_v19, %v7361_v36 }
0x4c38   :  { %v7370_v38 = vsel %vm44_vm0, %v7366_v25, 0.0  ;;  %v7365_v1 = vadd.f32 %v8992_v9, %v7363_v50 }
0x4c39   :  { %7371 = vadd.xlane.f32.xlu0 %v7370_v38 }
0x4c3a   :  { %v7367_v29 = vsel %vm44_vm0, %v7365_v1, 0.0 }
0x4c3b   :  { %7368 = vadd.xlane.f32.xlu1 %v7367_v29 }
0x4cc2   :  { %v7372_v55 = vpop.xlane.xlu0 %7371 }
0x4cc3   :  { %v7374_v46 = vmul.f32 0.03125, %v7372_v55 }
0x4cc4   :  { %v7369_v32 = vpop.xlane.xlu1 %7368 }
0x4cc5   :  { %v7376_v17 = vsub.f32 %v7366_v25, %v7374_v46  ;;  %v7373_v0 = vmul.f32 0.03125, %v7369_v32 }
0x4cc7   :  { %v7375_v7 = vsub.f32 %v7365_v1, %v7373_v0  ;;  %v7378_v59 = vmul.f32 %v7376_v17, %v7376_v17 }
0x4cc9   :  { %v7382_v5 = vsel %vm44_vm0, %v7378_v59, 0.0  ;;  %v7377_v56 = vmul.f32 %v7375_v7, %v7375_v7 }
0x4cca   :  { %7383 = vadd.xlane.f32.xlu0 %v7382_v5 }
0x4ccb   :  { %v7379_v24 = vsel %vm44_vm0, %v7377_v56, 0.0 }
0x4ccc   :  { %7380 = vadd.xlane.f32.xlu1 %v7379_v24 }
0x4d53   :  { %v7384_v51 = vpop.xlane.xlu0 %7383 }
0x4d54   :  { %v7386_v54 = vmul.f32 0.03125, %v7384_v51 }
0x4d55   :  { %v7381_v58 = vpop.xlane.xlu1 %7380 }
0x4d56   :  { %v7388_v61 = vadd.f32 1e-05, %v7386_v54  ;;  %v7385_v28 = vmul.f32 0.03125, %v7381_v58 }
0x4d58   :  { %8881 = vrsqrt.f32 %v7388_v61  ;;  %v7387_v35 = vadd.f32 1e-05, %v7385_v28 }
0x4d5a   :  { %8883 = vrsqrt.f32 %v7387_v35 }
0x4d65   :  { %v8882_v27 = vpop.eup %8881 }
0x4d66   :  { %v7392_v22 = vmul.f32 %v8882_v27, %v7376_v17 }
0x4d67   :  { %v8884_v37 = vpop.eup %8883 }
0x4d68   :  { %v7391_v3 = vmul.f32 %v8884_v37, %v7375_v7  ;;  %v7399_v2 = vmul.f32 %v7637_v45, %v7392_v22 }
0x4d6a   :  { %v7398_v10 = vmul.f32 %v7637_v45, %v7391_v3  ;;  %v7406_v34 = vadd.f32 %v7638_v62, %v7399_v2 }
0x4d6c   :  { %v7405_v11 = vadd.f32 %v7638_v62, %v7398_v10  ;;  %7408 = vst.msk [vmem:[#allocation2 + $0x8] sm:$0xff] %vm44_vm0, %v7406_v34 }
0x4d6e   :  { %7407 = vst.msk [vmem:[#allocation2] sm:$0xff] %vm44_vm0, %v7405_v11 }
0x4d6f   :  { %9004 = shalt.err (!%p9001_p4)
}
0x4d70   :  { %s9022_s6 = smov 128  }
0x4d71   :  { %7420 = dma.vmem_to_hbm [thread:$0]  %s7415_s28, 256, %s10684_s7, [#allocation3], %s9022_s6, %s9022_s6, %s9018_s1  }
0x4d72   :  { %9013 = dma.done.wait [#allocation3], 256  }
0x4d73   :  { %9014 = vsyncadd [#allocation3], 4294967040 }
0x4d74   :  { %7424 = vsyncpa [#allocation3], 1 }

</bundles_post_ra>
